<compile_context>
chip_gen: v7x
topology: tpu7x:2x2x1
jax: 0.10.0
libtpu: 0.0.40
codegen_flags: <defaults>
</compile_context>

<pallas_src>
import functools

import jax
import jax.numpy as jnp
from jax.experimental import pallas as pl
from jax.experimental.pallas import tpu as pltpu


# ------------------------------ model config --------------------------------

NUM_HEADS = 4
NUM_LAYERS = 2
HIDDEN = 32
INTERMEDIATE = 64
FFN_PAD = 128           # FFN intermediate zero-padded to 128 lanes (exact)
CONV_FILTERS = 64       # true Conv1d output channels
CONV_KERNEL = 3
CONV_PAD_C = 128        # conv channels padded to 128 -> lane-dense store
VOCAB = 100
MAX_POS = 16
TYPE_VOCAB = 2


# --------------------------- fused Pallas kernel -----------------------------

def _bert2cnn_kernel(x_ref, bias_ref, emb_g_ref, emb_b_ref,
                     wq_ref, bq_ref, wk_ref, bk_ref, wv_ref, bv_ref,
                     wo_ref, bo_ref, ln1g_ref, ln1b_ref,
                     w1_ref, b1_ref, w2_ref, b2_ref, ln2g_ref, ln2b_ref,
                     wconv_ref, bconv_ref, shift_ref, out_ref,
                     *, num_layers, num_heads, batch, seq_len, conv_k):
    B, S = batch, seq_len

    def mm(a, w):
        # bf16 operands on the MXU, f32 accumulation (weights are pre-cast).
        return jnp.dot(a.astype(jnp.bfloat16), w.astype(jnp.bfloat16),
                       preferred_element_type=jnp.float32)

    def ln(v, g, b, eps=1e-12):
        mu = jnp.mean(v, axis=-1, keepdims=True)
        var = jnp.mean(jnp.square(v - mu), axis=-1, keepdims=True)
        return (v - mu) * jax.lax.rsqrt(var + eps) * g + b

    # Additive attention bias [B*S, B*S] (key-padding + cross-batch blocking),
    # built host-side and hoisted out of the layer/head loops.
    attn_bias = bias_ref[...]

    # --- BERT embedding LayerNorm (embedding gathers stay at JAX level) -----
    x = ln(x_ref[...], emb_g_ref[...], emb_b_ref[...])        # [B*S, H] f32

    # --- encoder layers (static unroll; weights stacked on leading axes) ----
    for l in range(num_layers):
        attn = None
        for h in range(num_heads):
            w_idx = l * num_heads + h
            # Per-head projections: no fused-QKV lane slices, no head split.
            qh = mm(x, wq_ref[w_idx]) + bq_ref[w_idx]          # [B*S, Dh]
            kh = mm(x, wk_ref[w_idx]) + bk_ref[w_idx]
            vh = mm(x, wv_ref[w_idx]) + bv_ref[w_idx]
            # One 2-D score matmul covers every batch row at once; the
            # additive bias removes cross-batch and masked-key positions.
            # 1/sqrt(Dh) is folded into wq.  q @ k^T without a transpose.
            s = jax.lax.dot_general(qh, kh, (((1,), (1,)), ((), ())),
                                    preferred_element_type=jnp.float32)
            s = s + attn_bias                                  # [B*S, B*S]
            s = s - jnp.max(s, axis=-1, keepdims=True)
            p = jnp.exp(s)
            p = p * pl.reciprocal(jnp.sum(p, axis=-1, keepdims=True),
                                  approx=True)                 # EUP divide
            ctx = jnp.dot(p, vh, preferred_element_type=jnp.float32)
            # Per-head output projection accumulated straight into the
            # residual slab (replaces head concat + merged matmul).
            o = mm(ctx, wo_ref[w_idx])                         # [B*S, H]
            attn = o if attn is None else attn + o
        x = ln(x + attn + bo_ref[l], ln1g_ref[l], ln1b_ref[l])

        # FFN; intermediate zero-padded to 128 lanes (semantics exact).
        # TODO(synk): HF BERT uses exact erf GELU; tanh approximation here.
        hmid = jax.nn.gelu(mm(x, w1_ref[l]) + b1_ref[l], approximate=True)
        ffn = mm(hmid, w2_ref[l]) + b2_ref[l]
        x = ln(x + ffn, ln2g_ref[l], ln2b_ref[l])

    # --- TextCNN head: Conv1d('same', K) as sum_k (Shift_k @ X) @ W_k, ReLU,
    #     then a per-batch max over sequence positions (sublane reduce). -----
    y = mm(mm(shift_ref[0], x), wconv_ref[0]) + bconv_ref[...]
    for k in range(1, conv_k):
        y = y + mm(mm(shift_ref[k], x), wconv_ref[k])          # [B*S, C_pad]
    y = jnp.maximum(y, 0.0)                                    # ReLU
    # TODO(synk): pooling runs over masked/pad positions too, matching a CNN
    # head that is unaware of the attention mask.
    out_ref[...] = jnp.max(y.reshape(B, S, -1), axis=1)        # [B, C_pad]


def fused_bert2cnn(x, attn_bias, shifts, p, *, batch, seq_len):
    """x: [B*S, H] post-embedding activations; attn_bias: [B*S, B*S] additive
    attention bias; shifts: [K, B*S, B*S] boundary-masked conv shift matrices."""
    L = p["w1"].shape[0]
    nh = p["wq"].shape[0] // L
    K = shifts.shape[0]
    c_pad = p["conv_w"].shape[2]

    kernel = functools.partial(
        _bert2cnn_kernel, num_layers=L, num_heads=nh, batch=batch,
        seq_len=seq_len, conv_k=K)

    inputs = (x, attn_bias,
              p["emb_ln_g"], p["emb_ln_b"],
              p["wq"], p["bq"], p["wk"], p["bk"], p["wv"], p["bv"],
              p["wo"], p["bo"], p["ln1_g"], p["ln1_b"],
              p["w1"], p["b1"], p["w2"], p["b2"], p["ln2_g"], p["ln2_b"],
              p["conv_w"], p["conv_b"], shifts)

    def full_spec(a):
        # Whole (tiny) array resident in VMEM for the single grid step.
        return pl.BlockSpec(a.shape, lambda i, n=a.ndim: (0,) * n)

    # VMEM budget derived from actual resident bytes (inputs + output) with a
    # double-buffer / temporaries factor, not a magic constant; clamped to a
    # window well under every chip generation's physical VMEM.
    resident = sum(a.size * a.dtype.itemsize for a in inputs)
    resident += batch * c_pad * 4
    vmem_limit = int(min(56 * 2**20, max(8 * 2**20, 4 * resident)))

    return pl.pallas_call(
        kernel,
        out_shape=jax.ShapeDtypeStruct((batch, c_pad), jnp.float32),
        grid=(1,),
        in_specs=[full_spec(a) for a in inputs],
        out_specs=pl.BlockSpec((batch, c_pad), lambda i: (0, 0)),
        compiler_params=pltpu.CompilerParams(
            dimension_semantics=("arbitrary",),
            vmem_limit_bytes=vmem_limit),
    )(*inputs)


# ----------------------------- params & forward ------------------------------

def init_params(key):
    std = 0.02
    keys = iter(jax.random.split(key, 32))

    def nrm(shape):
        return (std * jax.random.normal(next(keys), shape)).astype(jnp.float32)

    def bf(a):
        return a.astype(jnp.bfloat16)

    H, I, L, nh, K = HIDDEN, INTERMEDIATE, NUM_LAYERS, NUM_HEADS, CONV_KERNEL
    Dh = H // nh
    scale = 1.0 / (Dh ** 0.5)

    # Conv1d weight [K, H, C]; channels zero-padded to 128 for a lane-dense
    # output store.  TODO(synk): when loading real torch weights, permute from
    # PyTorch Conv1d layout [C_out, C_in, K] to [K, C_in, C_out].
    conv_w = nrm((K, H, CONV_FILTERS))
    conv_w = jnp.pad(conv_w, ((0, 0), (0, 0), (0, CONV_PAD_C - CONV_FILTERS)))

    # FFN intermediate zero-padded 64 -> 128 lanes (exact: gelu(0)=0 and the
    # padded w2 rows are zero).
    w1 = jnp.pad(nrm((L, H, I)), ((0, 0), (0, 0), (0, FFN_PAD - I)))
    w2 = jnp.pad(nrm((L, I, H)), ((0, 0), (0, FFN_PAD - I), (0, 0)))

    return {
        "word_emb": nrm((VOCAB, H)),
        "pos_emb": nrm((MAX_POS, H)),
        "type_emb": nrm((TYPE_VOCAB, H)),
        "emb_ln_g": jnp.ones((1, H), jnp.float32),
        "emb_ln_b": jnp.zeros((1, H), jnp.float32),
        # Per-(layer, head) projection weights on a merged leading axis so the
        # kernel indexes a single static leading dim.  All matmul weights are
        # pre-cast to bf16 (halves DMA/VMEM bytes, no in-kernel cast work).
        # 1/sqrt(Dh) is folded into the Q weights (a real q-bias must also be
        # pre-scaled; here it is zero).
        "wq": bf(nrm((L * nh, H, Dh)) * scale),
        "bq": jnp.zeros((L * nh, 1, Dh), jnp.float32),
        "wk": bf(nrm((L * nh, H, Dh))),
        "bk": jnp.zeros((L * nh, 1, Dh), jnp.float32),
        "wv": bf(nrm((L * nh, H, Dh))),
        "bv": jnp.zeros((L * nh, 1, Dh), jnp.float32),
        "wo": bf(nrm((L * nh, Dh, H))),
        "bo": jnp.zeros((L, 1, H), jnp.float32),
        "ln1_g": jnp.ones((L, 1, H), jnp.float32),
        "ln1_b": jnp.zeros((L, 1, H), jnp.float32),
        "w1": bf(w1),
        "b1": jnp.zeros((L, 1, FFN_PAD), jnp.float32),
        "w2": bf(w2),
        "b2": jnp.zeros((L, 1, H), jnp.float32),
        "ln2_g": jnp.ones((L, 1, H), jnp.float32),
        "ln2_b": jnp.zeros((L, 1, H), jnp.float32),
        "conv_w": bf(conv_w),
        "conv_b": jnp.zeros((1, CONV_PAD_C), jnp.float32),
    }


def bert2cnn_forward(params, input_ids, token_type_ids, attention_mask):
    B, S = input_ids.shape
    H = params["word_emb"].shape[1]
    BS = B * S

    # TODO(synk): embedding-table gathers stay at JAX level (a few-row
    # data-dependent gather has no worthwhile tiled Pallas pattern here).
    pos_ids = jnp.arange(S)
    x = (params["word_emb"][input_ids]
         + params["pos_emb"][pos_ids][None, :, :]
         + params["type_emb"][token_type_ids]).reshape(BS, H)

    # Additive attention bias [B*S, B*S]: BERT key-padding mask (-10000 on
    # masked keys) plus a large negative on cross-batch entries so one fused
    # 2-D score matmul per head covers every batch row at once.
    key_bias = ((1.0 - attention_mask.astype(jnp.float32)) * -10000.0
                ).reshape(1, BS)
    row_b = jnp.repeat(jnp.arange(BS) // S, 1)
    same_batch = (row_b[:, None] // 1) == (row_b[None, :] // 1)
    same_batch = (jnp.arange(BS)[:, None] // S) == (jnp.arange(BS)[None, :] // S)
    attn_bias = jnp.where(same_batch,
                          jnp.broadcast_to(key_bias, (BS, BS)),
                          jnp.float32(-1e9))

    # Boundary-masked shift matrices for the 'same'-padded Conv1d: row t of
    # Shift_k selects x[t + k - pad_l] when it lies in the same batch, else 0.
    K = params["conv_w"].shape[0]
    pad_l = (K - 1) // 2
    idx = jnp.arange(BS)
    shift_list = []
    for k in range(K):
        src = idx + (k - pad_l)
        valid = (src >= 0) & (src < BS) & (src // S == idx // S)
        shift_list.append(((src[:, None] == idx[None, :]) & valid[:, None]
                           ).astype(jnp.bfloat16))
    shifts = jnp.stack(shift_list)                       # [K, B*S, B*S]

    out_padded = fused_bert2cnn(x, attn_bias, shifts, params,
                                batch=B, seq_len=S)      # [B, 128]
    return out_padded[:, :CONV_FILTERS]                  # drop channel padding


# ----------------------------------- main ------------------------------------

if __name__ == "__main__":
    B, S = 2, 8
    key = jax.random.PRNGKey(0)
    pkey, ikey = jax.random.split(key)

    params = init_params(pkey)
    input_ids = jax.random.randint(ikey, (B, S), 0, VOCAB, dtype=jnp.int32)
    token_type_ids = jnp.zeros((B, S), jnp.int32)
    attention_mask = jnp.ones((B, S), jnp.int32)

    fwd = jax.jit(bert2cnn_forward)
    out = fwd(params, input_ids, token_type_ids, attention_mask)
    out = jax.block_until_ready(out)
    assert out.shape == (B, CONV_FILTERS) and out.dtype == jnp.float32
    print("KERNEL_OK")
</pallas_src>

<mosaic_0001>
module attributes {stable_mosaic.version = 11 : i64} {
  func.func @_bert2cnn_kernel(%arg0: i32, %arg1: memref<16x32xf32, #tpu.memory_space<vmem>>, %arg2: memref<16x16xf32, #tpu.memory_space<vmem>>, %arg3: memref<1x32xf32, #tpu.memory_space<vmem>>, %arg4: memref<1x32xf32, #tpu.memory_space<vmem>>, %arg5: memref<8x32x8xbf16, #tpu.memory_space<vmem>>, %arg6: memref<8x1x8xf32, #tpu.memory_space<vmem>>, %arg7: memref<8x32x8xbf16, #tpu.memory_space<vmem>>, %arg8: memref<8x1x8xf32, #tpu.memory_space<vmem>>, %arg9: memref<8x32x8xbf16, #tpu.memory_space<vmem>>, %arg10: memref<8x1x8xf32, #tpu.memory_space<vmem>>, %arg11: memref<8x8x32xbf16, #tpu.memory_space<vmem>>, %arg12: memref<2x1x32xf32, #tpu.memory_space<vmem>>, %arg13: memref<2x1x32xf32, #tpu.memory_space<vmem>>, %arg14: memref<2x1x32xf32, #tpu.memory_space<vmem>>, %arg15: memref<2x32x128xbf16, #tpu.memory_space<vmem>>, %arg16: memref<2x1x128xf32, #tpu.memory_space<vmem>>, %arg17: memref<2x128x32xbf16, #tpu.memory_space<vmem>>, %arg18: memref<2x1x32xf32, #tpu.memory_space<vmem>>, %arg19: memref<2x1x32xf32, #tpu.memory_space<vmem>>, %arg20: memref<2x1x32xf32, #tpu.memory_space<vmem>>, %arg21: memref<3x32x128xbf16, #tpu.memory_space<vmem>>, %arg22: memref<1x128xf32, #tpu.memory_space<vmem>>, %arg23: memref<3x16x16xbf16, #tpu.memory_space<vmem>>, %arg24: memref<2x128xf32, #tpu.memory_space<vmem>>) attributes {dimension_semantics = [#tpu.dimension_semantics<arbitrary>], iteration_bounds = array<i64: 1>, scalar_prefetch = 0 : i64, scratch_operands = 0 : i64, tpu.core_type = #tpu.core_type<tc>, window_params = [{pipeline_mode = #tpu.pipeline_mode<synchronous>, transform_indices = @transform_0, window_bounds = array<i64: 16, 32>}, {pipeline_mode = #tpu.pipeline_mode<synchronous>, transform_indices = @transform_1, window_bounds = array<i64: 16, 16>}, {pipeline_mode = #tpu.pipeline_mode<synchronous>, transform_indices = @transform_2, window_bounds = array<i64: 1, 32>}, {pipeline_mode = #tpu.pipeline_mode<synchronous>, transform_indices = @transform_3, window_bounds = array<i64: 1, 32>}, {pipeline_mode = #tpu.pipeline_mode<synchronous>, transform_indices = @transform_4, window_bounds = array<i64: 8, 32, 8>}, {pipeline_mode = #tpu.pipeline_mode<synchronous>, transform_indices = @transform_5, window_bounds = array<i64: 8, 1, 8>}, {pipeline_mode = #tpu.pipeline_mode<synchronous>, transform_indices = @transform_6, window_bounds = array<i64: 8, 32, 8>}, {pipeline_mode = #tpu.pipeline_mode<synchronous>, transform_indices = @transform_7, window_bounds = array<i64: 8, 1, 8>}, {pipeline_mode = #tpu.pipeline_mode<synchronous>, transform_indices = @transform_8, window_bounds = array<i64: 8, 32, 8>}, {pipeline_mode = #tpu.pipeline_mode<synchronous>, transform_indices = @transform_9, window_bounds = array<i64: 8, 1, 8>}, {pipeline_mode = #tpu.pipeline_mode<synchronous>, transform_indices = @transform_10, window_bounds = array<i64: 8, 8, 32>}, {pipeline_mode = #tpu.pipeline_mode<synchronous>, transform_indices = @transform_11, window_bounds = array<i64: 2, 1, 32>}, {pipeline_mode = #tpu.pipeline_mode<synchronous>, transform_indices = @transform_12, window_bounds = array<i64: 2, 1, 32>}, {pipeline_mode = #tpu.pipeline_mode<synchronous>, transform_indices = @transform_13, window_bounds = array<i64: 2, 1, 32>}, {pipeline_mode = #tpu.pipeline_mode<synchronous>, transform_indices = @transform_14, window_bounds = array<i64: 2, 32, 128>}, {pipeline_mode = #tpu.pipeline_mode<synchronous>, transform_indices = @transform_15, window_bounds = array<i64: 2, 1, 128>}, {pipeline_mode = #tpu.pipeline_mode<synchronous>, transform_indices = @transform_16, window_bounds = array<i64: 2, 128, 32>}, {pipeline_mode = #tpu.pipeline_mode<synchronous>, transform_indices = @transform_17, window_bounds = array<i64: 2, 1, 32>}, {pipeline_mode = #tpu.pipeline_mode<synchronous>, transform_indices = @transform_18, window_bounds = array<i64: 2, 1, 32>}, {pipeline_mode = #tpu.pipeline_mode<synchronous>, transform_indices = @transform_19, window_bounds = array<i64: 2, 1, 32>}, {pipeline_mode = #tpu.pipeline_mode<synchronous>, transform_indices = @transform_20, window_bounds = array<i64: 3, 32, 128>}, {pipeline_mode = #tpu.pipeline_mode<synchronous>, transform_indices = @transform_21, window_bounds = array<i64: 1, 128>}, {pipeline_mode = #tpu.pipeline_mode<synchronous>, transform_indices = @transform_22, window_bounds = array<i64: 3, 16, 16>}, {pipeline_mode = #tpu.pipeline_mode<synchronous>, transform_indices = @transform_23, window_bounds = array<i64: 2, 128>}]} {
    %c0 = arith.constant 0 : index
    %c0_0 = arith.constant 0 : index
    %0 = vector.load %arg2[%c0, %c0_0] : memref<16x16xf32, #tpu.memory_space<vmem>>, vector<16x16xf32>
    %c0_1 = arith.constant 0 : index
    %c0_2 = arith.constant 0 : index
    %1 = vector.load %arg1[%c0_1, %c0_2] : memref<16x32xf32, #tpu.memory_space<vmem>>, vector<16x32xf32>
    %c0_3 = arith.constant 0 : index
    %c0_4 = arith.constant 0 : index
    %2 = vector.load %arg3[%c0_3, %c0_4] : memref<1x32xf32, #tpu.memory_space<vmem>>, vector<1x32xf32>
    %c0_5 = arith.constant 0 : index
    %c0_6 = arith.constant 0 : index
    %3 = vector.load %arg4[%c0_5, %c0_6] : memref<1x32xf32, #tpu.memory_space<vmem>>, vector<1x32xf32>
    %cst = arith.constant dense<0.000000e+00> : vector<16xf32>
    %4 = vector.multi_reduction <add>, %1, %cst [1] : vector<16x32xf32> to vector<16xf32>
    %5 = vector.shape_cast %4 : vector<16xf32> to vector<16x1xf32>
    %cst_7 = arith.constant 3.200000e+01 : f32
    %6 = vector.broadcast %cst_7 : f32 to vector<16x1xf32>
    %7 = arith.divf %5, %6 : vector<16x1xf32>
    %8 = vector.broadcast %7 : vector<16x1xf32> to vector<16x32xf32>
    %9 = arith.subf %1, %8 : vector<16x32xf32>
    %10 = arith.mulf %9, %9 : vector<16x32xf32>
    %cst_8 = arith.constant dense<0.000000e+00> : vector<16xf32>
    %11 = vector.multi_reduction <add>, %10, %cst_8 [1] : vector<16x32xf32> to vector<16xf32>
    %12 = vector.shape_cast %11 : vector<16xf32> to vector<16x1xf32>
    %cst_9 = arith.constant 3.200000e+01 : f32
    %13 = vector.broadcast %cst_9 : f32 to vector<16x1xf32>
    %14 = arith.divf %12, %13 : vector<16x1xf32>
    %15 = vector.broadcast %7 : vector<16x1xf32> to vector<16x32xf32>
    %16 = arith.subf %1, %15 : vector<16x32xf32>
    %cst_10 = arith.constant 9.99999996E-13 : f32
    %17 = vector.broadcast %cst_10 : f32 to vector<16x1xf32>
    %18 = arith.addf %14, %17 : vector<16x1xf32>
    %19 = math.rsqrt %18 : vector<16x1xf32>
    %20 = vector.broadcast %19 : vector<16x1xf32> to vector<16x32xf32>
    %21 = arith.mulf %16, %20 : vector<16x32xf32>
    %22 = vector.broadcast %2 : vector<1x32xf32> to vector<16x32xf32>
    %23 = arith.mulf %21, %22 : vector<16x32xf32>
    %24 = vector.broadcast %3 : vector<1x32xf32> to vector<16x32xf32>
    %25 = arith.addf %23, %24 : vector<16x32xf32>
    %c0_11 = arith.constant 0 : index
    %c0_12 = arith.constant 0 : index
    %c0_13 = arith.constant 0 : index
    %26 = vector.load %arg5[%c0_11, %c0_12, %c0_13] : memref<8x32x8xbf16, #tpu.memory_space<vmem>>, vector<1x32x8xbf16>
    %27 = vector.shape_cast %26 : vector<1x32x8xbf16> to vector<32x8xbf16>
    %28 = arith.truncf %25 : vector<16x32xf32> to vector<16x32xbf16>
    %cst_14 = arith.constant dense<0.000000e+00> : vector<16x8xf32>
    %29 = tpu.matmul %28, %27, %cst_14 {dimension_numbers = #tpu.dot_dimension_numbers<[1], [0], [0], [1], [0, 0, 1, 1], [], []>} : vector<16x32xbf16>, vector<32x8xbf16>, vector<16x8xf32> -> vector<16x8xf32>
    %c0_15 = arith.constant 0 : index
    %c0_16 = arith.constant 0 : index
    %c0_17 = arith.constant 0 : index
    %30 = vector.load %arg6[%c0_15, %c0_16, %c0_17] : memref<8x1x8xf32, #tpu.memory_space<vmem>>, vector<1x1x8xf32>
    %31 = vector.shape_cast %30 : vector<1x1x8xf32> to vector<1x8xf32>
    %32 = vector.broadcast %31 : vector<1x8xf32> to vector<16x8xf32>
    %33 = arith.addf %29, %32 : vector<16x8xf32>
    %c0_18 = arith.constant 0 : index
    %c0_19 = arith.constant 0 : index
    %c0_20 = arith.constant 0 : index
    %34 = vector.load %arg7[%c0_18, %c0_19, %c0_20] : memref<8x32x8xbf16, #tpu.memory_space<vmem>>, vector<1x32x8xbf16>
    %35 = vector.shape_cast %34 : vector<1x32x8xbf16> to vector<32x8xbf16>
    %36 = arith.truncf %25 : vector<16x32xf32> to vector<16x32xbf16>
    %cst_21 = arith.constant dense<0.000000e+00> : vector<16x8xf32>
    %37 = tpu.matmul %36, %35, %cst_21 {dimension_numbers = #tpu.dot_dimension_numbers<[1], [0], [0], [1], [0, 0, 1, 1], [], []>} : vector<16x32xbf16>, vector<32x8xbf16>, vector<16x8xf32> -> vector<16x8xf32>
    %c0_22 = arith.constant 0 : index
    %c0_23 = arith.constant 0 : index
    %c0_24 = arith.constant 0 : index
    %38 = vector.load %arg8[%c0_22, %c0_23, %c0_24] : memref<8x1x8xf32, #tpu.memory_space<vmem>>, vector<1x1x8xf32>
    %39 = vector.shape_cast %38 : vector<1x1x8xf32> to vector<1x8xf32>
    %40 = vector.broadcast %39 : vector<1x8xf32> to vector<16x8xf32>
    %41 = arith.addf %37, %40 : vector<16x8xf32>
    %c0_25 = arith.constant 0 : index
    %c0_26 = arith.constant 0 : index
    %c0_27 = arith.constant 0 : index
    %42 = vector.load %arg9[%c0_25, %c0_26, %c0_27] : memref<8x32x8xbf16, #tpu.memory_space<vmem>>, vector<1x32x8xbf16>
    %43 = vector.shape_cast %42 : vector<1x32x8xbf16> to vector<32x8xbf16>
    %44 = arith.truncf %25 : vector<16x32xf32> to vector<16x32xbf16>
    %cst_28 = arith.constant dense<0.000000e+00> : vector<16x8xf32>
    %45 = tpu.matmul %44, %43, %cst_28 {dimension_numbers = #tpu.dot_dimension_numbers<[1], [0], [0], [1], [0, 0, 1, 1], [], []>} : vector<16x32xbf16>, vector<32x8xbf16>, vector<16x8xf32> -> vector<16x8xf32>
    %c0_29 = arith.constant 0 : index
    %c0_30 = arith.constant 0 : index
    %c0_31 = arith.constant 0 : index
    %46 = vector.load %arg10[%c0_29, %c0_30, %c0_31] : memref<8x1x8xf32, #tpu.memory_space<vmem>>, vector<1x1x8xf32>
    %47 = vector.shape_cast %46 : vector<1x1x8xf32> to vector<1x8xf32>
    %48 = vector.broadcast %47 : vector<1x8xf32> to vector<16x8xf32>
    %49 = arith.addf %45, %48 : vector<16x8xf32>
    %cst_32 = arith.constant dense<0.000000e+00> : vector<16x16xf32>
    %50 = tpu.matmul %33, %41, %cst_32 {dimension_numbers = #tpu.dot_dimension_numbers<[1], [1], [0], [0], [0, 0, 1, 0], [], []>} : vector<16x8xf32>, vector<16x8xf32>, vector<16x16xf32> -> vector<16x16xf32>
    %51 = arith.addf %50, %0 : vector<16x16xf32>
    %cst_33 = arith.constant dense<0xFF800000> : vector<16xf32>
    %52 = vector.multi_reduction <maximumf>, %51, %cst_33 [1] : vector<16x16xf32> to vector<16xf32>
    %53 = vector.shape_cast %52 : vector<16xf32> to vector<16x1xf32>
    %54 = vector.broadcast %53 : vector<16x1xf32> to vector<16x16xf32>
    %55 = arith.subf %51, %54 : vector<16x16xf32>
    %56 = math.exp %55 : vector<16x16xf32>
    %cst_34 = arith.constant dense<0.000000e+00> : vector<16xf32>
    %57 = vector.multi_reduction <add>, %56, %cst_34 [1] : vector<16x16xf32> to vector<16xf32>
    %58 = vector.shape_cast %57 : vector<16xf32> to vector<16x1xf32>
    %59 = tpu.reciprocal %58 {approx = true} : vector<16x1xf32> -> vector<16x1xf32>
    %60 = vector.broadcast %59 : vector<16x1xf32> to vector<16x16xf32>
    %61 = arith.mulf %56, %60 : vector<16x16xf32>
    %cst_35 = arith.constant dense<0.000000e+00> : vector<16x8xf32>
    %62 = tpu.matmul %61, %49, %cst_35 {dimension_numbers = #tpu.dot_dimension_numbers<[1], [0], [0], [1], [0, 0, 1, 1], [], []>} : vector<16x16xf32>, vector<16x8xf32>, vector<16x8xf32> -> vector<16x8xf32>
    %c0_36 = arith.constant 0 : index
    %c0_37 = arith.constant 0 : index
    %c0_38 = arith.constant 0 : index
    %63 = vector.load %arg11[%c0_36, %c0_37, %c0_38] : memref<8x8x32xbf16, #tpu.memory_space<vmem>>, vector<1x8x32xbf16>
    %64 = vector.shape_cast %63 : vector<1x8x32xbf16> to vector<8x32xbf16>
    %65 = arith.truncf %62 : vector<16x8xf32> to vector<16x8xbf16>
    %cst_39 = arith.constant dense<0.000000e+00> : vector<16x32xf32>
    %66 = tpu.matmul %65, %64, %cst_39 {dimension_numbers = #tpu.dot_dimension_numbers<[1], [0], [0], [1], [0, 0, 1, 1], [], []>} : vector<16x8xbf16>, vector<8x32xbf16>, vector<16x32xf32> -> vector<16x32xf32>
    %c1 = arith.constant 1 : index
    %c0_40 = arith.constant 0 : index
    %c0_41 = arith.constant 0 : index
    %67 = vector.load %arg5[%c1, %c0_40, %c0_41] : memref<8x32x8xbf16, #tpu.memory_space<vmem>>, vector<1x32x8xbf16>
    %68 = vector.shape_cast %67 : vector<1x32x8xbf16> to vector<32x8xbf16>
    %69 = arith.truncf %25 : vector<16x32xf32> to vector<16x32xbf16>
    %cst_42 = arith.constant dense<0.000000e+00> : vector<16x8xf32>
    %70 = tpu.matmul %69, %68, %cst_42 {dimension_numbers = #tpu.dot_dimension_numbers<[1], [0], [0], [1], [0, 0, 1, 1], [], []>} : vector<16x32xbf16>, vector<32x8xbf16>, vector<16x8xf32> -> vector<16x8xf32>
    %c1_43 = arith.constant 1 : index
    %c0_44 = arith.constant 0 : index
    %c0_45 = arith.constant 0 : index
    %71 = vector.load %arg6[%c1_43, %c0_44, %c0_45] : memref<8x1x8xf32, #tpu.memory_space<vmem>>, vector<1x1x8xf32>
    %72 = vector.shape_cast %71 : vector<1x1x8xf32> to vector<1x8xf32>
    %73 = vector.broadcast %72 : vector<1x8xf32> to vector<16x8xf32>
    %74 = arith.addf %70, %73 : vector<16x8xf32>
    %c1_46 = arith.constant 1 : index
    %c0_47 = arith.constant 0 : index
    %c0_48 = arith.constant 0 : index
    %75 = vector.load %arg7[%c1_46, %c0_47, %c0_48] : memref<8x32x8xbf16, #tpu.memory_space<vmem>>, vector<1x32x8xbf16>
    %76 = vector.shape_cast %75 : vector<1x32x8xbf16> to vector<32x8xbf16>
    %77 = arith.truncf %25 : vector<16x32xf32> to vector<16x32xbf16>
    %cst_49 = arith.constant dense<0.000000e+00> : vector<16x8xf32>
    %78 = tpu.matmul %77, %76, %cst_49 {dimension_numbers = #tpu.dot_dimension_numbers<[1], [0], [0], [1], [0, 0, 1, 1], [], []>} : vector<16x32xbf16>, vector<32x8xbf16>, vector<16x8xf32> -> vector<16x8xf32>
    %c1_50 = arith.constant 1 : index
    %c0_51 = arith.constant 0 : index
    %c0_52 = arith.constant 0 : index
    %79 = vector.load %arg8[%c1_50, %c0_51, %c0_52] : memref<8x1x8xf32, #tpu.memory_space<vmem>>, vector<1x1x8xf32>
    %80 = vector.shape_cast %79 : vector<1x1x8xf32> to vector<1x8xf32>
    %81 = vector.broadcast %80 : vector<1x8xf32> to vector<16x8xf32>
    %82 = arith.addf %78, %81 : vector<16x8xf32>
    %c1_53 = arith.constant 1 : index
    %c0_54 = arith.constant 0 : index
    %c0_55 = arith.constant 0 : index
    %83 = vector.load %arg9[%c1_53, %c0_54, %c0_55] : memref<8x32x8xbf16, #tpu.memory_space<vmem>>, vector<1x32x8xbf16>
    %84 = vector.shape_cast %83 : vector<1x32x8xbf16> to vector<32x8xbf16>
    %85 = arith.truncf %25 : vector<16x32xf32> to vector<16x32xbf16>
    %cst_56 = arith.constant dense<0.000000e+00> : vector<16x8xf32>
    %86 = tpu.matmul %85, %84, %cst_56 {dimension_numbers = #tpu.dot_dimension_numbers<[1], [0], [0], [1], [0, 0, 1, 1], [], []>} : vector<16x32xbf16>, vector<32x8xbf16>, vector<16x8xf32> -> vector<16x8xf32>
    %c1_57 = arith.constant 1 : index
    %c0_58 = arith.constant 0 : index
    %c0_59 = arith.constant 0 : index
    %87 = vector.load %arg10[%c1_57, %c0_58, %c0_59] : memref<8x1x8xf32, #tpu.memory_space<vmem>>, vector<1x1x8xf32>
    %88 = vector.shape_cast %87 : vector<1x1x8xf32> to vector<1x8xf32>
    %89 = vector.broadcast %88 : vector<1x8xf32> to vector<16x8xf32>
    %90 = arith.addf %86, %89 : vector<16x8xf32>
    %cst_60 = arith.constant dense<0.000000e+00> : vector<16x16xf32>
    %91 = tpu.matmul %74, %82, %cst_60 {dimension_numbers = #tpu.dot_dimension_numbers<[1], [1], [0], [0], [0, 0, 1, 0], [], []>} : vector<16x8xf32>, vector<16x8xf32>, vector<16x16xf32> -> vector<16x16xf32>
    %92 = arith.addf %91, %0 : vector<16x16xf32>
    %cst_61 = arith.constant dense<0xFF800000> : vector<16xf32>
    %93 = vector.multi_reduction <maximumf>, %92, %cst_61 [1] : vector<16x16xf32> to vector<16xf32>
    %94 = vector.shape_cast %93 : vector<16xf32> to vector<16x1xf32>
    %95 = vector.broadcast %94 : vector<16x1xf32> to vector<16x16xf32>
    %96 = arith.subf %92, %95 : vector<16x16xf32>
    %97 = math.exp %96 : vector<16x16xf32>
    %cst_62 = arith.constant dense<0.000000e+00> : vector<16xf32>
    %98 = vector.multi_reduction <add>, %97, %cst_62 [1] : vector<16x16xf32> to vector<16xf32>
    %99 = vector.shape_cast %98 : vector<16xf32> to vector<16x1xf32>
    %100 = tpu.reciprocal %99 {approx = true} : vector<16x1xf32> -> vector<16x1xf32>
    %101 = vector.broadcast %100 : vector<16x1xf32> to vector<16x16xf32>
    %102 = arith.mulf %97, %101 : vector<16x16xf32>
    %cst_63 = arith.constant dense<0.000000e+00> : vector<16x8xf32>
    %103 = tpu.matmul %102, %90, %cst_63 {dimension_numbers = #tpu.dot_dimension_numbers<[1], [0], [0], [1], [0, 0, 1, 1], [], []>} : vector<16x16xf32>, vector<16x8xf32>, vector<16x8xf32> -> vector<16x8xf32>
    %c1_64 = arith.constant 1 : index
    %c0_65 = arith.constant 0 : index
    %c0_66 = arith.constant 0 : index
    %104 = vector.load %arg11[%c1_64, %c0_65, %c0_66] : memref<8x8x32xbf16, #tpu.memory_space<vmem>>, vector<1x8x32xbf16>
    %105 = vector.shape_cast %104 : vector<1x8x32xbf16> to vector<8x32xbf16>
    %106 = arith.truncf %103 : vector<16x8xf32> to vector<16x8xbf16>
    %cst_67 = arith.constant dense<0.000000e+00> : vector<16x32xf32>
    %107 = tpu.matmul %106, %105, %cst_67 {dimension_numbers = #tpu.dot_dimension_numbers<[1], [0], [0], [1], [0, 0, 1, 1], [], []>} : vector<16x8xbf16>, vector<8x32xbf16>, vector<16x32xf32> -> vector<16x32xf32>
    %108 = arith.addf %66, %107 : vector<16x32xf32>
    %c2 = arith.constant 2 : index
    %c0_68 = arith.constant 0 : index
    %c0_69 = arith.constant 0 : index
    %109 = vector.load %arg5[%c2, %c0_68, %c0_69] : memref<8x32x8xbf16, #tpu.memory_space<vmem>>, vector<1x32x8xbf16>
    %110 = vector.shape_cast %109 : vector<1x32x8xbf16> to vector<32x8xbf16>
    %111 = arith.truncf %25 : vector<16x32xf32> to vector<16x32xbf16>
    %cst_70 = arith.constant dense<0.000000e+00> : vector<16x8xf32>
    %112 = tpu.matmul %111, %110, %cst_70 {dimension_numbers = #tpu.dot_dimension_numbers<[1], [0], [0], [1], [0, 0, 1, 1], [], []>} : vector<16x32xbf16>, vector<32x8xbf16>, vector<16x8xf32> -> vector<16x8xf32>
    %c2_71 = arith.constant 2 : index
    %c0_72 = arith.constant 0 : index
    %c0_73 = arith.constant 0 : index
    %113 = vector.load %arg6[%c2_71, %c0_72, %c0_73] : memref<8x1x8xf32, #tpu.memory_space<vmem>>, vector<1x1x8xf32>
    %114 = vector.shape_cast %113 : vector<1x1x8xf32> to vector<1x8xf32>
    %115 = vector.broadcast %114 : vector<1x8xf32> to vector<16x8xf32>
    %116 = arith.addf %112, %115 : vector<16x8xf32>
    %c2_74 = arith.constant 2 : index
    %c0_75 = arith.constant 0 : index
    %c0_76 = arith.constant 0 : index
    %117 = vector.load %arg7[%c2_74, %c0_75, %c0_76] : memref<8x32x8xbf16, #tpu.memory_space<vmem>>, vector<1x32x8xbf16>
    %118 = vector.shape_cast %117 : vector<1x32x8xbf16> to vector<32x8xbf16>
    %119 = arith.truncf %25 : vector<16x32xf32> to vector<16x32xbf16>
    %cst_77 = arith.constant dense<0.000000e+00> : vector<16x8xf32>
    %120 = tpu.matmul %119, %118, %cst_77 {dimension_numbers = #tpu.dot_dimension_numbers<[1], [0], [0], [1], [0, 0, 1, 1], [], []>} : vector<16x32xbf16>, vector<32x8xbf16>, vector<16x8xf32> -> vector<16x8xf32>
    %c2_78 = arith.constant 2 : index
    %c0_79 = arith.constant 0 : index
    %c0_80 = arith.constant 0 : index
    %121 = vector.load %arg8[%c2_78, %c0_79, %c0_80] : memref<8x1x8xf32, #tpu.memory_space<vmem>>, vector<1x1x8xf32>
    %122 = vector.shape_cast %121 : vector<1x1x8xf32> to vector<1x8xf32>
    %123 = vector.broadcast %122 : vector<1x8xf32> to vector<16x8xf32>
    %124 = arith.addf %120, %123 : vector<16x8xf32>
    %c2_81 = arith.constant 2 : index
    %c0_82 = arith.constant 0 : index
    %c0_83 = arith.constant 0 : index
    %125 = vector.load %arg9[%c2_81, %c0_82, %c0_83] : memref<8x32x8xbf16, #tpu.memory_space<vmem>>, vector<1x32x8xbf16>
    %126 = vector.shape_cast %125 : vector<1x32x8xbf16> to vector<32x8xbf16>
    %127 = arith.truncf %25 : vector<16x32xf32> to vector<16x32xbf16>
    %cst_84 = arith.constant dense<0.000000e+00> : vector<16x8xf32>
    %128 = tpu.matmul %127, %126, %cst_84 {dimension_numbers = #tpu.dot_dimension_numbers<[1], [0], [0], [1], [0, 0, 1, 1], [], []>} : vector<16x32xbf16>, vector<32x8xbf16>, vector<16x8xf32> -> vector<16x8xf32>
    %c2_85 = arith.constant 2 : index
    %c0_86 = arith.constant 0 : index
    %c0_87 = arith.constant 0 : index
    %129 = vector.load %arg10[%c2_85, %c0_86, %c0_87] : memref<8x1x8xf32, #tpu.memory_space<vmem>>, vector<1x1x8xf32>
    %130 = vector.shape_cast %129 : vector<1x1x8xf32> to vector<1x8xf32>
    %131 = vector.broadcast %130 : vector<1x8xf32> to vector<16x8xf32>
    %132 = arith.addf %128, %131 : vector<16x8xf32>
    %cst_88 = arith.constant dense<0.000000e+00> : vector<16x16xf32>
    %133 = tpu.matmul %116, %124, %cst_88 {dimension_numbers = #tpu.dot_dimension_numbers<[1], [1], [0], [0], [0, 0, 1, 0], [], []>} : vector<16x8xf32>, vector<16x8xf32>, vector<16x16xf32> -> vector<16x16xf32>
    %134 = arith.addf %133, %0 : vector<16x16xf32>
    %cst_89 = arith.constant dense<0xFF800000> : vector<16xf32>
    %135 = vector.multi_reduction <maximumf>, %134, %cst_89 [1] : vector<16x16xf32> to vector<16xf32>
    %136 = vector.shape_cast %135 : vector<16xf32> to vector<16x1xf32>
    %137 = vector.broadcast %136 : vector<16x1xf32> to vector<16x16xf32>
    %138 = arith.subf %134, %137 : vector<16x16xf32>
    %139 = math.exp %138 : vector<16x16xf32>
    %cst_90 = arith.constant dense<0.000000e+00> : vector<16xf32>
    %140 = vector.multi_reduction <add>, %139, %cst_90 [1] : vector<16x16xf32> to vector<16xf32>
    %141 = vector.shape_cast %140 : vector<16xf32> to vector<16x1xf32>
    %142 = tpu.reciprocal %141 {approx = true} : vector<16x1xf32> -> vector<16x1xf32>
    %143 = vector.broadcast %142 : vector<16x1xf32> to vector<16x16xf32>
    %144 = arith.mulf %139, %143 : vector<16x16xf32>
    %cst_91 = arith.constant dense<0.000000e+00> : vector<16x8xf32>
    %145 = tpu.matmul %144, %132, %cst_91 {dimension_numbers = #tpu.dot_dimension_numbers<[1], [0], [0], [1], [0, 0, 1, 1], [], []>} : vector<16x16xf32>, vector<16x8xf32>, vector<16x8xf32> -> vector<16x8xf32>
    %c2_92 = arith.constant 2 : index
    %c0_93 = arith.constant 0 : index
    %c0_94 = arith.constant 0 : index
    %146 = vector.load %arg11[%c2_92, %c0_93, %c0_94] : memref<8x8x32xbf16, #tpu.memory_space<vmem>>, vector<1x8x32xbf16>
    %147 = vector.shape_cast %146 : vector<1x8x32xbf16> to vector<8x32xbf16>
    %148 = arith.truncf %145 : vector<16x8xf32> to vector<16x8xbf16>
    %cst_95 = arith.constant dense<0.000000e+00> : vector<16x32xf32>
    %149 = tpu.matmul %148, %147, %cst_95 {dimension_numbers = #tpu.dot_dimension_numbers<[1], [0], [0], [1], [0, 0, 1, 1], [], []>} : vector<16x8xbf16>, vector<8x32xbf16>, vector<16x32xf32> -> vector<16x32xf32>
    %150 = arith.addf %108, %149 : vector<16x32xf32>
    %c3 = arith.constant 3 : index
    %c0_96 = arith.constant 0 : index
    %c0_97 = arith.constant 0 : index
    %151 = vector.load %arg5[%c3, %c0_96, %c0_97] : memref<8x32x8xbf16, #tpu.memory_space<vmem>>, vector<1x32x8xbf16>
    %152 = vector.shape_cast %151 : vector<1x32x8xbf16> to vector<32x8xbf16>
    %153 = arith.truncf %25 : vector<16x32xf32> to vector<16x32xbf16>
    %cst_98 = arith.constant dense<0.000000e+00> : vector<16x8xf32>
    %154 = tpu.matmul %153, %152, %cst_98 {dimension_numbers = #tpu.dot_dimension_numbers<[1], [0], [0], [1], [0, 0, 1, 1], [], []>} : vector<16x32xbf16>, vector<32x8xbf16>, vector<16x8xf32> -> vector<16x8xf32>
    %c3_99 = arith.constant 3 : index
    %c0_100 = arith.constant 0 : index
    %c0_101 = arith.constant 0 : index
    %155 = vector.load %arg6[%c3_99, %c0_100, %c0_101] : memref<8x1x8xf32, #tpu.memory_space<vmem>>, vector<1x1x8xf32>
    %156 = vector.shape_cast %155 : vector<1x1x8xf32> to vector<1x8xf32>
    %157 = vector.broadcast %156 : vector<1x8xf32> to vector<16x8xf32>
    %158 = arith.addf %154, %157 : vector<16x8xf32>
    %c3_102 = arith.constant 3 : index
    %c0_103 = arith.constant 0 : index
    %c0_104 = arith.constant 0 : index
    %159 = vector.load %arg7[%c3_102, %c0_103, %c0_104] : memref<8x32x8xbf16, #tpu.memory_space<vmem>>, vector<1x32x8xbf16>
    %160 = vector.shape_cast %159 : vector<1x32x8xbf16> to vector<32x8xbf16>
    %161 = arith.truncf %25 : vector<16x32xf32> to vector<16x32xbf16>
    %cst_105 = arith.constant dense<0.000000e+00> : vector<16x8xf32>
    %162 = tpu.matmul %161, %160, %cst_105 {dimension_numbers = #tpu.dot_dimension_numbers<[1], [0], [0], [1], [0, 0, 1, 1], [], []>} : vector<16x32xbf16>, vector<32x8xbf16>, vector<16x8xf32> -> vector<16x8xf32>
    %c3_106 = arith.constant 3 : index
    %c0_107 = arith.constant 0 : index
    %c0_108 = arith.constant 0 : index
    %163 = vector.load %arg8[%c3_106, %c0_107, %c0_108] : memref<8x1x8xf32, #tpu.memory_space<vmem>>, vector<1x1x8xf32>
    %164 = vector.shape_cast %163 : vector<1x1x8xf32> to vector<1x8xf32>
    %165 = vector.broadcast %164 : vector<1x8xf32> to vector<16x8xf32>
    %166 = arith.addf %162, %165 : vector<16x8xf32>
    %c3_109 = arith.constant 3 : index
    %c0_110 = arith.constant 0 : index
    %c0_111 = arith.constant 0 : index
    %167 = vector.load %arg9[%c3_109, %c0_110, %c0_111] : memref<8x32x8xbf16, #tpu.memory_space<vmem>>, vector<1x32x8xbf16>
    %168 = vector.shape_cast %167 : vector<1x32x8xbf16> to vector<32x8xbf16>
    %169 = arith.truncf %25 : vector<16x32xf32> to vector<16x32xbf16>
    %cst_112 = arith.constant dense<0.000000e+00> : vector<16x8xf32>
    %170 = tpu.matmul %169, %168, %cst_112 {dimension_numbers = #tpu.dot_dimension_numbers<[1], [0], [0], [1], [0, 0, 1, 1], [], []>} : vector<16x32xbf16>, vector<32x8xbf16>, vector<16x8xf32> -> vector<16x8xf32>
    %c3_113 = arith.constant 3 : index
    %c0_114 = arith.constant 0 : index
    %c0_115 = arith.constant 0 : index
    %171 = vector.load %arg10[%c3_113, %c0_114, %c0_115] : memref<8x1x8xf32, #tpu.memory_space<vmem>>, vector<1x1x8xf32>
    %172 = vector.shape_cast %171 : vector<1x1x8xf32> to vector<1x8xf32>
    %173 = vector.broadcast %172 : vector<1x8xf32> to vector<16x8xf32>
    %174 = arith.addf %170, %173 : vector<16x8xf32>
    %cst_116 = arith.constant dense<0.000000e+00> : vector<16x16xf32>
    %175 = tpu.matmul %158, %166, %cst_116 {dimension_numbers = #tpu.dot_dimension_numbers<[1], [1], [0], [0], [0, 0, 1, 0], [], []>} : vector<16x8xf32>, vector<16x8xf32>, vector<16x16xf32> -> vector<16x16xf32>
    %176 = arith.addf %175, %0 : vector<16x16xf32>
    %cst_117 = arith.constant dense<0xFF800000> : vector<16xf32>
    %177 = vector.multi_reduction <maximumf>, %176, %cst_117 [1] : vector<16x16xf32> to vector<16xf32>
    %178 = vector.shape_cast %177 : vector<16xf32> to vector<16x1xf32>
    %179 = vector.broadcast %178 : vector<16x1xf32> to vector<16x16xf32>
    %180 = arith.subf %176, %179 : vector<16x16xf32>
    %181 = math.exp %180 : vector<16x16xf32>
    %cst_118 = arith.constant dense<0.000000e+00> : vector<16xf32>
    %182 = vector.multi_reduction <add>, %181, %cst_118 [1] : vector<16x16xf32> to vector<16xf32>
    %183 = vector.shape_cast %182 : vector<16xf32> to vector<16x1xf32>
    %184 = tpu.reciprocal %183 {approx = true} : vector<16x1xf32> -> vector<16x1xf32>
    %185 = vector.broadcast %184 : vector<16x1xf32> to vector<16x16xf32>
    %186 = arith.mulf %181, %185 : vector<16x16xf32>
    %cst_119 = arith.constant dense<0.000000e+00> : vector<16x8xf32>
    %187 = tpu.matmul %186, %174, %cst_119 {dimension_numbers = #tpu.dot_dimension_numbers<[1], [0], [0], [1], [0, 0, 1, 1], [], []>} : vector<16x16xf32>, vector<16x8xf32>, vector<16x8xf32> -> vector<16x8xf32>
    %c3_120 = arith.constant 3 : index
    %c0_121 = arith.constant 0 : index
    %c0_122 = arith.constant 0 : index
    %188 = vector.load %arg11[%c3_120, %c0_121, %c0_122] : memref<8x8x32xbf16, #tpu.memory_space<vmem>>, vector<1x8x32xbf16>
    %189 = vector.shape_cast %188 : vector<1x8x32xbf16> to vector<8x32xbf16>
    %190 = arith.truncf %187 : vector<16x8xf32> to vector<16x8xbf16>
    %cst_123 = arith.constant dense<0.000000e+00> : vector<16x32xf32>
    %191 = tpu.matmul %190, %189, %cst_123 {dimension_numbers = #tpu.dot_dimension_numbers<[1], [0], [0], [1], [0, 0, 1, 1], [], []>} : vector<16x8xbf16>, vector<8x32xbf16>, vector<16x32xf32> -> vector<16x32xf32>
    %192 = arith.addf %150, %191 : vector<16x32xf32>
    %193 = arith.addf %25, %192 : vector<16x32xf32>
    %c0_124 = arith.constant 0 : index
    %c0_125 = arith.constant 0 : index
    %c0_126 = arith.constant 0 : index
    %194 = vector.load %arg12[%c0_124, %c0_125, %c0_126] : memref<2x1x32xf32, #tpu.memory_space<vmem>>, vector<1x1x32xf32>
    %195 = vector.shape_cast %194 : vector<1x1x32xf32> to vector<1x32xf32>
    %196 = vector.broadcast %195 : vector<1x32xf32> to vector<16x32xf32>
    %197 = arith.addf %193, %196 : vector<16x32xf32>
    %c0_127 = arith.constant 0 : index
    %c0_128 = arith.constant 0 : index
    %c0_129 = arith.constant 0 : index
    %198 = vector.load %arg13[%c0_127, %c0_128, %c0_129] : memref<2x1x32xf32, #tpu.memory_space<vmem>>, vector<1x1x32xf32>
    %199 = vector.shape_cast %198 : vector<1x1x32xf32> to vector<1x32xf32>
    %c0_130 = arith.constant 0 : index
    %c0_131 = arith.constant 0 : index
    %c0_132 = arith.constant 0 : index
    %200 = vector.load %arg14[%c0_130, %c0_131, %c0_132] : memref<2x1x32xf32, #tpu.memory_space<vmem>>, vector<1x1x32xf32>
    %201 = vector.shape_cast %200 : vector<1x1x32xf32> to vector<1x32xf32>
    %cst_133 = arith.constant dense<0.000000e+00> : vector<16xf32>
    %202 = vector.multi_reduction <add>, %197, %cst_133 [1] : vector<16x32xf32> to vector<16xf32>
    %203 = vector.shape_cast %202 : vector<16xf32> to vector<16x1xf32>
    %cst_134 = arith.constant 3.200000e+01 : f32
    %204 = vector.broadcast %cst_134 : f32 to vector<16x1xf32>
    %205 = arith.divf %203, %204 : vector<16x1xf32>
    %206 = vector.broadcast %205 : vector<16x1xf32> to vector<16x32xf32>
    %207 = arith.subf %197, %206 : vector<16x32xf32>
    %208 = arith.mulf %207, %207 : vector<16x32xf32>
    %cst_135 = arith.constant dense<0.000000e+00> : vector<16xf32>
    %209 = vector.multi_reduction <add>, %208, %cst_135 [1] : vector<16x32xf32> to vector<16xf32>
    %210 = vector.shape_cast %209 : vector<16xf32> to vector<16x1xf32>
    %cst_136 = arith.constant 3.200000e+01 : f32
    %211 = vector.broadcast %cst_136 : f32 to vector<16x1xf32>
    %212 = arith.divf %210, %211 : vector<16x1xf32>
    %213 = vector.broadcast %205 : vector<16x1xf32> to vector<16x32xf32>
    %214 = arith.subf %197, %213 : vector<16x32xf32>
    %cst_137 = arith.constant 9.99999996E-13 : f32
    %215 = vector.broadcast %cst_137 : f32 to vector<16x1xf32>
    %216 = arith.addf %212, %215 : vector<16x1xf32>
    %217 = math.rsqrt %216 : vector<16x1xf32>
    %218 = vector.broadcast %217 : vector<16x1xf32> to vector<16x32xf32>
    %219 = arith.mulf %214, %218 : vector<16x32xf32>
    %220 = vector.broadcast %199 : vector<1x32xf32> to vector<16x32xf32>
    %221 = arith.mulf %219, %220 : vector<16x32xf32>
    %222 = vector.broadcast %201 : vector<1x32xf32> to vector<16x32xf32>
    %223 = arith.addf %221, %222 : vector<16x32xf32>
    %c0_138 = arith.constant 0 : index
    %c0_139 = arith.constant 0 : index
    %c0_140 = arith.constant 0 : index
    %224 = vector.load %arg15[%c0_138, %c0_139, %c0_140] : memref<2x32x128xbf16, #tpu.memory_space<vmem>>, vector<1x32x128xbf16>
    %225 = vector.shape_cast %224 : vector<1x32x128xbf16> to vector<32x128xbf16>
    %226 = arith.truncf %223 : vector<16x32xf32> to vector<16x32xbf16>
    %cst_141 = arith.constant dense<0.000000e+00> : vector<16x128xf32>
    %227 = tpu.matmul %226, %225, %cst_141 {dimension_numbers = #tpu.dot_dimension_numbers<[1], [0], [0], [1], [0, 0, 1, 1], [], []>} : vector<16x32xbf16>, vector<32x128xbf16>, vector<16x128xf32> -> vector<16x128xf32>
    %c0_142 = arith.constant 0 : index
    %c0_143 = arith.constant 0 : index
    %c0_144 = arith.constant 0 : index
    %228 = vector.load %arg16[%c0_142, %c0_143, %c0_144] : memref<2x1x128xf32, #tpu.memory_space<vmem>>, vector<1x1x128xf32>
    %229 = vector.shape_cast %228 : vector<1x1x128xf32> to vector<1x128xf32>
    %230 = vector.broadcast %229 : vector<1x128xf32> to vector<16x128xf32>
    %231 = arith.addf %227, %230 : vector<16x128xf32>
    %232 = arith.mulf %231, %231 : vector<16x128xf32>
    %233 = arith.mulf %231, %232 : vector<16x128xf32>
    %cst_145 = arith.constant 4.471500e-02 : f32
    %234 = vector.broadcast %cst_145 : f32 to vector<16x128xf32>
    %235 = arith.mulf %234, %233 : vector<16x128xf32>
    %236 = arith.addf %231, %235 : vector<16x128xf32>
    %cst_146 = arith.constant 0.797884583 : f32
    %237 = vector.broadcast %cst_146 : f32 to vector<16x128xf32>
    %238 = arith.mulf %237, %236 : vector<16x128xf32>
    %239 = math.tanh %238 : vector<16x128xf32>
    %cst_147 = arith.constant 1.000000e+00 : f32
    %240 = vector.broadcast %cst_147 : f32 to vector<16x128xf32>
    %241 = arith.addf %240, %239 : vector<16x128xf32>
    %cst_148 = arith.constant 5.000000e-01 : f32
    %242 = vector.broadcast %cst_148 : f32 to vector<16x128xf32>
    %243 = arith.mulf %242, %241 : vector<16x128xf32>
    %244 = arith.mulf %231, %243 : vector<16x128xf32>
    %c0_149 = arith.constant 0 : index
    %c0_150 = arith.constant 0 : index
    %c0_151 = arith.constant 0 : index
    %245 = vector.load %arg17[%c0_149, %c0_150, %c0_151] : memref<2x128x32xbf16, #tpu.memory_space<vmem>>, vector<1x128x32xbf16>
    %246 = vector.shape_cast %245 : vector<1x128x32xbf16> to vector<128x32xbf16>
    %247 = arith.truncf %244 : vector<16x128xf32> to vector<16x128xbf16>
    %cst_152 = arith.constant dense<0.000000e+00> : vector<16x32xf32>
    %248 = tpu.matmul %247, %246, %cst_152 {dimension_numbers = #tpu.dot_dimension_numbers<[1], [0], [0], [1], [0, 0, 1, 1], [], []>} : vector<16x128xbf16>, vector<128x32xbf16>, vector<16x32xf32> -> vector<16x32xf32>
    %c0_153 = arith.constant 0 : index
    %c0_154 = arith.constant 0 : index
    %c0_155 = arith.constant 0 : index
    %249 = vector.load %arg18[%c0_153, %c0_154, %c0_155] : memref<2x1x32xf32, #tpu.memory_space<vmem>>, vector<1x1x32xf32>
    %250 = vector.shape_cast %249 : vector<1x1x32xf32> to vector<1x32xf32>
    %251 = vector.broadcast %250 : vector<1x32xf32> to vector<16x32xf32>
    %252 = arith.addf %248, %251 : vector<16x32xf32>
    %253 = arith.addf %223, %252 : vector<16x32xf32>
    %c0_156 = arith.constant 0 : index
    %c0_157 = arith.constant 0 : index
    %c0_158 = arith.constant 0 : index
    %254 = vector.load %arg19[%c0_156, %c0_157, %c0_158] : memref<2x1x32xf32, #tpu.memory_space<vmem>>, vector<1x1x32xf32>
    %255 = vector.shape_cast %254 : vector<1x1x32xf32> to vector<1x32xf32>
    %c0_159 = arith.constant 0 : index
    %c0_160 = arith.constant 0 : index
    %c0_161 = arith.constant 0 : index
    %256 = vector.load %arg20[%c0_159, %c0_160, %c0_161] : memref<2x1x32xf32, #tpu.memory_space<vmem>>, vector<1x1x32xf32>
    %257 = vector.shape_cast %256 : vector<1x1x32xf32> to vector<1x32xf32>
    %cst_162 = arith.constant dense<0.000000e+00> : vector<16xf32>
    %258 = vector.multi_reduction <add>, %253, %cst_162 [1] : vector<16x32xf32> to vector<16xf32>
    %259 = vector.shape_cast %258 : vector<16xf32> to vector<16x1xf32>
    %cst_163 = arith.constant 3.200000e+01 : f32
    %260 = vector.broadcast %cst_163 : f32 to vector<16x1xf32>
    %261 = arith.divf %259, %260 : vector<16x1xf32>
    %262 = vector.broadcast %261 : vector<16x1xf32> to vector<16x32xf32>
    %263 = arith.subf %253, %262 : vector<16x32xf32>
    %264 = arith.mulf %263, %263 : vector<16x32xf32>
    %cst_164 = arith.constant dense<0.000000e+00> : vector<16xf32>
    %265 = vector.multi_reduction <add>, %264, %cst_164 [1] : vector<16x32xf32> to vector<16xf32>
    %266 = vector.shape_cast %265 : vector<16xf32> to vector<16x1xf32>
    %cst_165 = arith.constant 3.200000e+01 : f32
    %267 = vector.broadcast %cst_165 : f32 to vector<16x1xf32>
    %268 = arith.divf %266, %267 : vector<16x1xf32>
    %269 = vector.broadcast %261 : vector<16x1xf32> to vector<16x32xf32>
    %270 = arith.subf %253, %269 : vector<16x32xf32>
    %cst_166 = arith.constant 9.99999996E-13 : f32
    %271 = vector.broadcast %cst_166 : f32 to vector<16x1xf32>
    %272 = arith.addf %268, %271 : vector<16x1xf32>
    %273 = math.rsqrt %272 : vector<16x1xf32>
    %274 = vector.broadcast %273 : vector<16x1xf32> to vector<16x32xf32>
    %275 = arith.mulf %270, %274 : vector<16x32xf32>
    %276 = vector.broadcast %255 : vector<1x32xf32> to vector<16x32xf32>
    %277 = arith.mulf %275, %276 : vector<16x32xf32>
    %278 = vector.broadcast %257 : vector<1x32xf32> to vector<16x32xf32>
    %279 = arith.addf %277, %278 : vector<16x32xf32>
    %c4 = arith.constant 4 : index
    %c0_167 = arith.constant 0 : index
    %c0_168 = arith.constant 0 : index
    %280 = vector.load %arg5[%c4, %c0_167, %c0_168] : memref<8x32x8xbf16, #tpu.memory_space<vmem>>, vector<1x32x8xbf16>
    %281 = vector.shape_cast %280 : vector<1x32x8xbf16> to vector<32x8xbf16>
    %282 = arith.truncf %279 : vector<16x32xf32> to vector<16x32xbf16>
    %cst_169 = arith.constant dense<0.000000e+00> : vector<16x8xf32>
    %283 = tpu.matmul %282, %281, %cst_169 {dimension_numbers = #tpu.dot_dimension_numbers<[1], [0], [0], [1], [0, 0, 1, 1], [], []>} : vector<16x32xbf16>, vector<32x8xbf16>, vector<16x8xf32> -> vector<16x8xf32>
    %c4_170 = arith.constant 4 : index
    %c0_171 = arith.constant 0 : index
    %c0_172 = arith.constant 0 : index
    %284 = vector.load %arg6[%c4_170, %c0_171, %c0_172] : memref<8x1x8xf32, #tpu.memory_space<vmem>>, vector<1x1x8xf32>
    %285 = vector.shape_cast %284 : vector<1x1x8xf32> to vector<1x8xf32>
    %286 = vector.broadcast %285 : vector<1x8xf32> to vector<16x8xf32>
    %287 = arith.addf %283, %286 : vector<16x8xf32>
    %c4_173 = arith.constant 4 : index
    %c0_174 = arith.constant 0 : index
    %c0_175 = arith.constant 0 : index
    %288 = vector.load %arg7[%c4_173, %c0_174, %c0_175] : memref<8x32x8xbf16, #tpu.memory_space<vmem>>, vector<1x32x8xbf16>
    %289 = vector.shape_cast %288 : vector<1x32x8xbf16> to vector<32x8xbf16>
    %290 = arith.truncf %279 : vector<16x32xf32> to vector<16x32xbf16>
    %cst_176 = arith.constant dense<0.000000e+00> : vector<16x8xf32>
    %291 = tpu.matmul %290, %289, %cst_176 {dimension_numbers = #tpu.dot_dimension_numbers<[1], [0], [0], [1], [0, 0, 1, 1], [], []>} : vector<16x32xbf16>, vector<32x8xbf16>, vector<16x8xf32> -> vector<16x8xf32>
    %c4_177 = arith.constant 4 : index
    %c0_178 = arith.constant 0 : index
    %c0_179 = arith.constant 0 : index
    %292 = vector.load %arg8[%c4_177, %c0_178, %c0_179] : memref<8x1x8xf32, #tpu.memory_space<vmem>>, vector<1x1x8xf32>
    %293 = vector.shape_cast %292 : vector<1x1x8xf32> to vector<1x8xf32>
    %294 = vector.broadcast %293 : vector<1x8xf32> to vector<16x8xf32>
    %295 = arith.addf %291, %294 : vector<16x8xf32>
    %c4_180 = arith.constant 4 : index
    %c0_181 = arith.constant 0 : index
    %c0_182 = arith.constant 0 : index
    %296 = vector.load %arg9[%c4_180, %c0_181, %c0_182] : memref<8x32x8xbf16, #tpu.memory_space<vmem>>, vector<1x32x8xbf16>
    %297 = vector.shape_cast %296 : vector<1x32x8xbf16> to vector<32x8xbf16>
    %298 = arith.truncf %279 : vector<16x32xf32> to vector<16x32xbf16>
    %cst_183 = arith.constant dense<0.000000e+00> : vector<16x8xf32>
    %299 = tpu.matmul %298, %297, %cst_183 {dimension_numbers = #tpu.dot_dimension_numbers<[1], [0], [0], [1], [0, 0, 1, 1], [], []>} : vector<16x32xbf16>, vector<32x8xbf16>, vector<16x8xf32> -> vector<16x8xf32>
    %c4_184 = arith.constant 4 : index
    %c0_185 = arith.constant 0 : index
    %c0_186 = arith.constant 0 : index
    %300 = vector.load %arg10[%c4_184, %c0_185, %c0_186] : memref<8x1x8xf32, #tpu.memory_space<vmem>>, vector<1x1x8xf32>
    %301 = vector.shape_cast %300 : vector<1x1x8xf32> to vector<1x8xf32>
    %302 = vector.broadcast %301 : vector<1x8xf32> to vector<16x8xf32>
    %303 = arith.addf %299, %302 : vector<16x8xf32>
    %cst_187 = arith.constant dense<0.000000e+00> : vector<16x16xf32>
    %304 = tpu.matmul %287, %295, %cst_187 {dimension_numbers = #tpu.dot_dimension_numbers<[1], [1], [0], [0], [0, 0, 1, 0], [], []>} : vector<16x8xf32>, vector<16x8xf32>, vector<16x16xf32> -> vector<16x16xf32>
    %305 = arith.addf %304, %0 : vector<16x16xf32>
    %cst_188 = arith.constant dense<0xFF800000> : vector<16xf32>
    %306 = vector.multi_reduction <maximumf>, %305, %cst_188 [1] : vector<16x16xf32> to vector<16xf32>
    %307 = vector.shape_cast %306 : vector<16xf32> to vector<16x1xf32>
    %308 = vector.broadcast %307 : vector<16x1xf32> to vector<16x16xf32>
    %309 = arith.subf %305, %308 : vector<16x16xf32>
    %310 = math.exp %309 : vector<16x16xf32>
    %cst_189 = arith.constant dense<0.000000e+00> : vector<16xf32>
    %311 = vector.multi_reduction <add>, %310, %cst_189 [1] : vector<16x16xf32> to vector<16xf32>
    %312 = vector.shape_cast %311 : vector<16xf32> to vector<16x1xf32>
    %313 = tpu.reciprocal %312 {approx = true} : vector<16x1xf32> -> vector<16x1xf32>
    %314 = vector.broadcast %313 : vector<16x1xf32> to vector<16x16xf32>
    %315 = arith.mulf %310, %314 : vector<16x16xf32>
    %cst_190 = arith.constant dense<0.000000e+00> : vector<16x8xf32>
    %316 = tpu.matmul %315, %303, %cst_190 {dimension_numbers = #tpu.dot_dimension_numbers<[1], [0], [0], [1], [0, 0, 1, 1], [], []>} : vector<16x16xf32>, vector<16x8xf32>, vector<16x8xf32> -> vector<16x8xf32>
    %c4_191 = arith.constant 4 : index
    %c0_192 = arith.constant 0 : index
    %c0_193 = arith.constant 0 : index
    %317 = vector.load %arg11[%c4_191, %c0_192, %c0_193] : memref<8x8x32xbf16, #tpu.memory_space<vmem>>, vector<1x8x32xbf16>
    %318 = vector.shape_cast %317 : vector<1x8x32xbf16> to vector<8x32xbf16>
    %319 = arith.truncf %316 : vector<16x8xf32> to vector<16x8xbf16>
    %cst_194 = arith.constant dense<0.000000e+00> : vector<16x32xf32>
    %320 = tpu.matmul %319, %318, %cst_194 {dimension_numbers = #tpu.dot_dimension_numbers<[1], [0], [0], [1], [0, 0, 1, 1], [], []>} : vector<16x8xbf16>, vector<8x32xbf16>, vector<16x32xf32> -> vector<16x32xf32>
    %c5 = arith.constant 5 : index
    %c0_195 = arith.constant 0 : index
    %c0_196 = arith.constant 0 : index
    %321 = vector.load %arg5[%c5, %c0_195, %c0_196] : memref<8x32x8xbf16, #tpu.memory_space<vmem>>, vector<1x32x8xbf16>
    %322 = vector.shape_cast %321 : vector<1x32x8xbf16> to vector<32x8xbf16>
    %323 = arith.truncf %279 : vector<16x32xf32> to vector<16x32xbf16>
    %cst_197 = arith.constant dense<0.000000e+00> : vector<16x8xf32>
    %324 = tpu.matmul %323, %322, %cst_197 {dimension_numbers = #tpu.dot_dimension_numbers<[1], [0], [0], [1], [0, 0, 1, 1], [], []>} : vector<16x32xbf16>, vector<32x8xbf16>, vector<16x8xf32> -> vector<16x8xf32>
    %c5_198 = arith.constant 5 : index
    %c0_199 = arith.constant 0 : index
    %c0_200 = arith.constant 0 : index
    %325 = vector.load %arg6[%c5_198, %c0_199, %c0_200] : memref<8x1x8xf32, #tpu.memory_space<vmem>>, vector<1x1x8xf32>
    %326 = vector.shape_cast %325 : vector<1x1x8xf32> to vector<1x8xf32>
    %327 = vector.broadcast %326 : vector<1x8xf32> to vector<16x8xf32>
    %328 = arith.addf %324, %327 : vector<16x8xf32>
    %c5_201 = arith.constant 5 : index
    %c0_202 = arith.constant 0 : index
    %c0_203 = arith.constant 0 : index
    %329 = vector.load %arg7[%c5_201, %c0_202, %c0_203] : memref<8x32x8xbf16, #tpu.memory_space<vmem>>, vector<1x32x8xbf16>
    %330 = vector.shape_cast %329 : vector<1x32x8xbf16> to vector<32x8xbf16>
    %331 = arith.truncf %279 : vector<16x32xf32> to vector<16x32xbf16>
    %cst_204 = arith.constant dense<0.000000e+00> : vector<16x8xf32>
    %332 = tpu.matmul %331, %330, %cst_204 {dimension_numbers = #tpu.dot_dimension_numbers<[1], [0], [0], [1], [0, 0, 1, 1], [], []>} : vector<16x32xbf16>, vector<32x8xbf16>, vector<16x8xf32> -> vector<16x8xf32>
    %c5_205 = arith.constant 5 : index
    %c0_206 = arith.constant 0 : index
    %c0_207 = arith.constant 0 : index
    %333 = vector.load %arg8[%c5_205, %c0_206, %c0_207] : memref<8x1x8xf32, #tpu.memory_space<vmem>>, vector<1x1x8xf32>
    %334 = vector.shape_cast %333 : vector<1x1x8xf32> to vector<1x8xf32>
    %335 = vector.broadcast %334 : vector<1x8xf32> to vector<16x8xf32>
    %336 = arith.addf %332, %335 : vector<16x8xf32>
    %c5_208 = arith.constant 5 : index
    %c0_209 = arith.constant 0 : index
    %c0_210 = arith.constant 0 : index
    %337 = vector.load %arg9[%c5_208, %c0_209, %c0_210] : memref<8x32x8xbf16, #tpu.memory_space<vmem>>, vector<1x32x8xbf16>
    %338 = vector.shape_cast %337 : vector<1x32x8xbf16> to vector<32x8xbf16>
    %339 = arith.truncf %279 : vector<16x32xf32> to vector<16x32xbf16>
    %cst_211 = arith.constant dense<0.000000e+00> : vector<16x8xf32>
    %340 = tpu.matmul %339, %338, %cst_211 {dimension_numbers = #tpu.dot_dimension_numbers<[1], [0], [0], [1], [0, 0, 1, 1], [], []>} : vector<16x32xbf16>, vector<32x8xbf16>, vector<16x8xf32> -> vector<16x8xf32>
    %c5_212 = arith.constant 5 : index
    %c0_213 = arith.constant 0 : index
    %c0_214 = arith.constant 0 : index
    %341 = vector.load %arg10[%c5_212, %c0_213, %c0_214] : memref<8x1x8xf32, #tpu.memory_space<vmem>>, vector<1x1x8xf32>
    %342 = vector.shape_cast %341 : vector<1x1x8xf32> to vector<1x8xf32>
    %343 = vector.broadcast %342 : vector<1x8xf32> to vector<16x8xf32>
    %344 = arith.addf %340, %343 : vector<16x8xf32>
    %cst_215 = arith.constant dense<0.000000e+00> : vector<16x16xf32>
    %345 = tpu.matmul %328, %336, %cst_215 {dimension_numbers = #tpu.dot_dimension_numbers<[1], [1], [0], [0], [0, 0, 1, 0], [], []>} : vector<16x8xf32>, vector<16x8xf32>, vector<16x16xf32> -> vector<16x16xf32>
    %346 = arith.addf %345, %0 : vector<16x16xf32>
    %cst_216 = arith.constant dense<0xFF800000> : vector<16xf32>
    %347 = vector.multi_reduction <maximumf>, %346, %cst_216 [1] : vector<16x16xf32> to vector<16xf32>
    %348 = vector.shape_cast %347 : vector<16xf32> to vector<16x1xf32>
    %349 = vector.broadcast %348 : vector<16x1xf32> to vector<16x16xf32>
    %350 = arith.subf %346, %349 : vector<16x16xf32>
    %351 = math.exp %350 : vector<16x16xf32>
    %cst_217 = arith.constant dense<0.000000e+00> : vector<16xf32>
    %352 = vector.multi_reduction <add>, %351, %cst_217 [1] : vector<16x16xf32> to vector<16xf32>
    %353 = vector.shape_cast %352 : vector<16xf32> to vector<16x1xf32>
    %354 = tpu.reciprocal %353 {approx = true} : vector<16x1xf32> -> vector<16x1xf32>
    %355 = vector.broadcast %354 : vector<16x1xf32> to vector<16x16xf32>
    %356 = arith.mulf %351, %355 : vector<16x16xf32>
    %cst_218 = arith.constant dense<0.000000e+00> : vector<16x8xf32>
    %357 = tpu.matmul %356, %344, %cst_218 {dimension_numbers = #tpu.dot_dimension_numbers<[1], [0], [0], [1], [0, 0, 1, 1], [], []>} : vector<16x16xf32>, vector<16x8xf32>, vector<16x8xf32> -> vector<16x8xf32>
    %c5_219 = arith.constant 5 : index
    %c0_220 = arith.constant 0 : index
    %c0_221 = arith.constant 0 : index
    %358 = vector.load %arg11[%c5_219, %c0_220, %c0_221] : memref<8x8x32xbf16, #tpu.memory_space<vmem>>, vector<1x8x32xbf16>
    %359 = vector.shape_cast %358 : vector<1x8x32xbf16> to vector<8x32xbf16>
    %360 = arith.truncf %357 : vector<16x8xf32> to vector<16x8xbf16>
    %cst_222 = arith.constant dense<0.000000e+00> : vector<16x32xf32>
    %361 = tpu.matmul %360, %359, %cst_222 {dimension_numbers = #tpu.dot_dimension_numbers<[1], [0], [0], [1], [0, 0, 1, 1], [], []>} : vector<16x8xbf16>, vector<8x32xbf16>, vector<16x32xf32> -> vector<16x32xf32>
    %362 = arith.addf %320, %361 : vector<16x32xf32>
    %c6 = arith.constant 6 : index
    %c0_223 = arith.constant 0 : index
    %c0_224 = arith.constant 0 : index
    %363 = vector.load %arg5[%c6, %c0_223, %c0_224] : memref<8x32x8xbf16, #tpu.memory_space<vmem>>, vector<1x32x8xbf16>
    %364 = vector.shape_cast %363 : vector<1x32x8xbf16> to vector<32x8xbf16>
    %365 = arith.truncf %279 : vector<16x32xf32> to vector<16x32xbf16>
    %cst_225 = arith.constant dense<0.000000e+00> : vector<16x8xf32>
    %366 = tpu.matmul %365, %364, %cst_225 {dimension_numbers = #tpu.dot_dimension_numbers<[1], [0], [0], [1], [0, 0, 1, 1], [], []>} : vector<16x32xbf16>, vector<32x8xbf16>, vector<16x8xf32> -> vector<16x8xf32>
    %c6_226 = arith.constant 6 : index
    %c0_227 = arith.constant 0 : index
    %c0_228 = arith.constant 0 : index
    %367 = vector.load %arg6[%c6_226, %c0_227, %c0_228] : memref<8x1x8xf32, #tpu.memory_space<vmem>>, vector<1x1x8xf32>
    %368 = vector.shape_cast %367 : vector<1x1x8xf32> to vector<1x8xf32>
    %369 = vector.broadcast %368 : vector<1x8xf32> to vector<16x8xf32>
    %370 = arith.addf %366, %369 : vector<16x8xf32>
    %c6_229 = arith.constant 6 : index
    %c0_230 = arith.constant 0 : index
    %c0_231 = arith.constant 0 : index
    %371 = vector.load %arg7[%c6_229, %c0_230, %c0_231] : memref<8x32x8xbf16, #tpu.memory_space<vmem>>, vector<1x32x8xbf16>
    %372 = vector.shape_cast %371 : vector<1x32x8xbf16> to vector<32x8xbf16>
    %373 = arith.truncf %279 : vector<16x32xf32> to vector<16x32xbf16>
    %cst_232 = arith.constant dense<0.000000e+00> : vector<16x8xf32>
    %374 = tpu.matmul %373, %372, %cst_232 {dimension_numbers = #tpu.dot_dimension_numbers<[1], [0], [0], [1], [0, 0, 1, 1], [], []>} : vector<16x32xbf16>, vector<32x8xbf16>, vector<16x8xf32> -> vector<16x8xf32>
    %c6_233 = arith.constant 6 : index
    %c0_234 = arith.constant 0 : index
    %c0_235 = arith.constant 0 : index
    %375 = vector.load %arg8[%c6_233, %c0_234, %c0_235] : memref<8x1x8xf32, #tpu.memory_space<vmem>>, vector<1x1x8xf32>
    %376 = vector.shape_cast %375 : vector<1x1x8xf32> to vector<1x8xf32>
    %377 = vector.broadcast %376 : vector<1x8xf32> to vector<16x8xf32>
    %378 = arith.addf %374, %377 : vector<16x8xf32>
    %c6_236 = arith.constant 6 : index
    %c0_237 = arith.constant 0 : index
    %c0_238 = arith.constant 0 : index
    %379 = vector.load %arg9[%c6_236, %c0_237, %c0_238] : memref<8x32x8xbf16, #tpu.memory_space<vmem>>, vector<1x32x8xbf16>
    %380 = vector.shape_cast %379 : vector<1x32x8xbf16> to vector<32x8xbf16>
    %381 = arith.truncf %279 : vector<16x32xf32> to vector<16x32xbf16>
    %cst_239 = arith.constant dense<0.000000e+00> : vector<16x8xf32>
    %382 = tpu.matmul %381, %380, %cst_239 {dimension_numbers = #tpu.dot_dimension_numbers<[1], [0], [0], [1], [0, 0, 1, 1], [], []>} : vector<16x32xbf16>, vector<32x8xbf16>, vector<16x8xf32> -> vector<16x8xf32>
    %c6_240 = arith.constant 6 : index
    %c0_241 = arith.constant 0 : index
    %c0_242 = arith.constant 0 : index
    %383 = vector.load %arg10[%c6_240, %c0_241, %c0_242] : memref<8x1x8xf32, #tpu.memory_space<vmem>>, vector<1x1x8xf32>
    %384 = vector.shape_cast %383 : vector<1x1x8xf32> to vector<1x8xf32>
    %385 = vector.broadcast %384 : vector<1x8xf32> to vector<16x8xf32>
    %386 = arith.addf %382, %385 : vector<16x8xf32>
    %cst_243 = arith.constant dense<0.000000e+00> : vector<16x16xf32>
    %387 = tpu.matmul %370, %378, %cst_243 {dimension_numbers = #tpu.dot_dimension_numbers<[1], [1], [0], [0], [0, 0, 1, 0], [], []>} : vector<16x8xf32>, vector<16x8xf32>, vector<16x16xf32> -> vector<16x16xf32>
    %388 = arith.addf %387, %0 : vector<16x16xf32>
    %cst_244 = arith.constant dense<0xFF800000> : vector<16xf32>
    %389 = vector.multi_reduction <maximumf>, %388, %cst_244 [1] : vector<16x16xf32> to vector<16xf32>
    %390 = vector.shape_cast %389 : vector<16xf32> to vector<16x1xf32>
    %391 = vector.broadcast %390 : vector<16x1xf32> to vector<16x16xf32>
    %392 = arith.subf %388, %391 : vector<16x16xf32>
    %393 = math.exp %392 : vector<16x16xf32>
    %cst_245 = arith.constant dense<0.000000e+00> : vector<16xf32>
    %394 = vector.multi_reduction <add>, %393, %cst_245 [1] : vector<16x16xf32> to vector<16xf32>
    %395 = vector.shape_cast %394 : vector<16xf32> to vector<16x1xf32>
    %396 = tpu.reciprocal %395 {approx = true} : vector<16x1xf32> -> vector<16x1xf32>
    %397 = vector.broadcast %396 : vector<16x1xf32> to vector<16x16xf32>
    %398 = arith.mulf %393, %397 : vector<16x16xf32>
    %cst_246 = arith.constant dense<0.000000e+00> : vector<16x8xf32>
    %399 = tpu.matmul %398, %386, %cst_246 {dimension_numbers = #tpu.dot_dimension_numbers<[1], [0], [0], [1], [0, 0, 1, 1], [], []>} : vector<16x16xf32>, vector<16x8xf32>, vector<16x8xf32> -> vector<16x8xf32>
    %c6_247 = arith.constant 6 : index
    %c0_248 = arith.constant 0 : index
    %c0_249 = arith.constant 0 : index
    %400 = vector.load %arg11[%c6_247, %c0_248, %c0_249] : memref<8x8x32xbf16, #tpu.memory_space<vmem>>, vector<1x8x32xbf16>
    %401 = vector.shape_cast %400 : vector<1x8x32xbf16> to vector<8x32xbf16>
    %402 = arith.truncf %399 : vector<16x8xf32> to vector<16x8xbf16>
    %cst_250 = arith.constant dense<0.000000e+00> : vector<16x32xf32>
    %403 = tpu.matmul %402, %401, %cst_250 {dimension_numbers = #tpu.dot_dimension_numbers<[1], [0], [0], [1], [0, 0, 1, 1], [], []>} : vector<16x8xbf16>, vector<8x32xbf16>, vector<16x32xf32> -> vector<16x32xf32>
    %404 = arith.addf %362, %403 : vector<16x32xf32>
    %c7 = arith.constant 7 : index
    %c0_251 = arith.constant 0 : index
    %c0_252 = arith.constant 0 : index
    %405 = vector.load %arg5[%c7, %c0_251, %c0_252] : memref<8x32x8xbf16, #tpu.memory_space<vmem>>, vector<1x32x8xbf16>
    %406 = vector.shape_cast %405 : vector<1x32x8xbf16> to vector<32x8xbf16>
    %407 = arith.truncf %279 : vector<16x32xf32> to vector<16x32xbf16>
    %cst_253 = arith.constant dense<0.000000e+00> : vector<16x8xf32>
    %408 = tpu.matmul %407, %406, %cst_253 {dimension_numbers = #tpu.dot_dimension_numbers<[1], [0], [0], [1], [0, 0, 1, 1], [], []>} : vector<16x32xbf16>, vector<32x8xbf16>, vector<16x8xf32> -> vector<16x8xf32>
    %c7_254 = arith.constant 7 : index
    %c0_255 = arith.constant 0 : index
    %c0_256 = arith.constant 0 : index
    %409 = vector.load %arg6[%c7_254, %c0_255, %c0_256] : memref<8x1x8xf32, #tpu.memory_space<vmem>>, vector<1x1x8xf32>
    %410 = vector.shape_cast %409 : vector<1x1x8xf32> to vector<1x8xf32>
    %411 = vector.broadcast %410 : vector<1x8xf32> to vector<16x8xf32>
    %412 = arith.addf %408, %411 : vector<16x8xf32>
    %c7_257 = arith.constant 7 : index
    %c0_258 = arith.constant 0 : index
    %c0_259 = arith.constant 0 : index
    %413 = vector.load %arg7[%c7_257, %c0_258, %c0_259] : memref<8x32x8xbf16, #tpu.memory_space<vmem>>, vector<1x32x8xbf16>
    %414 = vector.shape_cast %413 : vector<1x32x8xbf16> to vector<32x8xbf16>
    %415 = arith.truncf %279 : vector<16x32xf32> to vector<16x32xbf16>
    %cst_260 = arith.constant dense<0.000000e+00> : vector<16x8xf32>
    %416 = tpu.matmul %415, %414, %cst_260 {dimension_numbers = #tpu.dot_dimension_numbers<[1], [0], [0], [1], [0, 0, 1, 1], [], []>} : vector<16x32xbf16>, vector<32x8xbf16>, vector<16x8xf32> -> vector<16x8xf32>
    %c7_261 = arith.constant 7 : index
    %c0_262 = arith.constant 0 : index
    %c0_263 = arith.constant 0 : index
    %417 = vector.load %arg8[%c7_261, %c0_262, %c0_263] : memref<8x1x8xf32, #tpu.memory_space<vmem>>, vector<1x1x8xf32>
    %418 = vector.shape_cast %417 : vector<1x1x8xf32> to vector<1x8xf32>
    %419 = vector.broadcast %418 : vector<1x8xf32> to vector<16x8xf32>
    %420 = arith.addf %416, %419 : vector<16x8xf32>
    %c7_264 = arith.constant 7 : index
    %c0_265 = arith.constant 0 : index
    %c0_266 = arith.constant 0 : index
    %421 = vector.load %arg9[%c7_264, %c0_265, %c0_266] : memref<8x32x8xbf16, #tpu.memory_space<vmem>>, vector<1x32x8xbf16>
    %422 = vector.shape_cast %421 : vector<1x32x8xbf16> to vector<32x8xbf16>
    %423 = arith.truncf %279 : vector<16x32xf32> to vector<16x32xbf16>
    %cst_267 = arith.constant dense<0.000000e+00> : vector<16x8xf32>
    %424 = tpu.matmul %423, %422, %cst_267 {dimension_numbers = #tpu.dot_dimension_numbers<[1], [0], [0], [1], [0, 0, 1, 1], [], []>} : vector<16x32xbf16>, vector<32x8xbf16>, vector<16x8xf32> -> vector<16x8xf32>
    %c7_268 = arith.constant 7 : index
    %c0_269 = arith.constant 0 : index
    %c0_270 = arith.constant 0 : index
    %425 = vector.load %arg10[%c7_268, %c0_269, %c0_270] : memref<8x1x8xf32, #tpu.memory_space<vmem>>, vector<1x1x8xf32>
    %426 = vector.shape_cast %425 : vector<1x1x8xf32> to vector<1x8xf32>
    %427 = vector.broadcast %426 : vector<1x8xf32> to vector<16x8xf32>
    %428 = arith.addf %424, %427 : vector<16x8xf32>
    %cst_271 = arith.constant dense<0.000000e+00> : vector<16x16xf32>
    %429 = tpu.matmul %412, %420, %cst_271 {dimension_numbers = #tpu.dot_dimension_numbers<[1], [1], [0], [0], [0, 0, 1, 0], [], []>} : vector<16x8xf32>, vector<16x8xf32>, vector<16x16xf32> -> vector<16x16xf32>
    %430 = arith.addf %429, %0 : vector<16x16xf32>
    %cst_272 = arith.constant dense<0xFF800000> : vector<16xf32>
    %431 = vector.multi_reduction <maximumf>, %430, %cst_272 [1] : vector<16x16xf32> to vector<16xf32>
    %432 = vector.shape_cast %431 : vector<16xf32> to vector<16x1xf32>
    %433 = vector.broadcast %432 : vector<16x1xf32> to vector<16x16xf32>
    %434 = arith.subf %430, %433 : vector<16x16xf32>
    %435 = math.exp %434 : vector<16x16xf32>
    %cst_273 = arith.constant dense<0.000000e+00> : vector<16xf32>
    %436 = vector.multi_reduction <add>, %435, %cst_273 [1] : vector<16x16xf32> to vector<16xf32>
    %437 = vector.shape_cast %436 : vector<16xf32> to vector<16x1xf32>
    %438 = tpu.reciprocal %437 {approx = true} : vector<16x1xf32> -> vector<16x1xf32>
    %439 = vector.broadcast %438 : vector<16x1xf32> to vector<16x16xf32>
    %440 = arith.mulf %435, %439 : vector<16x16xf32>
    %cst_274 = arith.constant dense<0.000000e+00> : vector<16x8xf32>
    %441 = tpu.matmul %440, %428, %cst_274 {dimension_numbers = #tpu.dot_dimension_numbers<[1], [0], [0], [1], [0, 0, 1, 1], [], []>} : vector<16x16xf32>, vector<16x8xf32>, vector<16x8xf32> -> vector<16x8xf32>
    %c7_275 = arith.constant 7 : index
    %c0_276 = arith.constant 0 : index
    %c0_277 = arith.constant 0 : index
    %442 = vector.load %arg11[%c7_275, %c0_276, %c0_277] : memref<8x8x32xbf16, #tpu.memory_space<vmem>>, vector<1x8x32xbf16>
    %443 = vector.shape_cast %442 : vector<1x8x32xbf16> to vector<8x32xbf16>
    %444 = arith.truncf %441 : vector<16x8xf32> to vector<16x8xbf16>
    %cst_278 = arith.constant dense<0.000000e+00> : vector<16x32xf32>
    %445 = tpu.matmul %444, %443, %cst_278 {dimension_numbers = #tpu.dot_dimension_numbers<[1], [0], [0], [1], [0, 0, 1, 1], [], []>} : vector<16x8xbf16>, vector<8x32xbf16>, vector<16x32xf32> -> vector<16x32xf32>
    %446 = arith.addf %404, %445 : vector<16x32xf32>
    %447 = arith.addf %279, %446 : vector<16x32xf32>
    %c1_279 = arith.constant 1 : index
    %c0_280 = arith.constant 0 : index
    %c0_281 = arith.constant 0 : index
    %448 = vector.load %arg12[%c1_279, %c0_280, %c0_281] : memref<2x1x32xf32, #tpu.memory_space<vmem>>, vector<1x1x32xf32>
    %449 = vector.shape_cast %448 : vector<1x1x32xf32> to vector<1x32xf32>
    %450 = vector.broadcast %449 : vector<1x32xf32> to vector<16x32xf32>
    %451 = arith.addf %447, %450 : vector<16x32xf32>
    %c1_282 = arith.constant 1 : index
    %c0_283 = arith.constant 0 : index
    %c0_284 = arith.constant 0 : index
    %452 = vector.load %arg13[%c1_282, %c0_283, %c0_284] : memref<2x1x32xf32, #tpu.memory_space<vmem>>, vector<1x1x32xf32>
    %453 = vector.shape_cast %452 : vector<1x1x32xf32> to vector<1x32xf32>
    %c1_285 = arith.constant 1 : index
    %c0_286 = arith.constant 0 : index
    %c0_287 = arith.constant 0 : index
    %454 = vector.load %arg14[%c1_285, %c0_286, %c0_287] : memref<2x1x32xf32, #tpu.memory_space<vmem>>, vector<1x1x32xf32>
    %455 = vector.shape_cast %454 : vector<1x1x32xf32> to vector<1x32xf32>
    %cst_288 = arith.constant dense<0.000000e+00> : vector<16xf32>
    %456 = vector.multi_reduction <add>, %451, %cst_288 [1] : vector<16x32xf32> to vector<16xf32>
    %457 = vector.shape_cast %456 : vector<16xf32> to vector<16x1xf32>
    %cst_289 = arith.constant 3.200000e+01 : f32
    %458 = vector.broadcast %cst_289 : f32 to vector<16x1xf32>
    %459 = arith.divf %457, %458 : vector<16x1xf32>
    %460 = vector.broadcast %459 : vector<16x1xf32> to vector<16x32xf32>
    %461 = arith.subf %451, %460 : vector<16x32xf32>
    %462 = arith.mulf %461, %461 : vector<16x32xf32>
    %cst_290 = arith.constant dense<0.000000e+00> : vector<16xf32>
    %463 = vector.multi_reduction <add>, %462, %cst_290 [1] : vector<16x32xf32> to vector<16xf32>
    %464 = vector.shape_cast %463 : vector<16xf32> to vector<16x1xf32>
    %cst_291 = arith.constant 3.200000e+01 : f32
    %465 = vector.broadcast %cst_291 : f32 to vector<16x1xf32>
    %466 = arith.divf %464, %465 : vector<16x1xf32>
    %467 = vector.broadcast %459 : vector<16x1xf32> to vector<16x32xf32>
    %468 = arith.subf %451, %467 : vector<16x32xf32>
    %cst_292 = arith.constant 9.99999996E-13 : f32
    %469 = vector.broadcast %cst_292 : f32 to vector<16x1xf32>
    %470 = arith.addf %466, %469 : vector<16x1xf32>
    %471 = math.rsqrt %470 : vector<16x1xf32>
    %472 = vector.broadcast %471 : vector<16x1xf32> to vector<16x32xf32>
    %473 = arith.mulf %468, %472 : vector<16x32xf32>
    %474 = vector.broadcast %453 : vector<1x32xf32> to vector<16x32xf32>
    %475 = arith.mulf %473, %474 : vector<16x32xf32>
    %476 = vector.broadcast %455 : vector<1x32xf32> to vector<16x32xf32>
    %477 = arith.addf %475, %476 : vector<16x32xf32>
    %c1_293 = arith.constant 1 : index
    %c0_294 = arith.constant 0 : index
    %c0_295 = arith.constant 0 : index
    %478 = vector.load %arg15[%c1_293, %c0_294, %c0_295] : memref<2x32x128xbf16, #tpu.memory_space<vmem>>, vector<1x32x128xbf16>
    %479 = vector.shape_cast %478 : vector<1x32x128xbf16> to vector<32x128xbf16>
    %480 = arith.truncf %477 : vector<16x32xf32> to vector<16x32xbf16>
    %cst_296 = arith.constant dense<0.000000e+00> : vector<16x128xf32>
    %481 = tpu.matmul %480, %479, %cst_296 {dimension_numbers = #tpu.dot_dimension_numbers<[1], [0], [0], [1], [0, 0, 1, 1], [], []>} : vector<16x32xbf16>, vector<32x128xbf16>, vector<16x128xf32> -> vector<16x128xf32>
    %c1_297 = arith.constant 1 : index
    %c0_298 = arith.constant 0 : index
    %c0_299 = arith.constant 0 : index
    %482 = vector.load %arg16[%c1_297, %c0_298, %c0_299] : memref<2x1x128xf32, #tpu.memory_space<vmem>>, vector<1x1x128xf32>
    %483 = vector.shape_cast %482 : vector<1x1x128xf32> to vector<1x128xf32>
    %484 = vector.broadcast %483 : vector<1x128xf32> to vector<16x128xf32>
    %485 = arith.addf %481, %484 : vector<16x128xf32>
    %486 = arith.mulf %485, %485 : vector<16x128xf32>
    %487 = arith.mulf %485, %486 : vector<16x128xf32>
    %cst_300 = arith.constant 4.471500e-02 : f32
    %488 = vector.broadcast %cst_300 : f32 to vector<16x128xf32>
    %489 = arith.mulf %488, %487 : vector<16x128xf32>
    %490 = arith.addf %485, %489 : vector<16x128xf32>
    %cst_301 = arith.constant 0.797884583 : f32
    %491 = vector.broadcast %cst_301 : f32 to vector<16x128xf32>
    %492 = arith.mulf %491, %490 : vector<16x128xf32>
    %493 = math.tanh %492 : vector<16x128xf32>
    %cst_302 = arith.constant 1.000000e+00 : f32
    %494 = vector.broadcast %cst_302 : f32 to vector<16x128xf32>
    %495 = arith.addf %494, %493 : vector<16x128xf32>
    %cst_303 = arith.constant 5.000000e-01 : f32
    %496 = vector.broadcast %cst_303 : f32 to vector<16x128xf32>
    %497 = arith.mulf %496, %495 : vector<16x128xf32>
    %498 = arith.mulf %485, %497 : vector<16x128xf32>
    %c1_304 = arith.constant 1 : index
    %c0_305 = arith.constant 0 : index
    %c0_306 = arith.constant 0 : index
    %499 = vector.load %arg17[%c1_304, %c0_305, %c0_306] : memref<2x128x32xbf16, #tpu.memory_space<vmem>>, vector<1x128x32xbf16>
    %500 = vector.shape_cast %499 : vector<1x128x32xbf16> to vector<128x32xbf16>
    %501 = arith.truncf %498 : vector<16x128xf32> to vector<16x128xbf16>
    %cst_307 = arith.constant dense<0.000000e+00> : vector<16x32xf32>
    %502 = tpu.matmul %501, %500, %cst_307 {dimension_numbers = #tpu.dot_dimension_numbers<[1], [0], [0], [1], [0, 0, 1, 1], [], []>} : vector<16x128xbf16>, vector<128x32xbf16>, vector<16x32xf32> -> vector<16x32xf32>
    %c1_308 = arith.constant 1 : index
    %c0_309 = arith.constant 0 : index
    %c0_310 = arith.constant 0 : index
    %503 = vector.load %arg18[%c1_308, %c0_309, %c0_310] : memref<2x1x32xf32, #tpu.memory_space<vmem>>, vector<1x1x32xf32>
    %504 = vector.shape_cast %503 : vector<1x1x32xf32> to vector<1x32xf32>
    %505 = vector.broadcast %504 : vector<1x32xf32> to vector<16x32xf32>
    %506 = arith.addf %502, %505 : vector<16x32xf32>
    %507 = arith.addf %477, %506 : vector<16x32xf32>
    %c1_311 = arith.constant 1 : index
    %c0_312 = arith.constant 0 : index
    %c0_313 = arith.constant 0 : index
    %508 = vector.load %arg19[%c1_311, %c0_312, %c0_313] : memref<2x1x32xf32, #tpu.memory_space<vmem>>, vector<1x1x32xf32>
    %509 = vector.shape_cast %508 : vector<1x1x32xf32> to vector<1x32xf32>
    %c1_314 = arith.constant 1 : index
    %c0_315 = arith.constant 0 : index
    %c0_316 = arith.constant 0 : index
    %510 = vector.load %arg20[%c1_314, %c0_315, %c0_316] : memref<2x1x32xf32, #tpu.memory_space<vmem>>, vector<1x1x32xf32>
    %511 = vector.shape_cast %510 : vector<1x1x32xf32> to vector<1x32xf32>
    %cst_317 = arith.constant dense<0.000000e+00> : vector<16xf32>
    %512 = vector.multi_reduction <add>, %507, %cst_317 [1] : vector<16x32xf32> to vector<16xf32>
    %513 = vector.shape_cast %512 : vector<16xf32> to vector<16x1xf32>
    %cst_318 = arith.constant 3.200000e+01 : f32
    %514 = vector.broadcast %cst_318 : f32 to vector<16x1xf32>
    %515 = arith.divf %513, %514 : vector<16x1xf32>
    %516 = vector.broadcast %515 : vector<16x1xf32> to vector<16x32xf32>
    %517 = arith.subf %507, %516 : vector<16x32xf32>
    %518 = arith.mulf %517, %517 : vector<16x32xf32>
    %cst_319 = arith.constant dense<0.000000e+00> : vector<16xf32>
    %519 = vector.multi_reduction <add>, %518, %cst_319 [1] : vector<16x32xf32> to vector<16xf32>
    %520 = vector.shape_cast %519 : vector<16xf32> to vector<16x1xf32>
    %cst_320 = arith.constant 3.200000e+01 : f32
    %521 = vector.broadcast %cst_320 : f32 to vector<16x1xf32>
    %522 = arith.divf %520, %521 : vector<16x1xf32>
    %523 = vector.broadcast %515 : vector<16x1xf32> to vector<16x32xf32>
    %524 = arith.subf %507, %523 : vector<16x32xf32>
    %cst_321 = arith.constant 9.99999996E-13 : f32
    %525 = vector.broadcast %cst_321 : f32 to vector<16x1xf32>
    %526 = arith.addf %522, %525 : vector<16x1xf32>
    %527 = math.rsqrt %526 : vector<16x1xf32>
    %528 = vector.broadcast %527 : vector<16x1xf32> to vector<16x32xf32>
    %529 = arith.mulf %524, %528 : vector<16x32xf32>
    %530 = vector.broadcast %509 : vector<1x32xf32> to vector<16x32xf32>
    %531 = arith.mulf %529, %530 : vector<16x32xf32>
    %532 = vector.broadcast %511 : vector<1x32xf32> to vector<16x32xf32>
    %533 = arith.addf %531, %532 : vector<16x32xf32>
    %c0_322 = arith.constant 0 : index
    %c0_323 = arith.constant 0 : index
    %c0_324 = arith.constant 0 : index
    %534 = vector.load %arg23[%c0_322, %c0_323, %c0_324] : memref<3x16x16xbf16, #tpu.memory_space<vmem>>, vector<1x16x16xbf16>
    %535 = vector.shape_cast %534 : vector<1x16x16xbf16> to vector<16x16xbf16>
    %536 = arith.truncf %533 : vector<16x32xf32> to vector<16x32xbf16>
    %cst_325 = arith.constant dense<0.000000e+00> : vector<16x32xf32>
    %537 = tpu.matmul %535, %536, %cst_325 {dimension_numbers = #tpu.dot_dimension_numbers<[1], [0], [0], [1], [0, 0, 1, 1], [], []>} : vector<16x16xbf16>, vector<16x32xbf16>, vector<16x32xf32> -> vector<16x32xf32>
    %c0_326 = arith.constant 0 : index
    %c0_327 = arith.constant 0 : index
    %c0_328 = arith.constant 0 : index
    %538 = vector.load %arg21[%c0_326, %c0_327, %c0_328] : memref<3x32x128xbf16, #tpu.memory_space<vmem>>, vector<1x32x128xbf16>
    %539 = vector.shape_cast %538 : vector<1x32x128xbf16> to vector<32x128xbf16>
    %540 = arith.truncf %537 : vector<16x32xf32> to vector<16x32xbf16>
    %cst_329 = arith.constant dense<0.000000e+00> : vector<16x128xf32>
    %541 = tpu.matmul %540, %539, %cst_329 {dimension_numbers = #tpu.dot_dimension_numbers<[1], [0], [0], [1], [0, 0, 1, 1], [], []>} : vector<16x32xbf16>, vector<32x128xbf16>, vector<16x128xf32> -> vector<16x128xf32>
    %c0_330 = arith.constant 0 : index
    %c0_331 = arith.constant 0 : index
    %542 = vector.load %arg22[%c0_330, %c0_331] : memref<1x128xf32, #tpu.memory_space<vmem>>, vector<1x128xf32>
    %543 = vector.broadcast %542 : vector<1x128xf32> to vector<16x128xf32>
    %544 = arith.addf %541, %543 : vector<16x128xf32>
    %c1_332 = arith.constant 1 : index
    %c0_333 = arith.constant 0 : index
    %c0_334 = arith.constant 0 : index
    %545 = vector.load %arg23[%c1_332, %c0_333, %c0_334] : memref<3x16x16xbf16, #tpu.memory_space<vmem>>, vector<1x16x16xbf16>
    %546 = vector.shape_cast %545 : vector<1x16x16xbf16> to vector<16x16xbf16>
    %547 = arith.truncf %533 : vector<16x32xf32> to vector<16x32xbf16>
    %cst_335 = arith.constant dense<0.000000e+00> : vector<16x32xf32>
    %548 = tpu.matmul %546, %547, %cst_335 {dimension_numbers = #tpu.dot_dimension_numbers<[1], [0], [0], [1], [0, 0, 1, 1], [], []>} : vector<16x16xbf16>, vector<16x32xbf16>, vector<16x32xf32> -> vector<16x32xf32>
    %c1_336 = arith.constant 1 : index
    %c0_337 = arith.constant 0 : index
    %c0_338 = arith.constant 0 : index
    %549 = vector.load %arg21[%c1_336, %c0_337, %c0_338] : memref<3x32x128xbf16, #tpu.memory_space<vmem>>, vector<1x32x128xbf16>
    %550 = vector.shape_cast %549 : vector<1x32x128xbf16> to vector<32x128xbf16>
    %551 = arith.truncf %548 : vector<16x32xf32> to vector<16x32xbf16>
    %cst_339 = arith.constant dense<0.000000e+00> : vector<16x128xf32>
    %552 = tpu.matmul %551, %550, %cst_339 {dimension_numbers = #tpu.dot_dimension_numbers<[1], [0], [0], [1], [0, 0, 1, 1], [], []>} : vector<16x32xbf16>, vector<32x128xbf16>, vector<16x128xf32> -> vector<16x128xf32>
    %553 = arith.addf %544, %552 : vector<16x128xf32>
    %c2_340 = arith.constant 2 : index
    %c0_341 = arith.constant 0 : index
    %c0_342 = arith.constant 0 : index
    %554 = vector.load %arg23[%c2_340, %c0_341, %c0_342] : memref<3x16x16xbf16, #tpu.memory_space<vmem>>, vector<1x16x16xbf16>
    %555 = vector.shape_cast %554 : vector<1x16x16xbf16> to vector<16x16xbf16>
    %556 = arith.truncf %533 : vector<16x32xf32> to vector<16x32xbf16>
    %cst_343 = arith.constant dense<0.000000e+00> : vector<16x32xf32>
    %557 = tpu.matmul %555, %556, %cst_343 {dimension_numbers = #tpu.dot_dimension_numbers<[1], [0], [0], [1], [0, 0, 1, 1], [], []>} : vector<16x16xbf16>, vector<16x32xbf16>, vector<16x32xf32> -> vector<16x32xf32>
    %c2_344 = arith.constant 2 : index
    %c0_345 = arith.constant 0 : index
    %c0_346 = arith.constant 0 : index
    %558 = vector.load %arg21[%c2_344, %c0_345, %c0_346] : memref<3x32x128xbf16, #tpu.memory_space<vmem>>, vector<1x32x128xbf16>
    %559 = vector.shape_cast %558 : vector<1x32x128xbf16> to vector<32x128xbf16>
    %560 = arith.truncf %557 : vector<16x32xf32> to vector<16x32xbf16>
    %cst_347 = arith.constant dense<0.000000e+00> : vector<16x128xf32>
    %561 = tpu.matmul %560, %559, %cst_347 {dimension_numbers = #tpu.dot_dimension_numbers<[1], [0], [0], [1], [0, 0, 1, 1], [], []>} : vector<16x32xbf16>, vector<32x128xbf16>, vector<16x128xf32> -> vector<16x128xf32>
    %562 = arith.addf %553, %561 : vector<16x128xf32>
    %cst_348 = arith.constant 0.000000e+00 : f32
    %563 = vector.broadcast %cst_348 : f32 to vector<16x128xf32>
    %564 = arith.maximumf %562, %563 : vector<16x128xf32>
    %565 = vector.shape_cast %564 : vector<16x128xf32> to vector<2x8x128xf32>
    %cst_349 = arith.constant dense<0xFF800000> : vector<2x128xf32>
    %566 = vector.multi_reduction <maximumf>, %565, %cst_349 [1] : vector<2x8x128xf32> to vector<2x128xf32>
    %c0_350 = arith.constant 0 : index
    %c0_351 = arith.constant 0 : index
    %567 = vector.load %arg24[%c0_350, %c0_351] : memref<2x128xf32, #tpu.memory_space<vmem>>, vector<2x128xf32>
    tpu.vector_store %arg24[%c0_350, %c0_351], %566 {strides = array<i32>} : memref<2x128xf32, #tpu.memory_space<vmem>>, vector<2x128xf32>,
    return
  }
  func.func @transform_0(%arg0: i32) -> (i32, i32) {
    %c0_i32 = arith.constant 0 : i32
    %c0_i32_0 = arith.constant 0 : i32
    %c0_i32_1 = arith.constant 0 : i32
    return %c0_i32, %c0_i32_0 : i32, i32
  }
  func.func @transform_1(%arg0: i32) -> (i32, i32) {
    %c0_i32 = arith.constant 0 : i32
    %c0_i32_0 = arith.constant 0 : i32
    %c0_i32_1 = arith.constant 0 : i32
    return %c0_i32, %c0_i32_0 : i32, i32
  }
  func.func @transform_2(%arg0: i32) -> (i32, i32) {
    %c0_i32 = arith.constant 0 : i32
    %c0_i32_0 = arith.constant 0 : i32
    %c0_i32_1 = arith.constant 0 : i32
    return %c0_i32, %c0_i32_0 : i32, i32
  }
  func.func @transform_3(%arg0: i32) -> (i32, i32) {
    %c0_i32 = arith.constant 0 : i32
    %c0_i32_0 = arith.constant 0 : i32
    %c0_i32_1 = arith.constant 0 : i32
    return %c0_i32, %c0_i32_0 : i32, i32
  }
  func.func @transform_4(%arg0: i32) -> (i32, i32, i32) {
    %c0_i32 = arith.constant 0 : i32
    %c0_i32_0 = arith.constant 0 : i32
    %c0_i32_1 = arith.constant 0 : i32
    %c0_i32_2 = arith.constant 0 : i32
    return %c0_i32, %c0_i32_0, %c0_i32_1 : i32, i32, i32
  }
  func.func @transform_5(%arg0: i32) -> (i32, i32, i32) {
    %c0_i32 = arith.constant 0 : i32
    %c0_i32_0 = arith.constant 0 : i32
    %c0_i32_1 = arith.constant 0 : i32
    %c0_i32_2 = arith.constant 0 : i32
    return %c0_i32, %c0_i32_0, %c0_i32_1 : i32, i32, i32
  }
  func.func @transform_6(%arg0: i32) -> (i32, i32, i32) {
    %c0_i32 = arith.constant 0 : i32
    %c0_i32_0 = arith.constant 0 : i32
    %c0_i32_1 = arith.constant 0 : i32
    %c0_i32_2 = arith.constant 0 : i32
    return %c0_i32, %c0_i32_0, %c0_i32_1 : i32, i32, i32
  }
  func.func @transform_7(%arg0: i32) -> (i32, i32, i32) {
    %c0_i32 = arith.constant 0 : i32
    %c0_i32_0 = arith.constant 0 : i32
    %c0_i32_1 = arith.constant 0 : i32
    %c0_i32_2 = arith.constant 0 : i32
    return %c0_i32, %c0_i32_0, %c0_i32_1 : i32, i32, i32
  }
  func.func @transform_8(%arg0: i32) -> (i32, i32, i32) {
    %c0_i32 = arith.constant 0 : i32
    %c0_i32_0 = arith.constant 0 : i32
    %c0_i32_1 = arith.constant 0 : i32
    %c0_i32_2 = arith.constant 0 : i32
    return %c0_i32, %c0_i32_0, %c0_i32_1 : i32, i32, i32
  }
  func.func @transform_9(%arg0: i32) -> (i32, i32, i32) {
    %c0_i32 = arith.constant 0 : i32
    %c0_i32_0 = arith.constant 0 : i32
    %c0_i32_1 = arith.constant 0 : i32
    %c0_i32_2 = arith.constant 0 : i32
    return %c0_i32, %c0_i32_0, %c0_i32_1 : i32, i32, i32
  }
  func.func @transform_10(%arg0: i32) -> (i32, i32, i32) {
    %c0_i32 = arith.constant 0 : i32
    %c0_i32_0 = arith.constant 0 : i32
    %c0_i32_1 = arith.constant 0 : i32
    %c0_i32_2 = arith.constant 0 : i32
    return %c0_i32, %c0_i32_0, %c0_i32_1 : i32, i32, i32
  }
  func.func @transform_11(%arg0: i32) -> (i32, i32, i32) {
    %c0_i32 = arith.constant 0 : i32
    %c0_i32_0 = arith.constant 0 : i32
    %c0_i32_1 = arith.constant 0 : i32
    %c0_i32_2 = arith.constant 0 : i32
    return %c0_i32, %c0_i32_0, %c0_i32_1 : i32, i32, i32
  }
  func.func @transform_12(%arg0: i32) -> (i32, i32, i32) {
    %c0_i32 = arith.constant 0 : i32
    %c0_i32_0 = arith.constant 0 : i32
    %c0_i32_1 = arith.constant 0 : i32
    %c0_i32_2 = arith.constant 0 : i32
    return %c0_i32, %c0_i32_0, %c0_i32_1 : i32, i32, i32
  }
  func.func @transform_13(%arg0: i32) -> (i32, i32, i32) {
    %c0_i32 = arith.constant 0 : i32
    %c0_i32_0 = arith.constant 0 : i32
    %c0_i32_1 = arith.constant 0 : i32
    %c0_i32_2 = arith.constant 0 : i32
    return %c0_i32, %c0_i32_0, %c0_i32_1 : i32, i32, i32
  }
  func.func @transform_14(%arg0: i32) -> (i32, i32, i32) {
    %c0_i32 = arith.constant 0 : i32
    %c0_i32_0 = arith.constant 0 : i32
    %c0_i32_1 = arith.constant 0 : i32
    %c0_i32_2 = arith.constant 0 : i32
    return %c0_i32, %c0_i32_0, %c0_i32_1 : i32, i32, i32
  }
  func.func @transform_15(%arg0: i32) -> (i32, i32, i32) {
    %c0_i32 = arith.constant 0 : i32
    %c0_i32_0 = arith.constant 0 : i32
    %c0_i32_1 = arith.constant 0 : i32
    %c0_i32_2 = arith.constant 0 : i32
    return %c0_i32, %c0_i32_0, %c0_i32_1 : i32, i32, i32
  }
  func.func @transform_16(%arg0: i32) -> (i32, i32, i32) {
    %c0_i32 = arith.constant 0 : i32
    %c0_i32_0 = arith.constant 0 : i32
    %c0_i32_1 = arith.constant 0 : i32
    %c0_i32_2 = arith.constant 0 : i32
    return %c0_i32, %c0_i32_0, %c0_i32_1 : i32, i32, i32
  }
  func.func @transform_17(%arg0: i32) -> (i32, i32, i32) {
    %c0_i32 = arith.constant 0 : i32
    %c0_i32_0 = arith.constant 0 : i32
    %c0_i32_1 = arith.constant 0 : i32
    %c0_i32_2 = arith.constant 0 : i32
    return %c0_i32, %c0_i32_0, %c0_i32_1 : i32, i32, i32
  }
  func.func @transform_18(%arg0: i32) -> (i32, i32, i32) {
    %c0_i32 = arith.constant 0 : i32
    %c0_i32_0 = arith.constant 0 : i32
    %c0_i32_1 = arith.constant 0 : i32
    %c0_i32_2 = arith.constant 0 : i32
    return %c0_i32, %c0_i32_0, %c0_i32_1 : i32, i32, i32
  }
  func.func @transform_19(%arg0: i32) -> (i32, i32, i32) {
    %c0_i32 = arith.constant 0 : i32
    %c0_i32_0 = arith.constant 0 : i32
    %c0_i32_1 = arith.constant 0 : i32
    %c0_i32_2 = arith.constant 0 : i32
    return %c0_i32, %c0_i32_0, %c0_i32_1 : i32, i32, i32
  }
  func.func @transform_20(%arg0: i32) -> (i32, i32, i32) {
    %c0_i32 = arith.constant 0 : i32
    %c0_i32_0 = arith.constant 0 : i32
    %c0_i32_1 = arith.constant 0 : i32
    %c0_i32_2 = arith.constant 0 : i32
    return %c0_i32, %c0_i32_0, %c0_i32_1 : i32, i32, i32
  }
  func.func @transform_21(%arg0: i32) -> (i32, i32) {
    %c0_i32 = arith.constant 0 : i32
    %c0_i32_0 = arith.constant 0 : i32
    %c0_i32_1 = arith.constant 0 : i32
    return %c0_i32, %c0_i32_0 : i32, i32
  }
  func.func @transform_22(%arg0: i32) -> (i32, i32, i32) {
    %c0_i32 = arith.constant 0 : i32
    %c0_i32_0 = arith.constant 0 : i32
    %c0_i32_1 = arith.constant 0 : i32
    %c0_i32_2 = arith.constant 0 : i32
    return %c0_i32, %c0_i32_0, %c0_i32_1 : i32, i32, i32
  }
  func.func @transform_23(%arg0: i32) -> (i32, i32) {
    %c0_i32 = arith.constant 0 : i32
    %c0_i32_0 = arith.constant 0 : i32
    %c0_i32_1 = arith.constant 0 : i32
    return %c0_i32, %c0_i32_0 : i32, i32
  }
}

</mosaic_0001>

<bundles_post_ra>
// kernel: bert2cnn_forward.1
= control target key start
LH: loop header
LB: loop body
LE: loop exit
PB: predicated region body
PF: predicated region fallthrough
CT: control target
= control target key end

     0   :  { %s6898_s0 = inlined_call_operand.vmem [shape: f32[16,32], index: 0, kind: input, shape index: {}]   ;;  %s6899_s1 = inlined_call_operand.vmem [shape: f32[16,16], index: 1, kind: input, shape index: {}]   ;;  %s6900_s2 = inlined_call_operand.vmem [shape: f32[1,32], index: 2, kind: input, shape index: {}]   ;;  %s6901_s3 = inlined_call_operand.vmem [shape: f32[1,32], index: 3, kind: input, shape index: {}]   ;;  %s6902_s4 = inlined_call_operand.vmem [shape: bf16[8,32,8], index: 4, kind: input, shape index: {}]   ;;  %s6903_s5 = inlined_call_operand.vmem [shape: f32[8,1,8], index: 5, kind: input, shape index: {}]   ;;  %s6904_s6 = inlined_call_operand.vmem [shape: bf16[8,32,8], index: 6, kind: input, shape index: {}]   ;;  %s6905_s7 = inlined_call_operand.vmem [shape: f32[8,1,8], index: 7, kind: input, shape index: {}]   ;;  %s6906_s8 = inlined_call_operand.vmem [shape: bf16[8,32,8], index: 8, kind: input, shape index: {}]   ;;  %s6907_s9 = inlined_call_operand.vmem [shape: f32[8,1,8], index: 9, kind: input, shape index: {}]   ;;  %s6908_s10 = inlined_call_operand.vmem [shape: bf16[8,8,32], index: 10, kind: input, shape index: {}]   ;;  %s6909_s11 = inlined_call_operand.vmem [shape: f32[2,1,32], index: 11, kind: input, shape index: {}]   ;;  %s6910_s12 = inlined_call_operand.vmem [shape: f32[2,1,32], index: 12, kind: input, shape index: {}]   ;;  %s6911_s13 = inlined_call_operand.vmem [shape: f32[2,1,32], index: 13, kind: input, shape index: {}]   ;;  %s6912_s14 = inlined_call_operand.vmem [shape: bf16[2,32,128], index: 14, kind: input, shape index: {}]   ;;  %s6913_s15 = inlined_call_operand.vmem [shape: f32[2,1,128], index: 15, kind: input, shape index: {}]   ;;  %s6914_s16 = inlined_call_operand.vmem [shape: bf16[2,128,32], index: 16, kind: input, shape index: {}]   ;;  %s6915_s17 = inlined_call_operand.vmem [shape: f32[2,1,32], index: 17, kind: input, shape index: {}]   ;;  %s6916_s18 = inlined_call_operand.vmem [shape: f32[2,1,32], index: 18, kind: input, shape index: {}]   ;;  %s6917_s19 = inlined_call_operand.vmem [shape: f32[2,1,32], index: 19, kind: input, shape index: {}]   ;;  %s6918_s20 = inlined_call_operand.vmem [shape: bf16[3,32,128], index: 20, kind: input, shape index: {}]   ;;  %s6919_s21 = inlined_call_operand.vmem [shape: f32[1,128], index: 21, kind: input, shape index: {}]   ;;  %s6920_s22 = inlined_call_operand.vmem [shape: bf16[3,16,16], index: 22, kind: input, shape index: {}]   ;;  %s6921_s23 = inlined_call_operand.hbm [shape: f32[2,128], index: 23, kind: output, shape index: {}]  }
   0x1   :  { %6928 = sst [smem:[#allocation5_spill]] %s6898_s0 }
   0x2   :  { %6929 = sst [smem:[#allocation6_spill]] %s6899_s1 }
   0x3   :  { %6930 = sst [smem:[#allocation7_spill]] %s6900_s2 }
   0x4   :  { %6931 = sst [smem:[#allocation8_spill]] %s6901_s3 }
   0x5   :  { %6932 = sst [smem:[#allocation9_spill]] %s6902_s4 }
   0x6   :  { %6933 = sst [smem:[#allocation10_spill]] %s6903_s5 }
   0x7   :  { %6934 = sst [smem:[#allocation11_spill]] %s6904_s6 }
   0x8   :  { %6935 = sst [smem:[#allocation12_spill]] %s6905_s7 }
   0x9   :  { %s6936_s24 = sld [smem:[#allocation5_spill]]  ;;  %vm82_vm0 = vcmask 261120  }
   0xf   :  { %v78_v0 = vld [vmem:[%s6936_s24] sm:$0xff]  ;;  %v79_v1 = vld [vmem:[%s6936_s24 + $0x8] sm:$0xff] }
  0x10   :  { %v83_v2 = vsel %vm82_vm0, %v78_v0, 0.0  ;;  %v86_v3 = vsel %vm82_vm0, %v79_v1, 0.0 }
  0x11   :  { %84 = vadd.xlane.f32.xlu0 %v83_v2 }
  0x15   :  { %87 = vadd.xlane.f32.xlu0 %v86_v3 }
  0x16   :  { %28 = vsyncpa [#allocation3], 0  ;;  %s6937_s2 = sld [smem:[#allocation9_spill]]  ;;  %s6938_s7 = sld [smem:[#allocation11_spill]]  ;;  %v5923_v16 = vmov 0.0   ;;  %vm5924_vm1 = vmmov 0  }
  0x17   :  { %5185 = vmatprep.subr.bf16.mxu0 %v5923_v16  ;;  %5193 = vmatprep.subr.bf16.mxu1 %v5923_v16  ;;  %s6939_s24 = sld [smem:[#allocation7_spill]]  ;;  %s6940_s1 = sld [smem:[#allocation8_spill]]  ;;  %v5732_v35 = vld [vmem:[%s6906_s8] sm:$0xff]   ;;  %v5733_v37 = vld [vmem:[%s6906_s8 + $0x8] sm:$0xff]   ;;  %v5736_v40 = vld [vmem:[%s6906_s8 + $0x10] sm:$0xff]   ;;  %vm322_vm2 = vcmask 64512  }
  0x18   :  { %5189 = vmatprep.mubr.msk.bf16.mxu0 %vm5924_vm1, %v5923_v16  ;;  %5197 = vmatprep.mubr.msk.bf16.mxu1 %vm5924_vm1, %v5923_v16  ;;  %v5737_v41 = vld [vmem:[%s6906_s8 + $0x18] sm:$0xff]   ;;  %s6941_s6 = sld [smem:[#allocation10_spill]]  ;;  %s6942_s29 = sld [smem:[#allocation12_spill]]  ;;  %vm6139_vm3 = vmpackc.low %vm322_vm2, %vm322_vm2  ;;  %v4647_v57 = vld [vmem:[%s6907_s9] ss:$0 sm:$0xff]  ;;  %vm410_vm4 = vcmask 130048  }
  0x19   :  { %s6945_s26 = sld [smem:[#allocation6_spill]]  ;;  %vm910_vm5 = vcmask 1043456   ;;  %vm4619_vm6 = vcmask 1041409  }
  0x1c   :  { %v5728_v14 = vld [vmem:[%s6937_s2] sm:$0xff]   ;;  %v5730_v17 = vld [vmem:[%s6937_s2 + $0x8] sm:$0xff]   ;;  %v5734_v38 = vld [vmem:[%s6937_s2 + $0x10] sm:$0xff]  }
  0x1d   :  { %v5729_v15 = vld [vmem:[%s6938_s7] sm:$0xff]   ;;  %5186 = vmatpush3.bf16.msra.mxu0 %v5728_v14  ;;  %v5731_v18 = vld [vmem:[%s6938_s7 + $0x8] sm:$0xff]   ;;  %v5735_v39 = vld [vmem:[%s6937_s2 + $0x18] sm:$0xff]  }
  0x1e   :  { %5194 = vmatpush3.bf16.msra.mxu1 %v5729_v15  ;;  %5187 = vmatprep.subr.bf16.mxu0 %v5923_v16  ;;  %v4637_v27 = vld [vmem:[%s6939_s24] ss:$0 sm:$0xff] }
  0x1f   :  { %5195 = vmatprep.subr.bf16.mxu1 %v5923_v16  ;;  %v4638_v31 = vld [vmem:[%s6940_s1] ss:$0 sm:$0xff] }
  0x20   :  { %v4639_v42 = vld [vmem:[%s6941_s6] ss:$0 sm:$0xff] }
  0x21   :  { %5188 = vmatpush3.bf16.msra.mxu0 %v5730_v17  ;;  %v4643_v44 = vld [vmem:[%s6942_s29] ss:$0 sm:$0xff]  ;;  %v6164_v17 = vld [vmem:[%s6945_s26 + $0x8] sm:$0xff] }
  0x22   :  { %5196 = vmatpush3.bf16.msra.mxu1 %v5731_v18  ;;  %5201 = vmatprep.subr.bf16.mxu0 %v5923_v16  ;;  %v6169_v18 = vld [vmem:[%s6945_s26] sm:$0xff] }
  0x9e   :  { %v85_v4 = vpop.xlane.xlu0 %84 }
  0x9f   :  { %v90_v5 = vmul.f32 0.03125, %v85_v4  ;;  %v4662_v4 = vld [vmem:[%s6941_s6 + $0x1] ss:$0 sm:$0xff] }
  0xa1   :  { %v92_v6 = vsub.f32 %v78_v0, %v90_v5 }
  0xa2   :  { %v88_v7 = vpop.xlane.xlu0 %87 }
  0xa3   :  { %v91_v8 = vmul.f32 0.03125, %v88_v7  ;;  %v94_v9 = vmul.f32 %v92_v6, %v92_v6 }
  0xa5   :  { %v93_v10 = vsub.f32 %v79_v1, %v91_v8  ;;  %v96_v11 = vsel %vm82_vm0, %v94_v9, 0.0  ;;  %v4680_v8 = vld [vmem:[%s6907_s9 + $0x1] ss:$0 sm:$0xff] }
  0xa6   :  { %97 = vadd.xlane.f32.xlu1 %v96_v11 }
  0xa7   :  { %v95_v12 = vmul.f32 %v93_v10, %v93_v10 }
  0xa9   :  { %v99_v13 = vsel %vm82_vm0, %v95_v12, 0.0 }
  0xaa   :  { %100 = vadd.xlane.f32.xlu1 %v99_v13 }
 0x133   :  { %v98_v19 = vpop.xlane.xlu1 %97 }
 0x134   :  { %v102_v20 = vmul.f32 0.03125, %v98_v19 }
 0x136   :  { %v104_v21 = vadd.f32 1e-12, %v102_v20 }
 0x137   :  { %v101_v22 = vpop.xlane.xlu1 %100 }
 0x138   :  { %5805 = vrsqrt.f32 %v104_v21  ;;  %v103_v23 = vmul.f32 0.03125, %v101_v22 }
 0x13a   :  { %v105_v24 = vadd.f32 1e-12, %v103_v23 }
 0x13c   :  { %5807 = vrsqrt.f32 %v105_v24 }
 0x142   :  { %v5806_v25 = vpop.eup %5805 }
 0x143   :  { %v108_v26 = vmul.f32 %v5806_v25, %v92_v6 }
 0x145   :  { %v116_v29 = vmul.f32 %v4637_v27, %v108_v26 }
 0x146   :  { %v5808_v28 = vpop.eup %5807 }
 0x147   :  { %v109_v30 = vmul.f32 %v5808_v28, %v93_v10  ;;  %v6083_v33 = vadd.f32 %v4638_v31, %v116_v29 }
 0x149   :  { %v117_v32 = vmul.f32 %v4637_v27, %v109_v30 }
 0x14b   :  { %v6085_v34 = vadd.f32 %v4638_v31, %v117_v32 }
 0x14d   :  { %v6092_v36 = vpack.c.bf16 %v6085_v34, %v6083_v33 }
 0x14f   :  { %5190 = vmatmul.mubr.msk.bf16.vlgmr.msra.gmra.mrb[0].mxu0 %vm82_vm0, %v6092_v36  ;;  %5198 = vmatmul.mubr.msk.bf16.vlgmr.msra.gmra.mrb[0].mxu1 %vm82_vm0, %v6092_v36 }
 0x150   :  { %5202 = vmatpush3.bf16.msra.mxu0 %v5732_v35  ;;  %5205 = vmatprep.mubr.msk.bf16.mxu0 %vm5924_vm1, %v5923_v16 }
 0x151   :  { %5203 = vmatprep.subr.bf16.mxu0 %v5923_v16 }
 0x154   :  { %5204 = vmatpush3.bf16.msra.mxu0 %v5733_v37 }
 0x155   :  { %5223 = vmatprep.subr.bf16.mxu0 %v5923_v16 }
 0x157   :  { %5206 = vmatmul.mubr.msk.bf16.vlgmr.msra.gmra.mrb[4].mxu0 %vm82_vm0, %v6092_v36 }
 0x158   :  { %5224 = vmatpush3.bf16.msra.mxu0 %v5734_v38  ;;  %5227 = vmatprep.mubr.msk.bf16.mxu0 %vm5924_vm1, %v5923_v16 }
 0x159   :  { %5225 = vmatprep.subr.bf16.mxu0 %v5923_v16 }
 0x15c   :  { %5226 = vmatpush3.bf16.msra.mxu0 %v5735_v39 }
 0x15d   :  { %5239 = vmatprep.subr.bf16.mxu0 %v5923_v16 }
 0x15f   :  { %5228 = vmatmul.mubr.msk.bf16.vlgmr.msra.gmra.mrb[8].mxu0 %vm82_vm0, %v6092_v36 }
 0x160   :  { %5240 = vmatpush3.bf16.msra.mxu0 %v5736_v40  ;;  %5243 = vmatprep.mubr.msk.bf16.mxu0 %vm5924_vm1, %v5923_v16 }
 0x161   :  { %5241 = vmatprep.subr.bf16.mxu0 %v5923_v16 }
 0x164   :  { %5242 = vmatpush3.bf16.msra.mxu0 %v5737_v41 }
 0x167   :  { %5244 = vmatmul.mubr.msk.bf16.vlgmr.msra.gmra.mrb[12].mxu0 %vm82_vm0, %v6092_v36 }
 0x222   :  { %v187_v43 = vpop.f32.mrb[0].mxu0  ;;  %v251_v45 = vpop.f32.mrb[0].mxu1 }
 0x223   :  { %v188_v46 = vadd.f32 %v4639_v42, %v187_v43  ;;  %v5191_v47 = vpop.f32.mrb[1].mxu0  ;;  %v5199_v48 = vpop.f32.mrb[1].mxu1  ;;  %v252_v51 = vadd.f32 %v4643_v44, %v251_v45  ;;  %v5738_v43 = vld [vmem:[%s6938_s7 + $0x10] sm:$0xff]   ;;  %v5739_v45 = vld [vmem:[%s6938_s7 + $0x18] sm:$0xff]  }
 0x224   :  { %v190_v49 = vpop.f32.mrb[2].mxu0  ;;  %v254_v50 = vpop.f32.mrb[2].mxu1 }
 0x225   :  { %v255_v52 = vadd.f32 %v4643_v44, %v254_v50  ;;  %v5192_v53 = vpop.f32.mrb[3].mxu0  ;;  %v5200_v54 = vpop.f32.mrb[3].mxu1  ;;  %5213 = vmatprep.mubr.msk.f32.mxu1 %vm322_vm2, %v188_v46  ;;  %v191_v0 = vadd.f32 %v4639_v42, %v190_v49  ;;  %v4671_v50 = vld [vmem:[%s6942_s29 + $0x1] ss:$0 sm:$0xff] }
 0x227   :  { %v5635_v56 = vpack.c.bf16 %v255_v52, %v252_v51 }
 0x229   :  { %5637 = vmatprep.subr.msk.bf16.mxu1 %vm6139_vm3, %v5635_v56 }
 0x22a   :  { %v315_v58 = vpop.f32.mrb[4].mxu0  ;;  %5640 = vmatpush3.bf16.xpose.msk.msra.mxu1 %vm6139_vm3, %v5635_v56 }
 0x22b   :  { %v5207_v59 = vpop.f32.mrb[5].mxu0  ;;  %v316_v61 = vadd.f32 %v4647_v57, %v315_v58 }
 0x22c   :  { %v318_v60 = vpop.f32.mrb[6].mxu0 }
 0x22d   :  { %v319_v62 = vadd.f32 %v4647_v57, %v318_v60  ;;  %v5208_v63 = vpop.f32.mrb[7].mxu0 }
 0x22f   :  { %v5641_v1 = vpack.c.bf16 %v319_v62, %v316_v61 }
 0x231   :  { %5214 = vmatmul.mubr.msk.f32.vlgmr.msra.gmra.mrb[4].mxu1 %vm322_vm2, %v191_v0  ;;  %5642 = vmatprep.subr.bf16.mxu1 %v5641_v1 }
 0x232   :  { %5644 = vmatpush3.bf16.msra.mxu1 %v5641_v1  ;;  %v575_v2 = vpop.f32.mrb[8].mxu0 }
 0x233   :  { %v5229_v3 = vpop.f32.mrb[9].mxu0  ;;  %5231 = vmatprep.subr.bf16.mxu1 %v5923_v16  ;;  %v576_v46 = vadd.f32 %v4662_v4, %v575_v2 }
 0x234   :  { %v578_v5 = vpop.f32.mrb[10].mxu0 }
 0x235   :  { %v6155_v6 = vadd.f32 %v4662_v4, %v578_v5  ;;  %v5230_v7 = vpop.f32.mrb[11].mxu0 }
 0x23a   :  { %v707_v9 = vpop.f32.mrb[12].mxu0 }
 0x23b   :  { %v5245_v10 = vpop.f32.mrb[13].mxu0  ;;  %v708_v12 = vadd.f32 %v4680_v8, %v707_v9 }
 0x23c   :  { %v710_v11 = vpop.f32.mrb[14].mxu0 }
 0x23d   :  { %v711_v13 = vadd.f32 %v4680_v8, %v710_v11  ;;  %v5246_v14 = vpop.f32.mrb[15].mxu0 }
 0x23e   :  { %v514_v14 = vld [vmem:[%s6908_s10] sm:$0xf] }
 0x23f   :  { %v5651_v15 = vpack.c.bf16 %v711_v13, %v708_v12 }
 0x241   :  { %5652 = vmatprep.subr.bf16.mxu0 %v5651_v15 }
 0x242   :  { %5654 = vmatpush3.bf16.msra.mxu0 %v5651_v15 }
 0x243   :  { %5267 = vmatprep.subr.bf16.mxu0 %v5923_v16 }
 0x304   :  { %v5215_v19 = vpop.f32.mrb[4].mxu1 }
 0x305   :  { %v407_v20 = vadd.f32 %v5215_v19, %v6164_v17  ;;  %v401_v21 = vpop.f32.mrb[5].mxu1 }
 0x306   :  { %v402_v22 = vadd.f32 %v401_v21, %v6169_v18  ;;  %v959_v21 = vsel %vm910_vm5, %v514_v14, 0 }
 0x307   :  { %v414_v23 = vsel %vm410_vm4, %v407_v20, -inf }
 0x308   :  { %415 = vmax.xlane.f32.xlu1 %v414_v23  ;;  %v411_v24 = vsel %vm410_vm4, %v402_v22, -inf  ;;  %v5741_v23 = vld [vmem:[%s6938_s7 + $0x28] sm:$0xff]  }
 0x309   :  { %412 = vmax.xlane.f32.xlu0 %v411_v24  ;;  %v4690_v24 = vld [vmem:[%s6908_s10 + $0x4] sm:$0xf] }
 0x395   :  { %v416_v25 = vpop.xlane.xlu1 %415 }
 0x396   :  { %v418_v26 = vsub.f32 %v407_v20, %v416_v25  ;;  %v413_v27 = vpop.xlane.xlu0 %412  ;;  %v912_v25 = vsel %vm910_vm5, %v4690_v24, 0 }
 0x397   :  { %v417_v28 = vsub.f32 %v402_v22, %v413_v27  ;;  %v5740_v22 = vld [vmem:[%s6938_s7 + $0x20] sm:$0xff]  }
 0x398   :  { %v421_v29 = vmul.f32 1.442695, %v418_v26 }
 0x399   :  { %v419_v30 = vmul.f32 1.442695, %v417_v28  ;;  %v5742_v28 = vld [vmem:[%s6937_s2 + $0x20] sm:$0xff]  }
 0x39a   :  { %5809 = vpow2.f32 %v421_v29 }
 0x39b   :  { %5811 = vpow2.f32 %v419_v30 }
 0x3a4   :  { %v5810_v31 = vpop.eup %5809 }
 0x3a5   :  { %v5812_v32 = vpop.eup %5811  ;;  %v426_v35 = vsel %vm410_vm4, %v5810_v31, 0.0 }
 0x3a6   :  { %427 = vadd.xlane.f32.xlu1 %v426_v35  ;;  %v423_v37 = vsel %vm410_vm4, %v5812_v32, 0.0 }
 0x3a7   :  { %424 = vadd.xlane.f32.xlu0 %v423_v37 }
 0x433   :  { %v428_v38 = vpop.xlane.xlu1 %427 }
 0x434   :  { %5813 = vrcp.f32 %v428_v38  ;;  %v425_v39 = vpop.xlane.xlu0 %424  ;;  %v5744_v38 = vld [vmem:[%s6906_s8 + $0x20] sm:$0xff]  }
 0x435   :  { %5815 = vrcp.f32 %v425_v39  ;;  %v4707_v39 = vld [vmem:[%s6942_s29 + $0x2] ss:$0 sm:$0xff] }
 0x43e   :  { %v5814_v40 = vpop.eup %5813 }
 0x43f   :  { %v5816_v41 = vpop.eup %5815  ;;  %v432_v44 = vmul.f32 %v5814_v40, %v5810_v31 }
 0x440   :  { %v431_v42 = vmul.f32 %v5816_v41, %v5812_v32  ;;  %v5743_v32 = vld [vmem:[%s6937_s2 + $0x28] sm:$0xff]  }
 0x442   :  { %5220 = vmatprep.mubr.msk.f32.mxu1 %vm410_vm4, %v431_v42  ;;  %v5745_v42 = vld [vmem:[%s6906_s8 + $0x28] sm:$0xff]  }
 0x443   :  { %5221 = vmatmul.mubr.msk.f32.vlgmr.msra.gmra.mrb[6].mxu1 %vm410_vm4, %v432_v44 }
 0x444   :  { %5232 = vmatpush3.bf16.msra.mxu1 %v5738_v43  ;;  %5235 = vmatprep.mubr.msk.bf16.mxu1 %vm5924_vm1, %v5923_v16 }
 0x445   :  { %5233 = vmatprep.subr.bf16.mxu1 %v5923_v16 }
 0x448   :  { %5234 = vmatpush3.bf16.msra.mxu1 %v5739_v45 }
 0x44b   :  { %5236 = vmatmul.mubr.msk.bf16.vlgmr.msra.gmra.mrb[8].mxu1 %vm82_vm0, %v6092_v36 }
 0x44c   :  { %5251 = vmatprep.mubr.msk.f32.mxu1 %vm322_vm2, %v576_v46 }
 0x516   :  { %v5222_v47 = vpop.f32.mrb[6].mxu1 }
 0x517   :  { %v505_v48 = vpop.f32.mrb[7].mxu1 }
 0x518   :  { %v515_v49 = vpack.c.bf16 %v5222_v47, %v505_v48 }
 0x51e   :  { %v641_v51 = vpop.f32.mrb[8].mxu1 }
 0x51f   :  { %v5237_v52 = vpop.f32.mrb[9].mxu1  ;;  %v642_v54 = vadd.f32 %v4671_v50, %v641_v51 }
 0x520   :  { %v644_v53 = vpop.f32.mrb[10].mxu1 }
 0x521   :  { %v645_v56 = vadd.f32 %v4671_v50, %v644_v53  ;;  %v5238_v57 = vpop.f32.mrb[11].mxu1 }
 0x523   :  { %v5645_v58 = vpack.c.bf16 %v645_v56, %v642_v54  ;;  %v4698_v54 = vld [vmem:[%s6941_s6 + $0x2] ss:$0 sm:$0xff] }
 0x525   :  { %5647 = vmatprep.subr.msk.bf16.mxu1 %vm6139_vm3, %v5645_v58 }
 0x526   :  { %5650 = vmatpush3.bf16.xpose.msk.msra.mxu1 %vm6139_vm3, %v5645_v58 }
 0x527   :  { %5261 = vmatprep.subr.bf16.mxu1 %v5923_v16 }
 0x52d   :  { %5252 = vmatmul.mubr.msk.f32.vlgmr.msra.gmra.mrb[12].mxu1 %vm322_vm2, %v6155_v6 }
 0x52e   :  { %5263 = vmatprep.mubr.msk.bf16.mxu1 %vm5924_vm1, %v5923_v16  ;;  %5262 = vmatpush3.bf16.msra.mxu1 %v912_v25 }
 0x52f   :  { %5273 = vmatprep.subr.bf16.mxu1 %v5923_v16 }
 0x600   :  { %v5253_v59 = vpop.f32.mrb[12].mxu1 }
 0x601   :  { %v798_v60 = vadd.f32 %v5253_v59, %v6164_v17  ;;  %v792_v61 = vpop.f32.mrb[13].mxu1 }
 0x602   :  { %v793_v62 = vadd.f32 %v792_v61, %v6169_v18 }
 0x603   :  { %v804_v63 = vsel %vm410_vm4, %v798_v60, -inf }
 0x604   :  { %805 = vmax.xlane.f32.xlu1 %v804_v63  ;;  %v801_v0 = vsel %vm410_vm4, %v793_v62, -inf }
 0x605   :  { %802 = vmax.xlane.f32.xlu0 %v801_v0 }
 0x691   :  { %v806_v1 = vpop.xlane.xlu1 %805 }
 0x692   :  { %v808_v2 = vsub.f32 %v798_v60, %v806_v1  ;;  %v803_v3 = vpop.xlane.xlu0 %802 }
 0x693   :  { %v807_v4 = vsub.f32 %v793_v62, %v803_v3  ;;  %v4716_v62 = vld [vmem:[%s6907_s9 + $0x2] ss:$0 sm:$0xff] }
 0x694   :  { %v811_v5 = vmul.f32 1.442695, %v808_v2 }
 0x695   :  { %v809_v6 = vmul.f32 1.442695, %v807_v4 }
 0x696   :  { %5817 = vpow2.f32 %v811_v5 }
 0x697   :  { %5819 = vpow2.f32 %v809_v6 }
 0x6a0   :  { %v5818_v7 = vpop.eup %5817 }
 0x6a1   :  { %v5820_v8 = vpop.eup %5819  ;;  %v816_v9 = vsel %vm410_vm4, %v5818_v7, 0.0 }
 0x6a2   :  { %817 = vadd.xlane.f32.xlu1 %v816_v9  ;;  %v813_v10 = vsel %vm410_vm4, %v5820_v8, 0.0 }
 0x6a3   :  { %814 = vadd.xlane.f32.xlu0 %v813_v10 }
 0x72f   :  { %v818_v11 = vpop.xlane.xlu1 %817 }
 0x730   :  { %5821 = vrcp.f32 %v818_v11  ;;  %v815_v12 = vpop.xlane.xlu0 %814 }
 0x731   :  { %5823 = vrcp.f32 %v815_v12 }
 0x73a   :  { %v5822_v13 = vpop.eup %5821 }
 0x73b   :  { %v5824_v15 = vpop.eup %5823  ;;  %v822_v20 = vmul.f32 %v5822_v13, %v5818_v7 }
 0x73c   :  { %v821_v19 = vmul.f32 %v5824_v15, %v5820_v8 }
 0x73e   :  { %5258 = vmatprep.mubr.msk.f32.mxu0 %vm410_vm4, %v821_v19 }
 0x73f   :  { %5259 = vmatmul.mubr.msk.f32.vlgmr.msra.gmra.mrb[16].mxu0 %vm410_vm4, %v822_v20 }
 0x740   :  { %5268 = vmatpush3.bf16.msra.mxu0 %v959_v21  ;;  %5269 = vmatprep.mubr.msk.bf16.mxu0 %vm5924_vm1, %v5923_v16 }
 0x741   :  { %5281 = vmatprep.subr.bf16.mxu0 %v5923_v16 }
 0x743   :  { %5270 = vmatmul.mubr.msk.bf16.vlgmr.msra.gmra.mrb[20].mxu0 %vm322_vm2, %v515_v49 }
 0x744   :  { %5282 = vmatpush3.bf16.msra.mxu0 %v5740_v22  ;;  %5285 = vmatprep.mubr.msk.bf16.mxu0 %vm5924_vm1, %v5923_v16 }
 0x745   :  { %5283 = vmatprep.subr.bf16.mxu0 %v5923_v16 }
 0x748   :  { %5284 = vmatpush3.bf16.msra.mxu0 %v5741_v23 }
 0x74b   :  { %5286 = vmatmul.mubr.msk.bf16.vlgmr.msra.gmra.mrb[24].mxu0 %vm82_vm0, %v6092_v36 }
 0x812   :  { %v5260_v26 = vpop.f32.mrb[16].mxu0 }
 0x813   :  { %v895_v27 = vpop.f32.mrb[17].mxu0 }
 0x814   :  { %v906_v29 = vpack.c.bf16 %v5260_v26, %v895_v27 }
 0x816   :  { %5264 = vmatmul.mubr.msk.bf16.vlgmr.msra.gmra.mrb[16].mxu1 %vm322_vm2, %v906_v29  ;;  %v995_v30 = vpop.f32.mrb[20].mxu0 }
 0x817   :  { %v5271_v31 = vpop.f32.mrb[21].mxu0  ;;  %5274 = vmatpush3.bf16.msra.mxu1 %v5742_v28  ;;  %5277 = vmatprep.mubr.msk.bf16.mxu1 %vm5924_vm1, %v5923_v16 }
 0x818   :  { %v998_v35 = vpop.f32.mrb[22].mxu0  ;;  %5275 = vmatprep.subr.bf16.mxu1 %v5923_v16 }
 0x819   :  { %v5272_v37 = vpop.f32.mrb[23].mxu0 }
 0x81a   :  { %v5749_v37 = vld [vmem:[%s6906_s8 + $0x38] sm:$0xff]  }
 0x81b   :  { %5276 = vmatpush3.bf16.msra.mxu1 %v5743_v32  ;;  %v5747_v32 = vld [vmem:[%s6937_s2 + $0x38] sm:$0xff]  }
 0x81c   :  { %5289 = vmatprep.subr.bf16.mxu1 %v5923_v16 }
 0x81e   :  { %5278 = vmatmul.mubr.msk.bf16.vlgmr.msra.gmra.mrb[20].mxu1 %vm82_vm0, %v6092_v36  ;;  %v1127_v40 = vpop.f32.mrb[24].mxu0 }
 0x81f   :  { %v5287_v41 = vpop.f32.mrb[25].mxu0  ;;  %5290 = vmatpush3.bf16.msra.mxu1 %v5744_v38  ;;  %5293 = vmatprep.mubr.msk.bf16.mxu1 %vm5924_vm1, %v5923_v16  ;;  %v1128_v44 = vadd.f32 %v4707_v39, %v1127_v40  ;;  %v4726_v38 = vld [vmem:[%s6908_s10 + $0x8] sm:$0xf] }
 0x820   :  { %v1130_v43 = vpop.f32.mrb[26].mxu0  ;;  %5291 = vmatprep.subr.bf16.mxu1 %v5923_v16 }
 0x821   :  { %v1131_v45 = vadd.f32 %v4707_v39, %v1130_v43  ;;  %v5288_v46 = vpop.f32.mrb[27].mxu0  ;;  %v1397_v39 = vsel %vm910_vm5, %v4726_v38, 0 }
 0x823   :  { %v5655_v47 = vpack.c.bf16 %v1131_v45, %v1128_v44  ;;  %5292 = vmatpush3.bf16.msra.mxu1 %v5745_v42  ;;  %v5750_v42 = vld [vmem:[%s6938_s7 + $0x30] sm:$0xff]   ;;  %v5751_v44 = vld [vmem:[%s6938_s7 + $0x38] sm:$0xff]   ;;  %v4733_v45 = vld [vmem:[%s6941_s6 + $0x3] ss:$0 sm:$0xff] }
 0x824   :  { %5311 = vmatprep.subr.bf16.mxu1 %v5923_v16 }
 0x825   :  { %5657 = vmatprep.subr.msk.bf16.mxu0 %vm6139_vm3, %v5655_v47 }
 0x826   :  { %5294 = vmatmul.mubr.msk.bf16.vlgmr.msra.gmra.mrb[24].mxu1 %vm82_vm0, %v6092_v36  ;;  %5660 = vmatpush3.bf16.xpose.msk.msra.mxu0 %vm6139_vm3, %v5655_v47 }
 0x827   :  { %5313 = vmatprep.mubr.msk.bf16.mxu1 %vm5924_vm1, %v5923_v16  ;;  %5312 = vmatpush3.bf16.msra.mxu1 %v1397_v39 }
 0x828   :  { %5325 = vmatprep.subr.bf16.mxu1 %v5923_v16 }
 0x8e9   :  { %v948_v48 = vpop.f32.mrb[16].mxu1 }
 0x8ea   :  { %v6269_v49 = vadd.f32 %v995_v30, %v948_v48  ;;  %v5265_v50 = vpop.f32.mrb[17].mxu1  ;;  %v5746_v30 = vld [vmem:[%s6937_s2 + $0x30] sm:$0xff]  }
 0x8eb   :  { %v951_v51 = vpop.f32.mrb[18].mxu1 }
 0x8ec   :  { %v6271_v52 = vadd.f32 %v998_v35, %v951_v51  ;;  %v5266_v53 = vpop.f32.mrb[19].mxu1  ;;  %v5748_v35 = vld [vmem:[%s6906_s8 + $0x30] sm:$0xff]  }
 0x8f1   :  { %v1061_v56 = vpop.f32.mrb[20].mxu1 }
 0x8f2   :  { %v1062_v57 = vadd.f32 %v4698_v54, %v1061_v56  ;;  %v5279_v58 = vpop.f32.mrb[21].mxu1 }
 0x8f3   :  { %v1064_v59 = vpop.f32.mrb[22].mxu1 }
 0x8f4   :  { %v1065_v60 = vadd.f32 %v4698_v54, %v1064_v59  ;;  %v5280_v61 = vpop.f32.mrb[23].mxu1  ;;  %5301 = vmatprep.mubr.msk.f32.mxu0 %vm322_vm2, %v1062_v57  ;;  %v4751_v54 = vld [vmem:[%s6907_s9 + $0x3] ss:$0 sm:$0xff] }
 0x8f6   :  { %5302 = vmatmul.mubr.msk.f32.vlgmr.msra.gmra.mrb[18].mxu0 %vm322_vm2, %v1065_v60 }
 0x8f9   :  { %v1193_v63 = vpop.f32.mrb[24].mxu1 }
 0x8fa   :  { %v5295_v0 = vpop.f32.mrb[25].mxu1  ;;  %v1194_v2 = vadd.f32 %v4716_v62, %v1193_v63 }
 0x8fb   :  { %v1196_v1 = vpop.f32.mrb[26].mxu1 }
 0x8fc   :  { %v1197_v3 = vadd.f32 %v4716_v62, %v1196_v1  ;;  %v5296_v4 = vpop.f32.mrb[27].mxu1 }
 0x8fd   :  { %v4742_v4 = vld [vmem:[%s6942_s29 + $0x3] ss:$0 sm:$0xff] }
 0x8fe   :  { %v5661_v5 = vpack.c.bf16 %v1197_v3, %v1194_v2 }
 0x900   :  { %5662 = vmatprep.subr.bf16.mxu0 %v5661_v5 }
 0x901   :  { %5664 = vmatpush3.bf16.msra.mxu0 %v5661_v5 }
 0x902   :  { %5317 = vmatprep.subr.bf16.mxu0 %v5923_v16 }
 0x9c9   :  { %v5303_v6 = vpop.f32.mrb[18].mxu0 }
 0x9ca   :  { %v1284_v7 = vadd.f32 %v5303_v6, %v6164_v17  ;;  %v1278_v8 = vpop.f32.mrb[19].mxu0 }
 0x9cb   :  { %v1279_v9 = vadd.f32 %v1278_v8, %v6169_v18 }
 0x9cc   :  { %v1290_v10 = vsel %vm410_vm4, %v1284_v7, -inf }
 0x9cd   :  { %1291 = vmax.xlane.f32.xlu1 %v1290_v10  ;;  %v1287_v11 = vsel %vm410_vm4, %v1279_v9, -inf }
 0x9ce   :  { %1288 = vmax.xlane.f32.xlu0 %v1287_v11 }
 0xa5a   :  { %v1292_v12 = vpop.xlane.xlu1 %1291 }
 0xa5b   :  { %v1294_v13 = vsub.f32 %v1284_v7, %v1292_v12  ;;  %v1289_v14 = vpop.xlane.xlu0 %1288 }
 0xa5c   :  { %v1293_v15 = vsub.f32 %v1279_v9, %v1289_v14 }
 0xa5d   :  { %v1297_v19 = vmul.f32 1.442695, %v1294_v13 }
 0xa5e   :  { %v1295_v20 = vmul.f32 1.442695, %v1293_v15 }
 0xa5f   :  { %5825 = vpow2.f32 %v1297_v19 }
 0xa60   :  { %5827 = vpow2.f32 %v1295_v20 }
 0xa69   :  { %v5826_v21 = vpop.eup %5825 }
 0xa6a   :  { %v5828_v22 = vpop.eup %5827  ;;  %v1302_v23 = vsel %vm410_vm4, %v5826_v21, 0.0 }
 0xa6b   :  { %1303 = vadd.xlane.f32.xlu1 %v1302_v23  ;;  %v1299_v24 = vsel %vm410_vm4, %v5828_v22, 0.0 }
 0xa6c   :  { %1300 = vadd.xlane.f32.xlu0 %v1299_v24 }
 0xaf8   :  { %v1304_v25 = vpop.xlane.xlu1 %1303 }
 0xaf9   :  { %5829 = vrcp.f32 %v1304_v25  ;;  %v1301_v26 = vpop.xlane.xlu0 %1300 }
 0xafa   :  { %5831 = vrcp.f32 %v1301_v26 }
 0xb03   :  { %v5830_v27 = vpop.eup %5829 }
 0xb04   :  { %v5832_v28 = vpop.eup %5831  ;;  %v1308_v31 = vmul.f32 %v5830_v27, %v5826_v21 }
 0xb05   :  { %v1307_v29 = vmul.f32 %v5832_v28, %v5828_v22 }
 0xb07   :  { %5308 = vmatprep.mubr.msk.f32.mxu0 %vm410_vm4, %v1307_v29 }
 0xb08   :  { %5309 = vmatmul.mubr.msk.f32.vlgmr.msra.gmra.mrb[28].mxu0 %vm410_vm4, %v1308_v31 }
 0xb09   :  { %5318 = vmatpush3.bf16.msra.mxu0 %v5746_v30  ;;  %5321 = vmatprep.mubr.msk.bf16.mxu0 %vm5924_vm1, %v5923_v16 }
 0xb0a   :  { %5319 = vmatprep.subr.bf16.mxu0 %v5923_v16 }
 0xb0d   :  { %5320 = vmatpush3.bf16.msra.mxu0 %v5747_v32 }
 0xb0e   :  { %5333 = vmatprep.subr.bf16.mxu0 %v5923_v16 }
 0xb10   :  { %5322 = vmatmul.mubr.msk.bf16.vlgmr.msra.gmra.mrb[32].mxu0 %vm82_vm0, %v6092_v36 }
 0xb11   :  { %5334 = vmatpush3.bf16.msra.mxu0 %v5748_v35  ;;  %5337 = vmatprep.mubr.msk.bf16.mxu0 %vm5924_vm1, %v5923_v16  ;;  %v4761_v35 = vld [vmem:[%s6908_s10 + $0xc] sm:$0xf] }
 0xb12   :  { %5335 = vmatprep.subr.bf16.mxu0 %v5923_v16 }
 0xb15   :  { %5336 = vmatpush3.bf16.msra.mxu0 %v5749_v37  ;;  %v1837_v37 = vsel %vm910_vm5, %v4761_v35, 0 }
 0xb16   :  { %5355 = vmatprep.subr.bf16.mxu0 %v5923_v16 }
 0xb18   :  { %5338 = vmatmul.mubr.msk.bf16.vlgmr.msra.gmra.mrb[36].mxu0 %vm82_vm0, %v6092_v36 }
 0xb19   :  { %5357 = vmatprep.mubr.msk.bf16.mxu0 %vm5924_vm1, %v5923_v16  ;;  %5356 = vmatpush3.bf16.msra.mxu0 %v1837_v37 }
 0xb1a   :  { %5369 = vmatprep.subr.bf16.mxu0 %v5923_v16 }
 0xbdb   :  { %v5310_v40 = vpop.f32.mrb[28].mxu0 }
 0xbdc   :  { %v1381_v41 = vpop.f32.mrb[29].mxu0 }
 0xbdd   :  { %v1392_v43 = vpack.c.bf16 %v5310_v40, %v1381_v41 }
 0xbdf   :  { %5314 = vmatmul.mubr.msk.bf16.vlgmr.msra.gmra.mrb[28].mxu1 %vm322_vm2, %v1392_v43 }
 0xbe0   :  { %5326 = vmatpush3.bf16.msra.mxu1 %v5750_v42  ;;  %5329 = vmatprep.mubr.msk.bf16.mxu1 %vm5924_vm1, %v5923_v16 }
 0xbe1   :  { %5327 = vmatprep.subr.bf16.mxu1 %v5923_v16 }
 0xbe3   :  { %v1501_v46 = vpop.f32.mrb[32].mxu0 }
 0xbe4   :  { %v5323_v47 = vpop.f32.mrb[33].mxu0  ;;  %5328 = vmatpush3.bf16.msra.mxu1 %v5751_v44  ;;  %v1502_v50 = vadd.f32 %v4733_v45, %v1501_v46 }
 0xbe5   :  { %v1504_v48 = vpop.f32.mrb[34].mxu0 }
 0xbe6   :  { %v1505_v51 = vadd.f32 %v4733_v45, %v1504_v48  ;;  %v5324_v53 = vpop.f32.mrb[35].mxu0  ;;  %v4763_v45 = vld [vmem:[%s6909_s11] ss:$0 sm:$0xff] }
 0xbe7   :  { %5330 = vmatmul.mubr.msk.bf16.vlgmr.msra.gmra.mrb[32].mxu1 %vm82_vm0, %v6092_v36 }
 0xbe8   :  { %5345 = vmatprep.mubr.msk.f32.mxu1 %vm322_vm2, %v1502_v50 }
 0xbeb   :  { %v1633_v56 = vpop.f32.mrb[36].mxu0 }
 0xbec   :  { %v5339_v57 = vpop.f32.mrb[37].mxu0  ;;  %v1634_v59 = vadd.f32 %v4751_v54, %v1633_v56 }
 0xbed   :  { %v1636_v58 = vpop.f32.mrb[38].mxu0 }
 0xbee   :  { %v1637_v60 = vadd.f32 %v4751_v54, %v1636_v58  ;;  %v5340_v61 = vpop.f32.mrb[39].mxu0 }
 0xbf0   :  { %v5671_v62 = vpack.c.bf16 %v1637_v60, %v1634_v59 }
 0xcb2   :  { %v1433_v63 = vpop.f32.mrb[28].mxu1 }
 0xcb3   :  { %v1440_v0 = vadd.f32 %v1433_v63, %v6269_v49  ;;  %v5315_v1 = vpop.f32.mrb[29].mxu1 }
 0xcb4   :  { %v1436_v2 = vpop.f32.mrb[30].mxu1  ;;  %v5752_v1 = vld [vmem:[%s6912_s14] sm:$0xff]  }
 0xcb5   :  { %v6342_v36 = vadd.f32 %v1436_v2, %v6271_v52  ;;  %v5316_v3 = vpop.f32.mrb[31].mxu1  ;;  %v5753_v2 = vld [vmem:[%s6912_s14 + $0x8] sm:$0xff]  }
 0xcba   :  { %v1567_v5 = vpop.f32.mrb[32].mxu1 }
 0xcbb   :  { %v5331_v6 = vpop.f32.mrb[33].mxu1  ;;  %v1568_v8 = vadd.f32 %v4742_v4, %v1567_v5 }
 0xcbc   :  { %v1570_v7 = vpop.f32.mrb[34].mxu1 }
 0xcbd   :  { %v1571_v9 = vadd.f32 %v4742_v4, %v1570_v7  ;;  %v5332_v10 = vpop.f32.mrb[35].mxu1 }
 0xcbf   :  { %v5665_v11 = vpack.c.bf16 %v1571_v9, %v1568_v8  ;;  %v4764_v9 = vld [vmem:[%s6910_s12] ss:$0 sm:$0xff] }
 0xcc1   :  { %5667 = vmatprep.subr.msk.bf16.mxu1 %vm6139_vm3, %v5665_v11 }
 0xcc2   :  { %5670 = vmatpush3.bf16.xpose.msk.msra.mxu1 %vm6139_vm3, %v5665_v11 }
 0xcc3   :  { %5672 = vmatprep.subr.bf16.mxu1 %v5671_v62 }
 0xcc9   :  { %5346 = vmatmul.mubr.msk.f32.vlgmr.msra.gmra.mrb[14].mxu1 %vm322_vm2, %v1505_v51 }
 0xcca   :  { %5674 = vmatpush3.bf16.msra.mxu1 %v5671_v62 }
 0xccb   :  { %5361 = vmatprep.subr.bf16.mxu1 %v5923_v16 }
 0xd9c   :  { %v5347_v49 = vpop.f32.mrb[14].mxu1 }
 0xd9d   :  { %v1724_v52 = vadd.f32 %v5347_v49, %v6164_v17  ;;  %v1718_v12 = vpop.f32.mrb[15].mxu1 }
 0xd9e   :  { %v1719_v13 = vadd.f32 %v1718_v12, %v6169_v18  ;;  %v4765_v12 = vld [vmem:[%s6911_s13] ss:$0 sm:$0xff] }
 0xd9f   :  { %v1730_v14 = vsel %vm410_vm4, %v1724_v52, -inf }
 0xda0   :  { %1731 = vmax.xlane.f32.xlu1 %v1730_v14  ;;  %v1727_v15 = vsel %vm410_vm4, %v1719_v13, -inf }
 0xda1   :  { %1728 = vmax.xlane.f32.xlu0 %v1727_v15 }
 0xe2d   :  { %v1732_v19 = vpop.xlane.xlu1 %1731 }
 0xe2e   :  { %v1734_v20 = vsub.f32 %v1724_v52, %v1732_v19  ;;  %v1729_v21 = vpop.xlane.xlu0 %1728 }
 0xe2f   :  { %v1733_v22 = vsub.f32 %v1719_v13, %v1729_v21  ;;  %v5755_v21 = vld [vmem:[%s6914_s16 + $0x8] sm:$0xff]  }
 0xe30   :  { %v1737_v23 = vmul.f32 1.442695, %v1734_v20  ;;  %v5754_v20 = vld [vmem:[%s6914_s16] sm:$0xff]  }
 0xe31   :  { %v1735_v24 = vmul.f32 1.442695, %v1733_v22  ;;  %v5756_v22 = vld [vmem:[%s6914_s16 + $0x10] sm:$0xff]  }
 0xe32   :  { %5833 = vpow2.f32 %v1737_v23  ;;  %v5757_v23 = vld [vmem:[%s6914_s16 + $0x18] sm:$0xff]  }
 0xe33   :  { %5835 = vpow2.f32 %v1735_v24  ;;  %v5758_v24 = vld [vmem:[%s6914_s16 + $0x20] sm:$0xff]  }
 0xe3c   :  { %v5834_v25 = vpop.eup %5833 }
 0xe3d   :  { %v5836_v26 = vpop.eup %5835  ;;  %v1742_v17 = vsel %vm410_vm4, %v5834_v25, 0.0 }
 0xe3e   :  { %1743 = vadd.xlane.f32.xlu1 %v1742_v17  ;;  %v1739_v18 = vsel %vm410_vm4, %v5836_v26, 0.0  ;;  %v5761_v17 = vld [vmem:[%s6914_s16 + $0x38] sm:$0xff]  }
 0xe3f   :  { %1740 = vadd.xlane.f32.xlu0 %v1739_v18  ;;  %v4766_v18 = vld [vmem:[%s6913_s15] ss:$0 sm:$0xff] }
 0xecb   :  { %v1744_v27 = vpop.xlane.xlu1 %1743 }
 0xecc   :  { %5837 = vrcp.f32 %v1744_v27  ;;  %v1741_v28 = vpop.xlane.xlu0 %1740 }
 0xecd   :  { %5839 = vrcp.f32 %v1741_v28 }
 0xed6   :  { %v5838_v29 = vpop.eup %5837 }
 0xed7   :  { %v5840_v30 = vpop.eup %5839  ;;  %v1748_v32 = vmul.f32 %v5838_v29, %v5834_v25  ;;  %v5759_v25 = vld [vmem:[%s6914_s16 + $0x28] sm:$0xff]  }
 0xed8   :  { %v1747_v31 = vmul.f32 %v5840_v30, %v5836_v26  ;;  %v5760_v26 = vld [vmem:[%s6914_s16 + $0x30] sm:$0xff]  }
 0xeda   :  { %5352 = vmatprep.mubr.msk.f32.mxu1 %vm410_vm4, %v1747_v31 }
 0xedb   :  { %5353 = vmatmul.mubr.msk.f32.vlgmr.msra.gmra.mrb[36].mxu1 %vm410_vm4, %v1748_v32 }
 0xedc   :  { %5365 = vmatprep.mubr.msk.bf16.mxu1 %vm5924_vm1, %v5923_v16  ;;  %5362 = vmatpush3.bf16.msra.mxu1 %v5752_v1 }
 0xedd   :  { %5363 = vmatprep.subr.bf16.mxu1 %v5923_v16 }
 0xee0   :  { %5364 = vmatpush3.bf16.msra.mxu1 %v5753_v2 }
 0xee1   :  { %5389 = vmatprep.subr.bf16.mxu1 %v5923_v16 }
 0xfae   :  { %v5354_v38 = vpop.f32.mrb[36].mxu1 }
 0xfaf   :  { %v1821_v39 = vpop.f32.mrb[37].mxu1 }
 0xfb0   :  { %v1832_v40 = vpack.c.bf16 %v5354_v38, %v1821_v39 }
 0xfb2   :  { %5358 = vmatmul.mubr.msk.bf16.vlgmr.msra.gmra.mrb[40].mxu0 %vm322_vm2, %v1832_v40 }
 0xfb3   :  { %5385 = vmatprep.mubr.msk.bf16.mxu0 %vm5924_vm1, %v5923_v16  ;;  %5370 = vmatpush3.bf16.msra.mxu0 %v5754_v20 }
 0xfb4   :  { %5371 = vmatprep.subr.bf16.mxu0 %v5923_v16 }
 0xfb7   :  { %5372 = vmatpush3.bf16.msra.mxu0 %v5755_v21 }
 0xfb8   :  { %5373 = vmatprep.subr.bf16.mxu0 %v5923_v16 }
 0xfbb   :  { %5374 = vmatpush3.bf16.msra.mxu0 %v5756_v22  ;;  %v4779_v22 = vld [vmem:[%s6916_s18] ss:$0 sm:$0xff] }
 0xfbc   :  { %5375 = vmatprep.subr.bf16.mxu0 %v5923_v16 }
 0xfbf   :  { %5376 = vmatpush3.bf16.msra.mxu0 %v5757_v23 }
 0xfc0   :  { %5377 = vmatprep.subr.bf16.mxu0 %v5923_v16 }
 0xfc3   :  { %5378 = vmatpush3.bf16.msra.mxu0 %v5758_v24 }
 0xfc4   :  { %5379 = vmatprep.subr.bf16.mxu0 %v5923_v16 }
 0xfc7   :  { %5380 = vmatpush3.bf16.msra.mxu0 %v5759_v25 }
 0xfc8   :  { %5381 = vmatprep.subr.bf16.mxu0 %v5923_v16 }
 0xfcb   :  { %5382 = vmatpush3.bf16.msra.mxu0 %v5760_v26 }
 0xfcc   :  { %5383 = vmatprep.subr.bf16.mxu0 %v5923_v16 }
 0xfcf   :  { %5384 = vmatpush3.bf16.msra.mxu0 %v5761_v17  ;;  %v4780_v17 = vld [vmem:[%s6917_s19] ss:$0 sm:$0xff] }
0x1085   :  { %v1873_v41 = vpop.f32.mrb[40].mxu0 }
0x1086   :  { %v1880_v42 = vadd.f32 %v1873_v41, %v1440_v0  ;;  %v5359_v43 = vpop.f32.mrb[41].mxu0 }
0x1087   :  { %v1876_v44 = vpop.f32.mrb[42].mxu0 }
0x1088   :  { %v1882_v46 = vadd.f32 %v1880_v42, %v6083_v33  ;;  %v1881_v47 = vadd.f32 %v1876_v44, %v6342_v36  ;;  %v5360_v48 = vpop.f32.mrb[43].mxu0 }
0x108a   :  { %v1883_v50 = vadd.f32 %v1881_v47, %v6085_v34  ;;  %v1891_v51 = vadd.f32 %v4763_v45, %v1882_v46 }
0x108c   :  { %v1895_v53 = vsel %vm82_vm0, %v1891_v51, 0.0  ;;  %v1892_v54 = vadd.f32 %v4763_v45, %v1883_v50 }
0x108d   :  { %1896 = vadd.xlane.f32.xlu0 %v1895_v53 }
0x108e   :  { %v1898_v56 = vsel %vm82_vm0, %v1892_v54, 0.0 }
0x108f   :  { %1899 = vadd.xlane.f32.xlu1 %v1898_v56 }
0x111a   :  { %v1897_v57 = vpop.xlane.xlu0 %1896 }
0x111b   :  { %v1901_v58 = vmul.f32 0.03125, %v1897_v57 }
0x111c   :  { %v1900_v59 = vpop.xlane.xlu1 %1899 }
0x111d   :  { %v1903_v60 = vsub.f32 %v1891_v51, %v1901_v58  ;;  %v1902_v61 = vmul.f32 0.03125, %v1900_v59  ;;  %v4770_v58 = vld [vmem:[%s6915_s17] ss:$0 sm:$0xff] }
0x111f   :  { %v1904_v62 = vsub.f32 %v1892_v54, %v1902_v61  ;;  %v1905_v33 = vmul.f32 %v1903_v60, %v1903_v60 }
0x1121   :  { %v1907_v63 = vsel %vm82_vm0, %v1905_v33, 0.0  ;;  %v1906_v0 = vmul.f32 %v1904_v62, %v1904_v62 }
0x1122   :  { %1908 = vadd.xlane.f32.xlu0 %v1907_v63 }
0x1123   :  { %v1910_v34 = vsel %vm82_vm0, %v1906_v0, 0.0 }
0x1124   :  { %1911 = vadd.xlane.f32.xlu1 %v1910_v34 }
0x11af   :  { %v1909_v36 = vpop.xlane.xlu0 %1908 }
0x11b0   :  { %v1913_v3 = vmul.f32 0.03125, %v1909_v36 }
0x11b1   :  { %v1912_v4 = vpop.xlane.xlu1 %1911 }
0x11b2   :  { %v1915_v5 = vadd.f32 1e-12, %v1913_v3  ;;  %v1914_v6 = vmul.f32 0.03125, %v1912_v4 }
0x11b4   :  { %5841 = vrsqrt.f32 %v1915_v5  ;;  %v1916_v7 = vadd.f32 1e-12, %v1914_v6 }
0x11b6   :  { %5843 = vrsqrt.f32 %v1916_v7 }
0x11be   :  { %v5842_v8 = vpop.eup %5841 }
0x11bf   :  { %v1919_v10 = vmul.f32 %v5842_v8, %v1903_v60 }
0x11c0   :  { %v5844_v11 = vpop.eup %5843 }
0x11c1   :  { %v1927_v49 = vmul.f32 %v4764_v9, %v1919_v10  ;;  %v1920_v52 = vmul.f32 %v5844_v11, %v1904_v62 }
0x11c3   :  { %v1928_v13 = vmul.f32 %v4764_v9, %v1920_v52  ;;  %v6395_v14 = vadd.f32 %v4765_v12, %v1927_v49  ;;  %v5762_v49 = vld [vmem:[%s6937_s2 + $0x40] sm:$0xff]   ;;  %v5763_v52 = vld [vmem:[%s6937_s2 + $0x48] sm:$0xff]  }
0x11c5   :  { %v6397_v15 = vadd.f32 %v4765_v12, %v1928_v13 }
0x11c7   :  { %v1941_v19 = vpack.c.bf16 %v6397_v15, %v6395_v14 }
0x11c9   :  { %5366 = vmatmul.mubr.msk.bf16.vlgmr.msra.gmra.mrb[40].mxu1 %vm82_vm0, %v1941_v19 }
0x11ca   :  { %5393 = vmatprep.mubr.msk.bf16.mxu1 %vm5924_vm1, %v5923_v16  ;;  %5390 = vmatpush3.bf16.msra.mxu1 %v5762_v49 }
0x11cb   :  { %5391 = vmatprep.subr.bf16.mxu1 %v5923_v16 }
0x11ce   :  { %5392 = vmatpush3.bf16.msra.mxu1 %v5763_v52 }
0x11cf   :  { %5397 = vmatprep.subr.bf16.mxu1 %v5923_v16 }
0x129c   :  { %v1998_v27 = vpop.f32.mrb[40].mxu1 }
0x129d   :  { %v1999_v28 = vadd.f32 %v4766_v18, %v1998_v27  ;;  %v5367_v29 = vpop.f32.mrb[41].mxu1 }
0x129e   :  { %v2001_v30 = vpop.f32.mrb[42].mxu1  ;;  %v5764_v29 = vld [vmem:[%s6938_s7 + $0x40] sm:$0xff]  }
0x129f   :  { %v2005_v31 = vmul.f32 %v1999_v28, %v1999_v28  ;;  %v2002_v32 = vadd.f32 %v4766_v18, %v2001_v30  ;;  %v5368_v35 = vpop.f32.mrb[43].mxu1 }
0x12a0   :  { %v5767_v35 = vld [vmem:[%s6906_s8 + $0x48] sm:$0xff]  }
0x12a1   :  { %v2007_v37 = vmul.f32 %v2005_v31, %v1999_v28  ;;  %v2006_v38 = vmul.f32 %v2002_v32, %v2002_v32  ;;  %v5765_v31 = vld [vmem:[%s6938_s7 + $0x48] sm:$0xff]  }
0x12a3   :  { %v2009_v39 = vmul.f32 0.044715, %v2007_v37  ;;  %v2008_v40 = vmul.f32 %v2006_v38, %v2002_v32  ;;  %v4786_v37 = vld [vmem:[%s6941_s6 + $0x4] ss:$0 sm:$0xff] }
0x12a5   :  { %v2011_v41 = vadd.f32 %v2009_v39, %v1999_v28  ;;  %v2010_v42 = vmul.f32 0.044715, %v2008_v40 }
0x12a7   :  { %v2013_v43 = vmul.f32 0.7978846, %v2011_v41  ;;  %v2012_v44 = vadd.f32 %v2010_v42, %v2002_v32 }
0x12a9   :  { %5845 = vtanh.f32 %v2013_v43  ;;  %v2014_v45 = vmul.f32 0.7978846, %v2012_v44  ;;  %v4795_v43 = vld [vmem:[%s6942_s29 + $0x4] ss:$0 sm:$0xff] }
0x12ab   :  { %5847 = vtanh.f32 %v2014_v45 }
0x12b3   :  { %v5846_v46 = vpop.eup %5845 }
0x12b4   :  { %v2017_v47 = vadd.f32 1.0, %v5846_v46 }
0x12b5   :  { %v5848_v48 = vpop.eup %5847 }
0x12b6   :  { %v2019_v50 = vmul.f32 0.5, %v2017_v47  ;;  %v2018_v51 = vadd.f32 1.0, %v5848_v48 }
0x12b8   :  { %v2020_v53 = vmul.f32 0.5, %v2018_v51  ;;  %v2021_v54 = vmul.f32 %v2019_v50, %v1999_v28 }
0x12ba   :  { %v2022_v56 = vmul.f32 %v2020_v53, %v2002_v32  ;;  %v5766_v32 = vld [vmem:[%s6906_s8 + $0x40] sm:$0xff]  }
0x12bb   :  { %v4804_v53 = vld [vmem:[%s6907_s9 + $0x4] ss:$0 sm:$0xff] }
0x12bc   :  { %v2039_v57 = vpack.c.bf16 %v2022_v56, %v2021_v54 }
0x12be   :  { %5386 = vmatmul.mubr.bf16.vlgmr.msra.gmra.mrb[44].mxu0 %v2039_v57 }
0x1391   :  { %v2129_v59 = vpop.f32.mrb[44].mxu0 }
0x1392   :  { %v2130_v60 = vadd.f32 %v4770_v58, %v2129_v59  ;;  %v5387_v61 = vpop.f32.mrb[45].mxu0 }
0x1393   :  { %v2132_v62 = vpop.f32.mrb[46].mxu0  ;;  %v5768_v61 = vld [vmem:[%s6937_s2 + $0x50] sm:$0xff]  }
0x1394   :  { %v2133_v33 = vadd.f32 %v4770_v58, %v2132_v62  ;;  %v5388_v63 = vpop.f32.mrb[47].mxu0  ;;  %v2136_v0 = vadd.f32 %v2130_v60, %v6395_v14 }
0x1395   :  { %v5769_v63 = vld [vmem:[%s6937_s2 + $0x58] sm:$0xff]  }
0x1396   :  { %v2140_v34 = vsel %vm82_vm0, %v2136_v0, 0.0  ;;  %v2137_v1 = vadd.f32 %v2133_v33, %v6397_v15 }
0x1397   :  { %2141 = vadd.xlane.f32.xlu0 %v2140_v34  ;;  %v5771_v34 = vld [vmem:[%s6906_s8 + $0x58] sm:$0xff]  }
0x1398   :  { %v2143_v2 = vsel %vm82_vm0, %v2137_v1, 0.0 }
0x1399   :  { %2144 = vadd.xlane.f32.xlu1 %v2143_v2  ;;  %v6540_v2 = vld [vmem:[%s6945_s26 + $0x8] sm:$0xff] }
0x1424   :  { %v2142_v36 = vpop.xlane.xlu0 %2141 }
0x1425   :  { %v2146_v3 = vmul.f32 0.03125, %v2142_v36 }
0x1426   :  { %v2145_v4 = vpop.xlane.xlu1 %2144 }
0x1427   :  { %v2148_v5 = vsub.f32 %v2136_v0, %v2146_v3  ;;  %v2147_v6 = vmul.f32 0.03125, %v2145_v4  ;;  %v5770_v0 = vld [vmem:[%s6906_s8 + $0x50] sm:$0xff]   ;;  %v6546_v4 = vld [vmem:[%s6945_s26] sm:$0xff] }
0x1429   :  { %v2149_v7 = vsub.f32 %v2137_v1, %v2147_v6  ;;  %v2150_v8 = vmul.f32 %v2148_v5, %v2148_v5 }
0x142b   :  { %v2152_v9 = vsel %vm82_vm0, %v2150_v8, 0.0  ;;  %v2151_v10 = vmul.f32 %v2149_v7, %v2149_v7 }
0x142c   :  { %2153 = vadd.xlane.f32.xlu0 %v2152_v9 }
0x142d   :  { %v2155_v11 = vsel %vm82_vm0, %v2151_v10, 0.0  ;;  %v4820_v10 = vld [vmem:[%s6941_s6 + $0x5] ss:$0 sm:$0xff] }
0x142e   :  { %2156 = vadd.xlane.f32.xlu1 %v2155_v11 }
0x14b9   :  { %v2154_v12 = vpop.xlane.xlu0 %2153 }
0x14ba   :  { %v2158_v13 = vmul.f32 0.03125, %v2154_v12  ;;  %v4838_v12 = vld [vmem:[%s6907_s9 + $0x5] ss:$0 sm:$0xff] }
0x14bb   :  { %v2157_v14 = vpop.xlane.xlu1 %2156 }
0x14bc   :  { %v2160_v15 = vadd.f32 1e-12, %v2158_v13  ;;  %v2159_v19 = vmul.f32 0.03125, %v2157_v14 }
0x14be   :  { %5849 = vrsqrt.f32 %v2160_v15  ;;  %v2161_v20 = vadd.f32 1e-12, %v2159_v19 }
0x14c0   :  { %5851 = vrsqrt.f32 %v2161_v20 }
0x14c8   :  { %v5850_v21 = vpop.eup %5849 }
0x14c9   :  { %v2164_v23 = vmul.f32 %v5850_v21, %v2148_v5 }
0x14ca   :  { %v5852_v24 = vpop.eup %5851 }
0x14cb   :  { %v2172_v25 = vmul.f32 %v4779_v22, %v2164_v23  ;;  %v2165_v26 = vmul.f32 %v5852_v24, %v2149_v7 }
0x14cd   :  { %v2173_v18 = vmul.f32 %v4779_v22, %v2165_v26  ;;  %v6461_v27 = vadd.f32 %v4780_v17, %v2172_v25 }
0x14cf   :  { %v6463_v28 = vadd.f32 %v4780_v17, %v2173_v18 }
0x14d1   :  { %v6470_v30 = vpack.c.bf16 %v6463_v28, %v6461_v27 }
0x14d3   :  { %5394 = vmatmul.mubr.msk.bf16.vlgmr.msra.gmra.mrb[44].mxu1 %vm82_vm0, %v6470_v30 }
0x14d4   :  { %5398 = vmatpush3.bf16.msra.mxu1 %v5764_v29  ;;  %5401 = vmatprep.mubr.msk.bf16.mxu1 %vm5924_vm1, %v5923_v16 }
0x14d5   :  { %5399 = vmatprep.subr.bf16.mxu1 %v5923_v16 }
0x14d8   :  { %5400 = vmatpush3.bf16.msra.mxu1 %v5765_v31 }
0x14d9   :  { %5405 = vmatprep.subr.bf16.mxu1 %v5923_v16 }
0x14db   :  { %5402 = vmatmul.mubr.msk.bf16.vlgmr.msra.gmra.mrb[48].mxu1 %vm82_vm0, %v6470_v30 }
0x14dc   :  { %5406 = vmatpush3.bf16.msra.mxu1 %v5766_v32  ;;  %5409 = vmatprep.mubr.msk.bf16.mxu1 %vm5924_vm1, %v5923_v16 }
0x14dd   :  { %5407 = vmatprep.subr.bf16.mxu1 %v5923_v16 }
0x14e0   :  { %5408 = vmatpush3.bf16.msra.mxu1 %v5767_v35 }
0x14e3   :  { %5410 = vmatmul.mubr.msk.bf16.vlgmr.msra.gmra.mrb[52].mxu1 %vm82_vm0, %v6470_v30 }
0x15a6   :  { %v2245_v38 = vpop.f32.mrb[44].mxu1 }
0x15a7   :  { %v2246_v39 = vadd.f32 %v4786_v37, %v2245_v38  ;;  %v5395_v40 = vpop.f32.mrb[45].mxu1 }
0x15a8   :  { %v2248_v41 = vpop.f32.mrb[46].mxu1 }
0x15a9   :  { %v5396_v42 = vpop.f32.mrb[47].mxu1  ;;  %5417 = vmatprep.mubr.msk.f32.mxu1 %vm322_vm2, %v2246_v39  ;;  %v2249_v62 = vadd.f32 %v4786_v37, %v2248_v41 }
0x15aa   :  { %v5772_v42 = vld [vmem:[%s6938_s7 + $0x50] sm:$0xff]  }
0x15ae   :  { %v2311_v44 = vpop.f32.mrb[48].mxu1 }
0x15af   :  { %v5403_v45 = vpop.f32.mrb[49].mxu1  ;;  %v2312_v47 = vadd.f32 %v4795_v43, %v2311_v44  ;;  %v5773_v44 = vld [vmem:[%s6938_s7 + $0x58] sm:$0xff]  }
0x15b0   :  { %v2314_v46 = vpop.f32.mrb[50].mxu1 }
0x15b1   :  { %v2315_v48 = vadd.f32 %v4795_v43, %v2314_v46  ;;  %v5404_v50 = vpop.f32.mrb[51].mxu1 }
0x15b2   :  { %v4829_v50 = vld [vmem:[%s6942_s29 + $0x5] ss:$0 sm:$0xff] }
0x15b3   :  { %v5675_v51 = vpack.c.bf16 %v2315_v48, %v2312_v47 }
0x15b5   :  { %5677 = vmatprep.subr.msk.bf16.mxu1 %vm6139_vm3, %v5675_v51 }
0x15b6   :  { %v2377_v54 = vpop.f32.mrb[52].mxu1  ;;  %5680 = vmatpush3.bf16.xpose.msk.msra.mxu1 %vm6139_vm3, %v5675_v51 }
0x15b7   :  { %v5411_v56 = vpop.f32.mrb[53].mxu1  ;;  %5427 = vmatprep.subr.bf16.mxu1 %v5923_v16  ;;  %v2378_v58 = vadd.f32 %v4804_v53, %v2377_v54 }
0x15b8   :  { %v2380_v57 = vpop.f32.mrb[54].mxu1 }
0x15b9   :  { %v2381_v59 = vadd.f32 %v4804_v53, %v2380_v57  ;;  %v5412_v60 = vpop.f32.mrb[55].mxu1 }
0x15bb   :  { %v5681_v33 = vpack.c.bf16 %v2381_v59, %v2378_v58 }
0x15bd   :  { %5418 = vmatmul.mubr.msk.f32.vlgmr.msra.gmra.mrb[38].mxu1 %vm322_vm2, %v2249_v62  ;;  %5682 = vmatprep.subr.bf16.mxu0 %v5681_v33 }
0x15be   :  { %5684 = vmatpush3.bf16.msra.mxu0 %v5681_v33  ;;  %5428 = vmatpush3.bf16.msra.mxu1 %v5768_v61 }
0x15bf   :  { %5429 = vmatprep.subr.bf16.mxu1 %v5923_v16  ;;  %5431 = vmatprep.mubr.msk.bf16.mxu1 %vm5924_vm1, %v5923_v16 }
0x15c0   :  { %5435 = vmatprep.subr.bf16.mxu0 %v5923_v16 }
0x15c2   :  { %5430 = vmatpush3.bf16.msra.mxu1 %v5769_v63 }
0x15c3   :  { %5443 = vmatprep.subr.bf16.mxu1 %v5923_v16 }
0x15c5   :  { %5432 = vmatmul.mubr.msk.bf16.vlgmr.msra.gmra.mrb[56].mxu1 %vm82_vm0, %v6470_v30 }
0x15c6   :  { %5444 = vmatpush3.bf16.msra.mxu1 %v5770_v0  ;;  %5447 = vmatprep.mubr.msk.bf16.mxu1 %vm5924_vm1, %v5923_v16 }
0x15c7   :  { %5445 = vmatprep.subr.bf16.mxu1 %v5923_v16 }
0x15ca   :  { %5446 = vmatpush3.bf16.msra.mxu1 %v5771_v34 }
0x15cb   :  { %5465 = vmatprep.subr.bf16.mxu1 %v5923_v16 }
0x15cd   :  { %5448 = vmatmul.mubr.msk.bf16.vlgmr.msra.gmra.mrb[60].mxu1 %vm82_vm0, %v6470_v30 }
0x15ce   :  { %5467 = vmatprep.mubr.msk.bf16.mxu1 %vm5924_vm1, %v5923_v16 }
0x1690   :  { %v5419_v1 = vpop.f32.mrb[38].mxu1 }
0x1691   :  { %v2468_v36 = vadd.f32 %v6540_v2, %v5419_v1  ;;  %v2462_v3 = vpop.f32.mrb[39].mxu1 }
0x1692   :  { %v2463_v5 = vadd.f32 %v6546_v4, %v2462_v3 }
0x1693   :  { %v2474_v6 = vsel %vm410_vm4, %v2468_v36, -inf }
0x1694   :  { %2475 = vmax.xlane.f32.xlu1 %v2474_v6  ;;  %v2471_v7 = vsel %vm410_vm4, %v2463_v5, -inf }
0x1695   :  { %2472 = vmax.xlane.f32.xlu0 %v2471_v7 }
0x1698   :  { %v2636_v8 = vpop.f32.mrb[56].mxu1 }
0x1699   :  { %v5433_v9 = vpop.f32.mrb[57].mxu1  ;;  %v2637_v45 = vadd.f32 %v4820_v10, %v2636_v8 }
0x169a   :  { %v2639_v11 = vpop.f32.mrb[58].mxu1 }
0x169b   :  { %v2640_v49 = vadd.f32 %v4820_v10, %v2639_v11  ;;  %v5434_v52 = vpop.f32.mrb[59].mxu1 }
0x16a0   :  { %v2768_v13 = vpop.f32.mrb[60].mxu1 }
0x16a1   :  { %v5449_v14 = vpop.f32.mrb[61].mxu1  ;;  %v2769_v19 = vadd.f32 %v4838_v12, %v2768_v13 }
0x16a2   :  { %v2771_v15 = vpop.f32.mrb[62].mxu1 }
0x16a3   :  { %v2772_v20 = vadd.f32 %v4838_v12, %v2771_v15  ;;  %v5450_v21 = vpop.f32.mrb[63].mxu1  ;;  %v4814_v12 = vld [vmem:[%s6908_s10 + $0x10] sm:$0xf] }
0x16a4   :  { %v5775_v21 = vld [vmem:[%s6938_s7 + $0x68] sm:$0xff]  }
0x16a5   :  { %v5691_v22 = vpack.c.bf16 %v2772_v20, %v2769_v19  ;;  %v3019_v19 = vsel %vm910_vm5, %v4814_v12, 0  ;;  %v5774_v20 = vld [vmem:[%s6938_s7 + $0x60] sm:$0xff]  }
0x1721   :  { %v2476_v23 = vpop.xlane.xlu1 %2475 }
0x1722   :  { %v2478_v24 = vsub.f32 %v2468_v36, %v2476_v23  ;;  %v2473_v25 = vpop.xlane.xlu0 %2472 }
0x1723   :  { %v2477_v26 = vsub.f32 %v2463_v5, %v2473_v25 }
0x1724   :  { %v2481_v17 = vmul.f32 1.442695, %v2478_v24 }
0x1725   :  { %v2479_v18 = vmul.f32 1.442695, %v2477_v26  ;;  %v5776_v26 = vld [vmem:[%s6937_s2 + $0x60] sm:$0xff]  }
0x1726   :  { %5853 = vpow2.f32 %v2481_v17 }
0x1727   :  { %5855 = vpow2.f32 %v2479_v18 }
0x1730   :  { %v5854_v29 = vpop.eup %5853 }
0x1731   :  { %v5856_v31 = vpop.eup %5855  ;;  %v2486_v32 = vsel %vm410_vm4, %v5854_v29, 0.0 }
0x1732   :  { %2487 = vadd.xlane.f32.xlu1 %v2486_v32  ;;  %v2483_v35 = vsel %vm410_vm4, %v5856_v31, 0.0 }
0x1733   :  { %2484 = vadd.xlane.f32.xlu0 %v2483_v35 }
0x17bf   :  { %v2488_v37 = vpop.xlane.xlu1 %2487 }
0x17c0   :  { %5857 = vrcp.f32 %v2488_v37  ;;  %v2485_v38 = vpop.xlane.xlu0 %2484  ;;  %v5778_v37 = vld [vmem:[%s6906_s8 + $0x60] sm:$0xff]  }
0x17c1   :  { %5859 = vrcp.f32 %v2485_v38  ;;  %v4865_v38 = vld [vmem:[%s6942_s29 + $0x6] ss:$0 sm:$0xff] }
0x17ca   :  { %v5858_v39 = vpop.eup %5857 }
0x17cb   :  { %v5860_v40 = vpop.eup %5859  ;;  %v2492_v43 = vmul.f32 %v5858_v39, %v5854_v29 }
0x17cc   :  { %v2491_v41 = vmul.f32 %v5860_v40, %v5856_v31  ;;  %v5777_v31 = vld [vmem:[%s6937_s2 + $0x68] sm:$0xff]  }
0x17ce   :  { %5424 = vmatprep.mubr.msk.f32.mxu0 %vm410_vm4, %v2491_v41  ;;  %v5779_v41 = vld [vmem:[%s6906_s8 + $0x68] sm:$0xff]  }
0x17cf   :  { %5425 = vmatmul.mubr.msk.f32.vlgmr.msra.gmra.mrb[30].mxu0 %vm410_vm4, %v2492_v43 }
0x17d0   :  { %5436 = vmatpush3.bf16.msra.mxu0 %v5772_v42  ;;  %5439 = vmatprep.mubr.msk.bf16.mxu0 %vm5924_vm1, %v5923_v16 }
0x17d1   :  { %5437 = vmatprep.subr.bf16.mxu0 %v5923_v16 }
0x17d4   :  { %5438 = vmatpush3.bf16.msra.mxu0 %v5773_v44 }
0x17d7   :  { %5440 = vmatmul.mubr.msk.bf16.vlgmr.msra.gmra.mrb[48].mxu0 %vm82_vm0, %v6470_v30 }
0x17d8   :  { %5455 = vmatprep.mubr.msk.f32.mxu0 %vm322_vm2, %v2637_v45 }
0x18a2   :  { %v5426_v46 = vpop.f32.mrb[30].mxu0 }
0x18a3   :  { %v2565_v47 = vpop.f32.mrb[31].mxu0 }
0x18a4   :  { %v2576_v48 = vpack.c.bf16 %v5426_v46, %v2565_v47 }
0x18aa   :  { %v2702_v51 = vpop.f32.mrb[48].mxu0 }
0x18ab   :  { %v5441_v53 = vpop.f32.mrb[49].mxu0  ;;  %v2703_v56 = vadd.f32 %v4829_v50, %v2702_v51 }
0x18ac   :  { %v2705_v54 = vpop.f32.mrb[50].mxu0 }
0x18ad   :  { %v2706_v57 = vadd.f32 %v4829_v50, %v2705_v54  ;;  %v5442_v58 = vpop.f32.mrb[51].mxu0 }
0x18af   :  { %v5685_v59 = vpack.c.bf16 %v2706_v57, %v2703_v56  ;;  %v4856_v56 = vld [vmem:[%s6941_s6 + $0x6] ss:$0 sm:$0xff] }
0x18b1   :  { %5687 = vmatprep.subr.msk.bf16.mxu0 %vm6139_vm3, %v5685_v59 }
0x18b2   :  { %5690 = vmatpush3.bf16.xpose.msk.msra.mxu0 %vm6139_vm3, %v5685_v59 }
0x18b3   :  { %5692 = vmatprep.subr.bf16.mxu0 %v5691_v22 }
0x18b9   :  { %5456 = vmatmul.mubr.msk.f32.vlgmr.msra.gmra.mrb[52].mxu0 %vm322_vm2, %v2640_v49 }
0x18ba   :  { %5694 = vmatpush3.bf16.msra.mxu0 %v5691_v22  ;;  %v4848_v22 = vld [vmem:[%s6908_s10 + $0x14] sm:$0xf] }
0x18bb   :  { %5471 = vmatprep.subr.bf16.mxu0 %v5923_v16  ;;  %v2972_v23 = vsel %vm910_vm5, %v4848_v22, 0 }
0x18bc   :  { %5466 = vmatpush3.bf16.msra.mxu1 %v2972_v23 }
0x18bd   :  { %5477 = vmatprep.subr.bf16.mxu1 %v5923_v16 }
0x198c   :  { %v5457_v60 = vpop.f32.mrb[52].mxu0 }
0x198d   :  { %v2859_v61 = vadd.f32 %v6540_v2, %v5457_v60  ;;  %v2853_v62 = vpop.f32.mrb[53].mxu0 }
0x198e   :  { %v2854_v33 = vadd.f32 %v6546_v4, %v2853_v62 }
0x198f   :  { %v2865_v63 = vsel %vm410_vm4, %v2859_v61, -inf }
0x1990   :  { %2866 = vmax.xlane.f32.xlu1 %v2865_v63  ;;  %v2862_v0 = vsel %vm410_vm4, %v2854_v33, -inf }
0x1991   :  { %2863 = vmax.xlane.f32.xlu0 %v2862_v0 }
0x1a1d   :  { %v2867_v34 = vpop.xlane.xlu1 %2866 }
0x1a1e   :  { %v2869_v1 = vsub.f32 %v2859_v61, %v2867_v34  ;;  %v2864_v36 = vpop.xlane.xlu0 %2863 }
0x1a1f   :  { %v2868_v3 = vsub.f32 %v2854_v33, %v2864_v36  ;;  %v4874_v33 = vld [vmem:[%s6907_s9 + $0x6] ss:$0 sm:$0xff] }
0x1a20   :  { %v2872_v5 = vmul.f32 1.442695, %v2869_v1 }
0x1a21   :  { %v2870_v6 = vmul.f32 1.442695, %v2868_v3 }
0x1a22   :  { %5861 = vpow2.f32 %v2872_v5 }
0x1a23   :  { %5863 = vpow2.f32 %v2870_v6 }
0x1a2c   :  { %v5862_v7 = vpop.eup %5861 }
0x1a2d   :  { %v5864_v8 = vpop.eup %5863  ;;  %v2877_v9 = vsel %vm410_vm4, %v5862_v7, 0.0 }
0x1a2e   :  { %2878 = vadd.xlane.f32.xlu1 %v2877_v9  ;;  %v2874_v10 = vsel %vm410_vm4, %v5864_v8, 0.0 }
0x1a2f   :  { %2875 = vadd.xlane.f32.xlu0 %v2874_v10 }
0x1abb   :  { %v2879_v11 = vpop.xlane.xlu1 %2878 }
0x1abc   :  { %5865 = vrcp.f32 %v2879_v11  ;;  %v2876_v49 = vpop.xlane.xlu0 %2875 }
0x1abd   :  { %5867 = vrcp.f32 %v2876_v49 }
0x1ac6   :  { %v5866_v52 = vpop.eup %5865 }
0x1ac7   :  { %v5868_v13 = vpop.eup %5867  ;;  %v2883_v15 = vmul.f32 %v5866_v52, %v5862_v7 }
0x1ac8   :  { %v2882_v14 = vmul.f32 %v5868_v13, %v5864_v8 }
0x1aca   :  { %5462 = vmatprep.mubr.msk.f32.mxu0 %vm410_vm4, %v2882_v14 }
0x1acb   :  { %5463 = vmatmul.mubr.msk.f32.vlgmr.msra.gmra.mrb[54].mxu0 %vm410_vm4, %v2883_v15 }
0x1acc   :  { %5472 = vmatpush3.bf16.msra.mxu0 %v3019_v19  ;;  %5473 = vmatprep.mubr.msk.bf16.mxu0 %vm5924_vm1, %v5923_v16 }
0x1acd   :  { %5485 = vmatprep.subr.bf16.mxu0 %v5923_v16 }
0x1acf   :  { %5474 = vmatmul.mubr.msk.bf16.vlgmr.msra.gmra.mrb[56].mxu0 %vm322_vm2, %v2576_v48 }
0x1ad0   :  { %5486 = vmatpush3.bf16.msra.mxu0 %v5774_v20  ;;  %5489 = vmatprep.mubr.msk.bf16.mxu0 %vm5924_vm1, %v5923_v16 }
0x1ad1   :  { %5487 = vmatprep.subr.bf16.mxu0 %v5923_v16 }
0x1ad4   :  { %5488 = vmatpush3.bf16.msra.mxu0 %v5775_v21 }
0x1ad7   :  { %5490 = vmatmul.mubr.msk.bf16.vlgmr.msra.gmra.mrb[60].mxu0 %vm82_vm0, %v6470_v30 }
0x1b9e   :  { %v5464_v24 = vpop.f32.mrb[54].mxu0 }
0x1b9f   :  { %v2956_v25 = vpop.f32.mrb[55].mxu0 }
0x1ba0   :  { %v2967_v17 = vpack.c.bf16 %v5464_v24, %v2956_v25 }
0x1ba2   :  { %5468 = vmatmul.mubr.msk.bf16.vlgmr.msra.gmra.mrb[64].mxu1 %vm322_vm2, %v2967_v17  ;;  %v3055_v18 = vpop.f32.mrb[56].mxu0 }
0x1ba3   :  { %v5475_v29 = vpop.f32.mrb[57].mxu0  ;;  %5478 = vmatpush3.bf16.msra.mxu1 %v5776_v26  ;;  %5481 = vmatprep.mubr.msk.bf16.mxu1 %vm5924_vm1, %v5923_v16 }
0x1ba4   :  { %v3058_v32 = vpop.f32.mrb[58].mxu0  ;;  %5479 = vmatprep.subr.bf16.mxu1 %v5923_v16 }
0x1ba5   :  { %v5476_v35 = vpop.f32.mrb[59].mxu0 }
0x1ba6   :  { %v5783_v35 = vld [vmem:[%s6906_s8 + $0x78] sm:$0xff]  }
0x1ba7   :  { %5480 = vmatpush3.bf16.msra.mxu1 %v5777_v31  ;;  %v5781_v31 = vld [vmem:[%s6937_s2 + $0x78] sm:$0xff]  }
0x1ba8   :  { %5493 = vmatprep.subr.bf16.mxu1 %v5923_v16 }
0x1baa   :  { %5482 = vmatmul.mubr.msk.bf16.vlgmr.msra.gmra.mrb[68].mxu1 %vm82_vm0, %v6470_v30  ;;  %v3187_v39 = vpop.f32.mrb[60].mxu0 }
0x1bab   :  { %v5491_v40 = vpop.f32.mrb[61].mxu0  ;;  %5494 = vmatpush3.bf16.msra.mxu1 %v5778_v37  ;;  %5497 = vmatprep.mubr.msk.bf16.mxu1 %vm5924_vm1, %v5923_v16  ;;  %v3188_v43 = vadd.f32 %v4865_v38, %v3187_v39  ;;  %v4884_v37 = vld [vmem:[%s6908_s10 + $0x18] sm:$0xf] }
0x1bac   :  { %v3190_v42 = vpop.f32.mrb[62].mxu0  ;;  %5495 = vmatprep.subr.bf16.mxu1 %v5923_v16 }
0x1bad   :  { %v3191_v44 = vadd.f32 %v4865_v38, %v3190_v42  ;;  %v5492_v45 = vpop.f32.mrb[63].mxu0  ;;  %v3457_v38 = vsel %vm910_vm5, %v4884_v37, 0 }
0x1baf   :  { %v5695_v46 = vpack.c.bf16 %v3191_v44, %v3188_v43  ;;  %5496 = vmatpush3.bf16.msra.mxu1 %v5779_v41  ;;  %v5784_v41 = vld [vmem:[%s6938_s7 + $0x70] sm:$0xff]   ;;  %v5785_v43 = vld [vmem:[%s6938_s7 + $0x78] sm:$0xff]   ;;  %v4891_v44 = vld [vmem:[%s6941_s6 + $0x7] ss:$0 sm:$0xff] }
0x1bb0   :  { %5515 = vmatprep.subr.bf16.mxu1 %v5923_v16 }
0x1bb1   :  { %5697 = vmatprep.subr.msk.bf16.mxu0 %vm6139_vm3, %v5695_v46 }
0x1bb2   :  { %5498 = vmatmul.mubr.msk.bf16.vlgmr.msra.gmra.mrb[72].mxu1 %vm82_vm0, %v6470_v30  ;;  %5700 = vmatpush3.bf16.xpose.msk.msra.mxu0 %vm6139_vm3, %v5695_v46 }
0x1bb3   :  { %5517 = vmatprep.mubr.msk.bf16.mxu1 %vm5924_vm1, %v5923_v16  ;;  %5516 = vmatpush3.bf16.msra.mxu1 %v3457_v38 }
0x1bb4   :  { %5529 = vmatprep.subr.bf16.mxu1 %v5923_v16 }
0x1c75   :  { %v3008_v47 = vpop.f32.mrb[64].mxu1 }
0x1c76   :  { %v6648_v48 = vadd.f32 %v3055_v18, %v3008_v47  ;;  %v5469_v50 = vpop.f32.mrb[65].mxu1  ;;  %v5780_v18 = vld [vmem:[%s6937_s2 + $0x70] sm:$0xff]  }
0x1c77   :  { %v3011_v51 = vpop.f32.mrb[66].mxu1 }
0x1c78   :  { %v6650_v53 = vadd.f32 %v3058_v32, %v3011_v51  ;;  %v5470_v54 = vpop.f32.mrb[67].mxu1  ;;  %v5782_v32 = vld [vmem:[%s6906_s8 + $0x70] sm:$0xff]  }
0x1c7d   :  { %v3121_v57 = vpop.f32.mrb[68].mxu1 }
0x1c7e   :  { %v3122_v58 = vadd.f32 %v4856_v56, %v3121_v57  ;;  %v5483_v59 = vpop.f32.mrb[69].mxu1 }
0x1c7f   :  { %v3124_v60 = vpop.f32.mrb[70].mxu1 }
0x1c80   :  { %v3125_v61 = vadd.f32 %v4856_v56, %v3124_v60  ;;  %v5484_v62 = vpop.f32.mrb[71].mxu1  ;;  %5505 = vmatprep.mubr.msk.f32.mxu0 %vm322_vm2, %v3122_v58  ;;  %v4909_v56 = vld [vmem:[%s6907_s9 + $0x7] ss:$0 sm:$0xff] }
0x1c82   :  { %5506 = vmatmul.mubr.msk.f32.vlgmr.msra.gmra.mrb[64].mxu0 %vm322_vm2, %v3125_v61 }
0x1c85   :  { %v3253_v63 = vpop.f32.mrb[72].mxu1 }
0x1c86   :  { %v5499_v0 = vpop.f32.mrb[73].mxu1  ;;  %v3254_v1 = vadd.f32 %v4874_v33, %v3253_v63 }
0x1c87   :  { %v3256_v34 = vpop.f32.mrb[74].mxu1 }
0x1c88   :  { %v3257_v36 = vadd.f32 %v4874_v33, %v3256_v34  ;;  %v5500_v3 = vpop.f32.mrb[75].mxu1 }
0x1c89   :  { %v4900_v3 = vld [vmem:[%s6942_s29 + $0x7] ss:$0 sm:$0xff] }
0x1c8a   :  { %v5701_v5 = vpack.c.bf16 %v3257_v36, %v3254_v1 }
0x1c8c   :  { %5702 = vmatprep.subr.bf16.mxu0 %v5701_v5 }
0x1c8d   :  { %5704 = vmatpush3.bf16.msra.mxu0 %v5701_v5 }
0x1c8e   :  { %5521 = vmatprep.subr.bf16.mxu0 %v5923_v16 }
0x1d55   :  { %v5507_v6 = vpop.f32.mrb[64].mxu0 }
0x1d56   :  { %v3344_v7 = vadd.f32 %v6540_v2, %v5507_v6  ;;  %v3338_v8 = vpop.f32.mrb[65].mxu0 }
0x1d57   :  { %v3339_v9 = vadd.f32 %v6546_v4, %v3338_v8 }
0x1d58   :  { %v3350_v10 = vsel %vm410_vm4, %v3344_v7, -inf }
0x1d59   :  { %3351 = vmax.xlane.f32.xlu1 %v3350_v10  ;;  %v3347_v11 = vsel %vm410_vm4, %v3339_v9, -inf }
0x1d5a   :  { %3348 = vmax.xlane.f32.xlu0 %v3347_v11 }
0x1de6   :  { %v3352_v49 = vpop.xlane.xlu1 %3351 }
0x1de7   :  { %v3354_v52 = vsub.f32 %v3344_v7, %v3352_v49  ;;  %v3349_v12 = vpop.xlane.xlu0 %3348 }
0x1de8   :  { %v3353_v13 = vsub.f32 %v3339_v9, %v3349_v12 }
0x1de9   :  { %v3357_v14 = vmul.f32 1.442695, %v3354_v52 }
0x1dea   :  { %v3355_v15 = vmul.f32 1.442695, %v3353_v13 }
0x1deb   :  { %5869 = vpow2.f32 %v3357_v14 }
0x1dec   :  { %5871 = vpow2.f32 %v3355_v15 }
0x1df5   :  { %v5870_v19 = vpop.eup %5869 }
0x1df6   :  { %v5872_v20 = vpop.eup %5871  ;;  %v3362_v21 = vsel %vm410_vm4, %v5870_v19, 0.0 }
0x1df7   :  { %3363 = vadd.xlane.f32.xlu1 %v3362_v21  ;;  %v3359_v22 = vsel %vm410_vm4, %v5872_v20, 0.0 }
0x1df8   :  { %3360 = vadd.xlane.f32.xlu0 %v3359_v22 }
0x1e84   :  { %v3364_v23 = vpop.xlane.xlu1 %3363 }
0x1e85   :  { %5873 = vrcp.f32 %v3364_v23  ;;  %v3361_v24 = vpop.xlane.xlu0 %3360 }
0x1e86   :  { %5875 = vrcp.f32 %v3361_v24 }
0x1e8f   :  { %v5874_v25 = vpop.eup %5873 }
0x1e90   :  { %v5876_v26 = vpop.eup %5875  ;;  %v3368_v29 = vmul.f32 %v5874_v25, %v5870_v19 }
0x1e91   :  { %v3367_v17 = vmul.f32 %v5876_v26, %v5872_v20 }
0x1e93   :  { %5512 = vmatprep.mubr.msk.f32.mxu0 %vm410_vm4, %v3367_v17 }
0x1e94   :  { %5513 = vmatmul.mubr.msk.f32.vlgmr.msra.gmra.mrb[66].mxu0 %vm410_vm4, %v3368_v29 }
0x1e95   :  { %5522 = vmatpush3.bf16.msra.mxu0 %v5780_v18  ;;  %5525 = vmatprep.mubr.msk.bf16.mxu0 %vm5924_vm1, %v5923_v16 }
0x1e96   :  { %5523 = vmatprep.subr.bf16.mxu0 %v5923_v16 }
0x1e99   :  { %5524 = vmatpush3.bf16.msra.mxu0 %v5781_v31  ;;  %v4919_v31 = vld [vmem:[%s6908_s10 + $0x1c] sm:$0xf] }
0x1e9a   :  { %5537 = vmatprep.subr.bf16.mxu0 %v5923_v16 }
0x1e9c   :  { %5526 = vmatmul.mubr.msk.bf16.vlgmr.msra.gmra.mrb[68].mxu0 %vm82_vm0, %v6470_v30 }
0x1e9d   :  { %5538 = vmatpush3.bf16.msra.mxu0 %v5782_v32  ;;  %5541 = vmatprep.mubr.msk.bf16.mxu0 %vm5924_vm1, %v5923_v16  ;;  %v3897_v32 = vsel %vm910_vm5, %v4919_v31, 0 }
0x1e9e   :  { %5539 = vmatprep.subr.bf16.mxu0 %v5923_v16 }
0x1ea1   :  { %5540 = vmatpush3.bf16.msra.mxu0 %v5783_v35 }
0x1ea2   :  { %5559 = vmatprep.subr.bf16.mxu0 %v5923_v16 }
0x1ea4   :  { %5542 = vmatmul.mubr.msk.bf16.vlgmr.msra.gmra.mrb[72].mxu0 %vm82_vm0, %v6470_v30 }
0x1ea5   :  { %5561 = vmatprep.mubr.msk.bf16.mxu0 %vm5924_vm1, %v5923_v16  ;;  %5560 = vmatpush3.bf16.msra.mxu0 %v3897_v32 }
0x1ea6   :  { %5573 = vmatprep.subr.bf16.mxu0 %v5923_v16 }
0x1f67   :  { %v5514_v39 = vpop.f32.mrb[66].mxu0 }
0x1f68   :  { %v3441_v40 = vpop.f32.mrb[67].mxu0 }
0x1f69   :  { %v3452_v42 = vpack.c.bf16 %v5514_v39, %v3441_v40 }
0x1f6b   :  { %5518 = vmatmul.mubr.msk.bf16.vlgmr.msra.gmra.mrb[76].mxu1 %vm322_vm2, %v3452_v42 }
0x1f6c   :  { %5530 = vmatpush3.bf16.msra.mxu1 %v5784_v41  ;;  %5533 = vmatprep.mubr.msk.bf16.mxu1 %vm5924_vm1, %v5923_v16 }
0x1f6d   :  { %5531 = vmatprep.subr.bf16.mxu1 %v5923_v16 }
0x1f6f   :  { %v3561_v45 = vpop.f32.mrb[68].mxu0 }
0x1f70   :  { %v5527_v46 = vpop.f32.mrb[69].mxu0  ;;  %5532 = vmatpush3.bf16.msra.mxu1 %v5785_v43  ;;  %v3562_v50 = vadd.f32 %v4891_v44, %v3561_v45  ;;  %v4922_v43 = vld [vmem:[%s6909_s11 + $0x1] ss:$0 sm:$0xff] }
0x1f71   :  { %v3564_v47 = vpop.f32.mrb[70].mxu0 }
0x1f72   :  { %v3565_v51 = vadd.f32 %v4891_v44, %v3564_v47  ;;  %v5528_v54 = vpop.f32.mrb[71].mxu0 }
0x1f73   :  { %5534 = vmatmul.mubr.msk.bf16.vlgmr.msra.gmra.mrb[80].mxu1 %vm82_vm0, %v6470_v30 }
0x1f74   :  { %5549 = vmatprep.mubr.msk.f32.mxu1 %vm322_vm2, %v3562_v50 }
0x1f77   :  { %v3693_v57 = vpop.f32.mrb[72].mxu0 }
0x1f78   :  { %v5543_v58 = vpop.f32.mrb[73].mxu0  ;;  %v3694_v60 = vadd.f32 %v4909_v56, %v3693_v57 }
0x1f79   :  { %v3696_v59 = vpop.f32.mrb[74].mxu0 }
0x1f7a   :  { %v3697_v61 = vadd.f32 %v4909_v56, %v3696_v59  ;;  %v5544_v62 = vpop.f32.mrb[75].mxu0 }
0x1f7c   :  { %v5711_v33 = vpack.c.bf16 %v3697_v61, %v3694_v60 }
0x203e   :  { %v3493_v63 = vpop.f32.mrb[76].mxu1 }
0x203f   :  { %v3500_v0 = vadd.f32 %v3493_v63, %v6648_v48  ;;  %v5519_v34 = vpop.f32.mrb[77].mxu1 }
0x2040   :  { %v3496_v1 = vpop.f32.mrb[78].mxu1  ;;  %v5787_v34 = vld [vmem:[%s6912_s14 + $0x18] sm:$0xff]  }
0x2041   :  { %v6721_v30 = vadd.f32 %v3496_v1, %v6650_v53  ;;  %v5520_v36 = vpop.f32.mrb[79].mxu1 }
0x2046   :  { %v3627_v5 = vpop.f32.mrb[80].mxu1 }
0x2047   :  { %v5535_v6 = vpop.f32.mrb[81].mxu1  ;;  %v3628_v8 = vadd.f32 %v4900_v3, %v3627_v5 }
0x2048   :  { %v3630_v7 = vpop.f32.mrb[82].mxu1 }
0x2049   :  { %v3631_v9 = vadd.f32 %v4900_v3, %v3630_v7  ;;  %v5536_v10 = vpop.f32.mrb[83].mxu1 }
0x204b   :  { %v5705_v11 = vpack.c.bf16 %v3631_v9, %v3628_v8  ;;  %v4925_v8 = vld [vmem:[%s6910_s12 + $0x1] ss:$0 sm:$0xff] }
0x204d   :  { %5707 = vmatprep.subr.msk.bf16.mxu1 %vm6139_vm3, %v5705_v11 }
0x204e   :  { %5710 = vmatpush3.bf16.xpose.msk.msra.mxu1 %vm6139_vm3, %v5705_v11 }
0x204f   :  { %5712 = vmatprep.subr.bf16.mxu1 %v5711_v33 }
0x2055   :  { %5550 = vmatmul.mubr.msk.f32.vlgmr.msra.gmra.mrb[84].mxu1 %vm322_vm2, %v3565_v51 }
0x2056   :  { %5714 = vmatpush3.bf16.msra.mxu1 %v5711_v33 }
0x2057   :  { %5565 = vmatprep.subr.bf16.mxu1 %v5923_v16 }
0x2128   :  { %v5551_v48 = vpop.f32.mrb[84].mxu1 }
0x2129   :  { %v3784_v53 = vadd.f32 %v6540_v2, %v5551_v48  ;;  %v3778_v49 = vpop.f32.mrb[85].mxu1 }
0x212a   :  { %v3779_v52 = vadd.f32 %v6546_v4, %v3778_v49 }
0x212b   :  { %v3790_v12 = vsel %vm410_vm4, %v3784_v53, -inf }
0x212c   :  { %3791 = vmax.xlane.f32.xlu1 %v3790_v12  ;;  %v3787_v13 = vsel %vm410_vm4, %v3779_v52, -inf }
0x212d   :  { %3788 = vmax.xlane.f32.xlu0 %v3787_v13 }
0x21b9   :  { %v3792_v55 = vpop.xlane.xlu1 %3791 }
0x21ba   :  { %v3794_v14 = vsub.f32 %v3784_v53, %v3792_v55  ;;  %v3789_v15 = vpop.xlane.xlu0 %3788  ;;  %v4926_v53 = vld [vmem:[%s6911_s13 + $0x1] ss:$0 sm:$0xff] }
0x21bb   :  { %v3793_v19 = vsub.f32 %v3779_v52, %v3789_v15  ;;  %v5788_v55 = vld [vmem:[%s6914_s16 + $0x40] sm:$0xff]   ;;  %v5790_v15 = vld [vmem:[%s6914_s16 + $0x50] sm:$0xff]  }
0x21bc   :  { %v3797_v20 = vmul.f32 1.442695, %v3794_v14  ;;  %v5789_v14 = vld [vmem:[%s6914_s16 + $0x48] sm:$0xff]  }
0x21bd   :  { %v3795_v21 = vmul.f32 1.442695, %v3793_v19  ;;  %v5791_v19 = vld [vmem:[%s6914_s16 + $0x58] sm:$0xff]  }
0x21be   :  { %5877 = vpow2.f32 %v3797_v20  ;;  %v5792_v20 = vld [vmem:[%s6914_s16 + $0x60] sm:$0xff]  }
0x21bf   :  { %5879 = vpow2.f32 %v3795_v21  ;;  %v5793_v21 = vld [vmem:[%s6914_s16 + $0x68] sm:$0xff]  }
0x21c8   :  { %v5878_v22 = vpop.eup %5877 }
0x21c9   :  { %v5880_v23 = vpop.eup %5879  ;;  %v3802_v2 = vsel %vm410_vm4, %v5878_v22, 0.0 }
0x21ca   :  { %3803 = vadd.xlane.f32.xlu1 %v3802_v2  ;;  %v3799_v4 = vsel %vm410_vm4, %v5880_v23, 0.0  ;;  %v4932_v2 = vld [vmem:[%s6913_s15 + $0x1] ss:$0 sm:$0xff] }
0x21cb   :  { %3800 = vadd.xlane.f32.xlu0 %v3799_v4 }
0x2257   :  { %v3804_v24 = vpop.xlane.xlu1 %3803 }
0x2258   :  { %5881 = vrcp.f32 %v3804_v24  ;;  %v3801_v25 = vpop.xlane.xlu0 %3800 }
0x2259   :  { %5883 = vrcp.f32 %v3801_v25 }
0x2262   :  { %v5882_v26 = vpop.eup %5881 }
0x2263   :  { %v5884_v17 = vpop.eup %5883  ;;  %v3808_v29 = vmul.f32 %v5882_v26, %v5878_v22  ;;  %v5794_v22 = vld [vmem:[%s6914_s16 + $0x70] sm:$0xff]  }
0x2264   :  { %v3807_v18 = vmul.f32 %v5884_v17, %v5880_v23  ;;  %v5795_v23 = vld [vmem:[%s6914_s16 + $0x78] sm:$0xff]  }
0x2266   :  { %5556 = vmatprep.mubr.msk.f32.mxu1 %vm410_vm4, %v3807_v18 }
0x2267   :  { %5557 = vmatmul.mubr.msk.f32.vlgmr.msra.gmra.mrb[86].mxu1 %vm410_vm4, %v3808_v29 }
0x2268   :  { %5569 = vmatprep.mubr.msk.bf16.mxu1 %vm5924_vm1, %v5923_v16 }
0x233a   :  { %v5558_v35 = vpop.f32.mrb[86].mxu1 }
0x233b   :  { %v3881_v37 = vpop.f32.mrb[87].mxu1 }
0x233c   :  { %v3892_v38 = vpack.c.bf16 %v5558_v35, %v3881_v37 }
0x233e   :  { %5562 = vmatmul.mubr.msk.bf16.vlgmr.msra.gmra.mrb[76].mxu0 %vm322_vm2, %v3892_v38 }
0x233f   :  { %5589 = vmatprep.mubr.msk.bf16.mxu0 %vm5924_vm1, %v5923_v16  ;;  %5574 = vmatpush3.bf16.msra.mxu0 %v5788_v55 }
0x2340   :  { %5575 = vmatprep.subr.bf16.mxu0 %v5923_v16 }
0x2343   :  { %5576 = vmatpush3.bf16.msra.mxu0 %v5789_v14 }
0x2344   :  { %5577 = vmatprep.subr.bf16.mxu0 %v5923_v16 }
0x2347   :  { %5578 = vmatpush3.bf16.msra.mxu0 %v5790_v15 }
0x2348   :  { %5579 = vmatprep.subr.bf16.mxu0 %v5923_v16 }
0x234b   :  { %5580 = vmatpush3.bf16.msra.mxu0 %v5791_v19 }
0x234c   :  { %5581 = vmatprep.subr.bf16.mxu0 %v5923_v16 }
0x234f   :  { %5582 = vmatpush3.bf16.msra.mxu0 %v5792_v20  ;;  %v4965_v20 = vld [vmem:[%s6917_s19 + $0x1] ss:$0 sm:$0xff] }
0x2350   :  { %5583 = vmatprep.subr.bf16.mxu0 %v5923_v16 }
0x2353   :  { %5584 = vmatpush3.bf16.msra.mxu0 %v5793_v21 }
0x2354   :  { %5585 = vmatprep.subr.bf16.mxu0 %v5923_v16 }
0x2357   :  { %5586 = vmatpush3.bf16.msra.mxu0 %v5794_v22 }
0x2358   :  { %5587 = vmatprep.subr.bf16.mxu0 %v5923_v16 }
0x235b   :  { %5588 = vmatpush3.bf16.msra.mxu0 %v5795_v23 }
0x235c   :  { %5621 = vmatprep.subr.bf16.mxu0 %v5923_v16 }
0x2411   :  { %v3933_v39 = vpop.f32.mrb[76].mxu0 }
0x2412   :  { %v3940_v40 = vadd.f32 %v3933_v39, %v3500_v0  ;;  %v5563_v41 = vpop.f32.mrb[77].mxu0  ;;  %v5786_v0 = vld [vmem:[%s6912_s14 + $0x10] sm:$0xff]  }
0x2413   :  { %v3936_v42 = vpop.f32.mrb[78].mxu0  ;;  %5566 = vmatpush3.bf16.msra.mxu1 %v5786_v0 }
0x2414   :  { %v3942_v44 = vadd.f32 %v3940_v40, %v6461_v27  ;;  %v3941_v45 = vadd.f32 %v3936_v42, %v6721_v30  ;;  %v5564_v46 = vpop.f32.mrb[79].mxu0  ;;  %5567 = vmatprep.subr.bf16.mxu1 %v5923_v16 }
0x2416   :  { %v3943_v47 = vadd.f32 %v3941_v45, %v6463_v28  ;;  %v3952_v50 = vadd.f32 %v4922_v43, %v3942_v44 }
0x2417   :  { %5568 = vmatpush3.bf16.msra.mxu1 %v5787_v34 }
0x2418   :  { %v3958_v51 = vsel %vm82_vm0, %v3952_v50, 0.0  ;;  %v3953_v54 = vadd.f32 %v4922_v43, %v3943_v47  ;;  %5593 = vmatprep.subr.bf16.mxu1 %v5923_v16 }
0x2419   :  { %3959 = vadd.xlane.f32.xlu0 %v3958_v51 }
0x241a   :  { %v3961_v56 = vsel %vm82_vm0, %v3953_v54, 0.0 }
0x241b   :  { %3962 = vadd.xlane.f32.xlu1 %v3961_v56 }
0x24a6   :  { %v3960_v57 = vpop.xlane.xlu0 %3959 }
0x24a7   :  { %v3964_v58 = vmul.f32 0.03125, %v3960_v57  ;;  %v4953_v57 = vld [vmem:[%s6915_s17 + $0x1] ss:$0 sm:$0xff] }
0x24a8   :  { %v3963_v59 = vpop.xlane.xlu1 %3962 }
0x24a9   :  { %v3966_v60 = vsub.f32 %v3952_v50, %v3964_v58  ;;  %v3965_v61 = vmul.f32 0.03125, %v3963_v59 }
0x24ab   :  { %v3967_v62 = vsub.f32 %v3953_v54, %v3965_v61  ;;  %v3968_v27 = vmul.f32 %v3966_v60, %v3966_v60 }
0x24ad   :  { %v3970_v33 = vsel %vm82_vm0, %v3968_v27, 0.0  ;;  %v3969_v63 = vmul.f32 %v3967_v62, %v3967_v62 }
0x24ae   :  { %3971 = vadd.xlane.f32.xlu0 %v3970_v33 }
0x24af   :  { %v3973_v28 = vsel %vm82_vm0, %v3969_v63, 0.0 }
0x24b0   :  { %3974 = vadd.xlane.f32.xlu1 %v3973_v28 }
0x253b   :  { %v3972_v1 = vpop.xlane.xlu0 %3971 }
0x253c   :  { %v3976_v30 = vmul.f32 0.03125, %v3972_v1 }
0x253d   :  { %v3975_v36 = vpop.xlane.xlu1 %3974 }
0x253e   :  { %v3978_v3 = vadd.f32 1e-12, %v3976_v30  ;;  %v3977_v5 = vmul.f32 0.03125, %v3975_v36 }
0x2540   :  { %5885 = vrsqrt.f32 %v3978_v3  ;;  %v3979_v6 = vadd.f32 1e-12, %v3977_v5 }
0x2542   :  { %5887 = vrsqrt.f32 %v3979_v6 }
0x254a   :  { %v5886_v7 = vpop.eup %5885 }
0x254b   :  { %v3982_v9 = vmul.f32 %v5886_v7, %v3966_v60 }
0x254c   :  { %v5888_v10 = vpop.eup %5887 }
0x254d   :  { %v3990_v11 = vmul.f32 %v4925_v8, %v3982_v9  ;;  %v3983_v48 = vmul.f32 %v5888_v10, %v3967_v62 }
0x254f   :  { %v3991_v49 = vmul.f32 %v4925_v8, %v3983_v48  ;;  %v6774_v52 = vadd.f32 %v4926_v53, %v3990_v11 }
0x2551   :  { %v6776_v12 = vadd.f32 %v4926_v53, %v3991_v49 }
0x2553   :  { %v4005_v13 = vpack.c.bf16 %v6776_v12, %v6774_v52 }
0x2555   :  { %5570 = vmatmul.mubr.msk.bf16.vlgmr.msra.gmra.mrb[88].mxu1 %vm82_vm0, %v4005_v13  ;;  %v4964_v13 = vld [vmem:[%s6916_s18 + $0x1] ss:$0 sm:$0xff] }
0x2556   :  { %5595 = vmatprep.mubr.msk.bf16.mxu1 %vm5924_vm1, %v5923_v16 }
0x2628   :  { %v4063_v4 = vpop.f32.mrb[88].mxu1 }
0x2629   :  { %v4064_v24 = vadd.f32 %v4932_v2, %v4063_v4  ;;  %v5571_v25 = vpop.f32.mrb[89].mxu1  ;;  %v5796_v4 = vld [vmem:[%s6920_s22] sm:$0xff]  }
0x262a   :  { %v4066_v26 = vpop.f32.mrb[90].mxu1  ;;  %v5798_v25 = vld [vmem:[%s6918_s20 + $0x8] sm:$0xff]  }
0x262b   :  { %v4070_v17 = vmul.f32 %v4064_v24, %v4064_v24  ;;  %v4067_v18 = vadd.f32 %v4932_v2, %v4066_v26  ;;  %v5572_v29 = vpop.f32.mrb[91].mxu1  ;;  %v5800_v26 = vld [vmem:[%s6920_s22 + $0x10] sm:$0xff]  }
0x262d   :  { %v4072_v31 = vmul.f32 %v4070_v17, %v4064_v24  ;;  %v4071_v32 = vmul.f32 %v4067_v18, %v4067_v18 }
0x262f   :  { %v4074_v35 = vmul.f32 0.044715, %v4072_v31  ;;  %v4073_v37 = vmul.f32 %v4071_v32, %v4067_v18 }
0x2631   :  { %v4076_v38 = vadd.f32 %v4074_v35, %v4064_v24  ;;  %v4075_v39 = vmul.f32 0.044715, %v4073_v37  ;;  %v5799_v35 = vld [vmem:[%s6920_s22 + $0x8] sm:$0xff]   ;;  %v5801_v37 = vld [vmem:[%s6918_s20 + $0x10] sm:$0xff]  }
0x2633   :  { %v4078_v40 = vmul.f32 0.7978846, %v4076_v38  ;;  %v4077_v41 = vadd.f32 %v4075_v39, %v4067_v18  ;;  %v5802_v38 = vld [vmem:[%s6918_s20 + $0x18] sm:$0xff]  }
0x2635   :  { %5889 = vtanh.f32 %v4078_v40  ;;  %v4079_v42 = vmul.f32 0.7978846, %v4077_v41 }
0x2637   :  { %5891 = vtanh.f32 %v4079_v42 }
0x263f   :  { %v5890_v43 = vpop.eup %5889 }
0x2640   :  { %v4082_v44 = vadd.f32 1.0, %v5890_v43 }
0x2641   :  { %v5892_v45 = vpop.eup %5891 }
0x2642   :  { %v4084_v46 = vmul.f32 0.5, %v4082_v44  ;;  %v4083_v47 = vadd.f32 1.0, %v5892_v45 }
0x2644   :  { %v4085_v50 = vmul.f32 0.5, %v4083_v47  ;;  %v4086_v51 = vmul.f32 %v4084_v46, %v4064_v24  ;;  %v5797_v24 = vld [vmem:[%s6918_s20] sm:$0xff]  }
0x2645   :  { %v5803_v47 = vld [vmem:[%s6918_s20 + $0x20] sm:$0xff]  }
0x2646   :  { %v4087_v54 = vmul.f32 %v4085_v50, %v4067_v18 }
0x2648   :  { %v4105_v56 = vpack.c.bf16 %v4087_v54, %v4086_v51  ;;  %v5804_v54 = vld [vmem:[%s6918_s20 + $0x28] sm:$0xff]   ;;  %s5925_s20 = smov [#allocation2]  }
0x264a   :  { %5590 = vmatmul.mubr.bf16.vlgmr.msra.gmra.mrb[80].mxu0 %v4105_v56  ;;  %v4968_v56 = vld [vmem:[%s6919_s21] ss:$0 sm:$0xff]  ;;  %s4629_s21 = sshll.u32 %s5925_s20, 4  ;;  %s4630_s21 = int_to_ptr.vmem [resolvable:$true] %s4629_s21 }
0x264b   :  { %5623 = vmatprep.mubr.msk.bf16.mxu0 %vm5924_vm1, %v5923_v16  ;;  %s5899_s28 = scalar_lea.vmem %s4630_s21, 32  ;;  %p5904_p1 = scmp.lt.s32.totalorder %s4630_s21, %s4630_s21 }
0x264c   :  { %p5900_p0 = scmp.ne.s32.totalorder %s4630_s21, %s5899_s28  ;;  %p5905_p2 = scmp.lt.s32.totalorder %s5899_s28, %s5899_s28 }
0x264e   :  { %p5906_p3 = por %p5905_p2, %p5904_p1 }
0x2650   :  { %p5907_p4 = pnand %p5906_p3, %p5900_p0 }
0x271d   :  { %v4196_v58 = vpop.f32.mrb[80].mxu0 }
0x271e   :  { %v4197_v59 = vadd.f32 %v4953_v57, %v4196_v58  ;;  %v5591_v60 = vpop.f32.mrb[81].mxu0 }
0x271f   :  { %v4199_v61 = vpop.f32.mrb[82].mxu0 }
0x2720   :  { %v4200_v62 = vadd.f32 %v4953_v57, %v4199_v61  ;;  %v5592_v27 = vpop.f32.mrb[83].mxu0  ;;  %v4203_v33 = vadd.f32 %v4197_v59, %v6774_v52 }
0x2722   :  { %v4209_v63 = vsel %vm82_vm0, %v4203_v33, 0.0  ;;  %v4204_v28 = vadd.f32 %v4200_v62, %v6776_v12 }
0x2723   :  { %4210 = vadd.xlane.f32.xlu0 %v4209_v63 }
0x2724   :  { %v4212_v0 = vsel %vm82_vm0, %v4204_v28, 0.0 }
0x2725   :  { %4213 = vadd.xlane.f32.xlu1 %v4212_v0 }
0x27b0   :  { %v4211_v34 = vpop.xlane.xlu0 %4210 }
0x27b1   :  { %v4215_v1 = vmul.f32 0.03125, %v4211_v34 }
0x27b2   :  { %v4214_v30 = vpop.xlane.xlu1 %4213 }
0x27b3   :  { %v4217_v36 = vsub.f32 %v4203_v33, %v4215_v1  ;;  %v4216_v3 = vmul.f32 0.03125, %v4214_v30 }
0x27b5   :  { %v4218_v5 = vsub.f32 %v4204_v28, %v4216_v3  ;;  %v4219_v6 = vmul.f32 %v4217_v36, %v4217_v36 }
0x27b7   :  { %v4221_v7 = vsel %vm82_vm0, %v4219_v6, 0.0  ;;  %v4220_v8 = vmul.f32 %v4218_v5, %v4218_v5 }
0x27b8   :  { %4222 = vadd.xlane.f32.xlu0 %v4221_v7 }
0x27b9   :  { %v4224_v9 = vsel %vm82_vm0, %v4220_v8, 0.0 }
0x27ba   :  { %4225 = vadd.xlane.f32.xlu1 %v4224_v9 }
0x2845   :  { %v4223_v10 = vpop.xlane.xlu0 %4222 }
0x2846   :  { %v4227_v11 = vmul.f32 0.03125, %v4223_v10 }
0x2847   :  { %v4226_v48 = vpop.xlane.xlu1 %4225 }
0x2848   :  { %v4229_v53 = vadd.f32 1e-12, %v4227_v11  ;;  %v4228_v49 = vmul.f32 0.03125, %v4226_v48 }
0x284a   :  { %5893 = vrsqrt.f32 %v4229_v53  ;;  %v4230_v52 = vadd.f32 1e-12, %v4228_v49 }
0x284c   :  { %5895 = vrsqrt.f32 %v4230_v52 }
0x2854   :  { %v5894_v12 = vpop.eup %5893 }
0x2855   :  { %v4233_v55 = vmul.f32 %v5894_v12, %v4217_v36 }
0x2856   :  { %v5896_v14 = vpop.eup %5895 }
0x2857   :  { %v4234_v15 = vmul.f32 %v5896_v14, %v4218_v5  ;;  %v4241_v19 = vmul.f32 %v4964_v13, %v4233_v55 }
0x2859   :  { %v4242_v21 = vmul.f32 %v4964_v13, %v4234_v15  ;;  %v4249_v22 = vadd.f32 %v4965_v20, %v4241_v19 }
0x285b   :  { %v4250_v23 = vadd.f32 %v4965_v20, %v4242_v21 }
0x285d   :  { %v4253_v2 = vpack.c.bf16 %v4250_v23, %v4249_v22 }
0x285f   :  { %5594 = vmatpush3.bf16.msra.mxu1 %v4253_v2  ;;  %5622 = vmatpush3.bf16.msra.mxu0 %v4253_v2 }
0x2860   :  { %5599 = vmatprep.subr.bf16.mxu1 %v5923_v16 }
0x2862   :  { %5596 = vmatmul.mubr.msk.bf16.vlgmr.msra.gmra.mrb[92].mxu1 %vm410_vm4, %v5796_v4  ;;  %5624 = vmatmul.mubr.msk.bf16.vlgmr.msra.gmra.mrb[84].mxu0 %vm410_vm4, %v5800_v26 }
0x2863   :  { %5600 = vmatpush3.bf16.msra.mxu1 %v5797_v24  ;;  %5603 = vmatprep.mubr.msk.bf16.mxu1 %vm5924_vm1, %v5923_v16 }
0x2864   :  { %5601 = vmatprep.subr.bf16.mxu1 %v5923_v16 }
0x2867   :  { %5602 = vmatpush3.bf16.msra.mxu1 %v5798_v25 }
0x2868   :  { %5607 = vmatprep.subr.bf16.mxu1 %v5923_v16 }
0x2935   :  { %v4296_v17 = vpop.f32.mrb[92].mxu1  ;;  %v4532_v39 = vpop.f32.mrb[84].mxu0 }
0x2936   :  { %v5597_v18 = vpop.f32.mrb[93].mxu1  ;;  %v5625_v40 = vpop.f32.mrb[85].mxu0 }
0x2937   :  { %v4299_v29 = vpop.f32.mrb[94].mxu1  ;;  %v4535_v41 = vpop.f32.mrb[86].mxu0 }
0x2938   :  { %v4307_v31 = vpack.c.bf16 %v4299_v29, %v4296_v17  ;;  %v5598_v32 = vpop.f32.mrb[95].mxu1  ;;  %v4544_v42 = vpack.c.bf16 %v4535_v41, %v4532_v39  ;;  %v5626_v43 = vpop.f32.mrb[87].mxu0 }
0x293a   :  { %5604 = vmatmul.mubr.msk.bf16.vlgmr.msra.gmra.mrb[96].mxu1 %vm82_vm0, %v4307_v31 }
0x293b   :  { %5608 = vmatpush3.bf16.msra.mxu1 %v4253_v2  ;;  %5609 = vmatprep.mubr.msk.bf16.mxu1 %vm5924_vm1, %v5923_v16 }
0x293c   :  { %5613 = vmatprep.subr.bf16.mxu1 %v5923_v16 }
0x2942   :  { %5610 = vmatmul.mubr.msk.bf16.vlgmr.msra.gmra.mrb[100].mxu1 %vm410_vm4, %v5799_v35 }
0x2943   :  { %5614 = vmatpush3.bf16.msra.mxu1 %v5801_v37  ;;  %5617 = vmatprep.mubr.msk.bf16.mxu1 %vm5924_vm1, %v5923_v16 }
0x2944   :  { %5615 = vmatprep.subr.bf16.mxu1 %v5923_v16 }
0x2947   :  { %5616 = vmatpush3.bf16.msra.mxu1 %v5802_v38 }
0x2948   :  { %5627 = vmatprep.subr.bf16.mxu1 %v5923_v16 }
0x2a15   :  { %v4416_v44 = vpop.f32.mrb[100].mxu1 }
0x2a16   :  { %v5611_v45 = vpop.f32.mrb[101].mxu1 }
0x2a17   :  { %v4419_v46 = vpop.f32.mrb[102].mxu1 }
0x2a18   :  { %v4428_v50 = vpack.c.bf16 %v4419_v46, %v4416_v44  ;;  %v5612_v51 = vpop.f32.mrb[103].mxu1 }
0x2a1a   :  { %5618 = vmatmul.mubr.msk.bf16.vlgmr.msra.gmra.mrb[96].mxu1 %vm82_vm0, %v4428_v50 }
0x2a1b   :  { %5628 = vmatpush3.bf16.msra.mxu1 %v5803_v47  ;;  %5631 = vmatprep.mubr.msk.bf16.mxu1 %vm5924_vm1, %v5923_v16 }
0x2a1c   :  { %5629 = vmatprep.subr.bf16.mxu1 %v5923_v16 }
0x2a1f   :  { %5630 = vmatpush3.bf16.msra.mxu1 %v5804_v54 }
0x2a26   :  { %5632 = vmatmul.mubr.msk.bf16.vlgmr.msra.gmra.mrb[96].mxu1 %vm82_vm0, %v4544_v42 }
0x2af9   :  { %v4594_v57 = vpop.f32.mrb[96].mxu1 }
0x2afa   :  { %v5715_v58 = vadd.f32 %v4968_v56, %v4594_v57  ;;  %v5633_v59 = vpop.f32.mrb[97].mxu1 }
0x2afb   :  { %v4597_v60 = vpop.f32.mrb[98].mxu1 }
0x2afc   :  { %v4603_v61 = vmax.f32 %v5715_v58, 0.0  ;;  %v5716_v62 = vadd.f32 %v4968_v56, %v4597_v60  ;;  %v5634_v27 = vpop.f32.mrb[99].mxu1 }
0x2afe   :  { %v4605_v33 = vrot.slane %v4603_v61, 4  ;;  %v4604_v63 = vmax.f32 %v5716_v62, 0.0 }
0x2b00   :  { %v4606_v28 = vmax.f32 %v4603_v61, %v4605_v33  ;;  %v4611_v0 = vrot.slane %v4604_v63, 4 }
0x2b02   :  { %v4607_v34 = vrot.slane %v4606_v28, 2  ;;  %v4612_v16 = vmax.f32 %v4604_v63, %v4611_v0 }
0x2b04   :  { %v4608_v1 = vmax.f32 %v4606_v28, %v4607_v34  ;;  %v4613_v30 = vrot.slane %v4612_v16, 2 }
0x2b06   :  { %v4609_v36 = vrot.slane %v4608_v1, 1  ;;  %v4614_v3 = vmax.f32 %v4612_v16, %v4613_v30 }
0x2b08   :  { %v4615_v5 = vrot.slane %v4614_v3, 1  ;;  %v4610_v6 = vmax.f32 %v4608_v1, %v4609_v36 }
0x2b0a   :  { %v4616_v7 = vmax.f32 %v4614_v3, %v4615_v5 }
0x2b0c   :  { %v4620_v8 = vsel %vm4619_vm6, %v4616_v7, %v4610_v6 }
0x2b0d   :  { %4622 = vst [vmem:[#allocation2] sm:$0x3] %v4620_v8 }
0x2b0e   :  { %5910 = shalt.err (!%p5907_p4)
}
0x2b0f   :  { %s5911_s16 = scalar_lea.hbm %s6921_s23, 32 }
0x2b10   :  { %p5912_p5 = scmp.ne.s32.totalorder %s6921_s23, %s5911_s16  ;;  %p5915_p6 = scmp.lt.u32.totalorder %s5911_s16, %s6921_s23 }
0x2b12   :  { %p5917_p7 = pnand %p5915_p6, %p5912_p5 }
0x2b14   :  { %5920 = shalt.err (!%p5917_p7)
}
0x2b15   :  { %4632 = dma.vmem_to_hbm [thread:$0]  %s4630_s21, 32, %s6921_s23, [#allocation3]  }
0x2b16   :  { %5921 = dma.done.wait [#allocation3], 32  }
0x2b17   :  { %5922 = vsyncadd [#allocation3], 4294967264 }
0x2b18   :  { %4636 = vsyncpa [#allocation3], 1 }

</bundles_post_ra>
